<compile_context>
chip_gen: v5e
topology: v5e:2x2
jax: 0.10.0
libtpu: 0.0.40
codegen_flags: <defaults>
</compile_context>

<pallas_src>
import functools
import math

import jax
import jax.numpy as jnp
from jax.experimental import pallas as pl
from jax.experimental.pallas import tpu as pltpu


def _gru_seq_kernel(prex_ref, h0_ref, wh_ref, g_ref, b_ref, out_ref, h_scr,
                    *, size, eps, tt):
    """One grid step = `tt` timesteps of the recurrence.

    prex_ref : (tt, B, 3*size) f32  -- precomputed x_t @ Wx, streamed per block
    h0_ref   : (B, size)            -- initial state (used only at block 0)
    wh_ref   : (size, 3*size)       -- recurrent weight (bf16 or f32), resident
    g_ref    : (1, 3*size) f32      -- LayerNorm gamma, resident
    b_ref    : (1, 3*size) f32      -- LayerNorm beta (+update_bias folded in)
    out_ref  : (tt, B, size) f32    -- hidden states for this time block
    h_scr    : (B, size) f32        -- carried hidden state across grid steps
    """
    blk = pl.program_id(0)

    @pl.when(blk == 0)
    def _():
        h_scr[...] = h0_ref[...].astype(jnp.float32)

    # Hoist invariant loads out of the inner time loop (JAX does not CSE
    # broadcast_in_dim; re-loading per step would duplicate work).
    wh = wh_ref[...]                # (size, 3*size), matmul dtype
    gamma = g_ref[...]              # (1, 3*size) f32
    beta = b_ref[...]               # (1, 3*size) f32, update_bias folded in
    inv_n = 1.0 / (3.0 * size)

    def step(t, h):
        # Serial-critical-path work: one fused N=3*size MXU matmul + epilogue.
        parts = prex_ref[t] + jnp.dot(h.astype(wh.dtype), wh,
                                      preferred_element_type=jnp.float32)
        # LayerNorm over the full 3*size feature axis (biased variance, f32).
        mean = parts.sum(-1, keepdims=True) * inv_n
        cen = parts - mean
        var = (cen * cen).sum(-1, keepdims=True) * inv_n
        norm = cen * jax.lax.rsqrt(var + eps) * gamma + beta
        # Gate slices: lane-aligned (free) whenever size % 128 == 0.
        reset = jax.nn.sigmoid(norm[:, :size])
        cand = jnp.tanh(reset * norm[:, size:2 * size])
        update = jax.nn.sigmoid(norm[:, 2 * size:])
        h_new = h + update * (cand - h)   # == update*cand + (1-update)*h
        out_ref[t] = h_new
        return h_new

    h_scr[...] = jax.lax.fori_loop(0, tt, step, h_scr[...], unroll=True)


def gru_sequence_forward(x_seq, h0, w, ln_g, ln_b, *, size,
                         update_bias=-1.0, eps=1e-3,
                         time_block=None, mm_dtype=jnp.bfloat16):
    """Run the GRUCell over x_seq (T, B, inp) from state h0 (B, size).

    w    : (inp + size, 3*size)  -- pre-transposed nn.Linear weight (no bias)
    ln_g : (3*size,) LayerNorm gamma;  ln_b : (3*size,) LayerNorm beta
    Returns all hidden states (T, B, size) in f32; final state is out[-1].

    time_block: timesteps processed per grid step (must divide T; default = T).
    mm_dtype  : MXU operand dtype (bf16 default); state/LN/gates stay f32.
    """
    T, B, inp = x_seq.shape
    fan_in = inp + size
    assert w.shape == (fan_in, 3 * size)
    tt = T if time_block is None else int(time_block)
    assert T % tt == 0, "time_block must divide T"
    n_blocks = T // tt

    # Split the fused weight into the input-side and recurrent-side slabs.
    wx = w[:inp].astype(mm_dtype)        # (inp, 3*size)
    wh = w[inp:].astype(mm_dtype)        # (size, 3*size)
    g_full = jnp.reshape(ln_g, (1, 3 * size)).astype(jnp.float32)
    b_full = jnp.reshape(ln_b, (1, 3 * size)).astype(jnp.float32)
    # Fold update_bias into the update-gate third of the LayerNorm beta.
    b_full = b_full.at[:, 2 * size:].add(jnp.float32(update_bias))

    # Hoist the time-parallel input projection off the serial recurrence:
    # one big (T*B, inp) @ (inp, 3*size) matmul, f32 accumulation.
    pre_x = jnp.dot(x_seq.reshape(T * B, inp).astype(mm_dtype), wx,
                    preferred_element_type=jnp.float32).reshape(T, B, 3 * size)

    kernel = functools.partial(_gru_seq_kernel, size=size, eps=float(eps), tt=tt)

    grid_spec = pltpu.PrefetchScalarGridSpec(
        num_scalar_prefetch=0,
        grid=(n_blocks,),
        in_specs=[
            # Streamed per time block (double-buffered by the pipeline).
            pl.BlockSpec((tt, B, 3 * size), lambda i: (i, 0, 0)),
            # Resident across the whole rollout (constant index maps).
            pl.BlockSpec((B, size), lambda i: (0, 0)),
            pl.BlockSpec((size, 3 * size), lambda i: (0, 0),
                         pipeline_mode=pl.Buffered(1)),   # weight: single buffer
            pl.BlockSpec((1, 3 * size), lambda i: (0, 0)),
            pl.BlockSpec((1, 3 * size), lambda i: (0, 0)),
        ],
        out_specs=pl.BlockSpec((tt, B, size), lambda i: (i, 0, 0)),
        scratch_shapes=[pltpu.VMEM((B, size), jnp.float32)],   # carried state
    )

    # Explicit VMEM budget (weights + double-buffered pre_x/out + scratch),
    # with headroom; capped at 64 MiB so it is valid on v7x as well.
    mm_bytes = jnp.dtype(mm_dtype).itemsize
    est = (size * 3 * size * mm_bytes          # Wh (single-buffered)
           + 2 * tt * B * 3 * size * 4         # pre_x, double-buffered
           + 2 * tt * B * size * 4             # out, double-buffered
           + 2 * B * size * 4                  # h0 + scratch
           + 2 * 3 * size * 4)                 # gamma, beta
    vmem_limit = int(min(64 << 20, max(2 * est + (4 << 20), 16 << 20)))

    # NOTE: time is inherently serial; batch is the only intra-chip parallel
    # axis.  For production rollouts pack multiple sequences into B (>=128)
    # and, on v7x, shard that batch over the two TensorCores.
    return pl.pallas_call(
        kernel,
        out_shape=jax.ShapeDtypeStruct((T, B, size), jnp.float32),
        grid_spec=grid_spec,
        compiler_params=pltpu.CompilerParams(
            dimension_semantics=("arbitrary",),      # sequential recurrence
            vmem_limit_bytes=vmem_limit),
    )(pre_x, h0.astype(jnp.float32), wh, g_full, b_full)


def gru_cell_forward(inputs, state, w, ln_g, ln_b, *, size,
                     update_bias=-1.0, eps=1e-3, mm_dtype=jnp.bfloat16):
    """Single-step convenience wrapper (matches the module's forward)."""
    out = gru_sequence_forward(inputs[None], state, w, ln_g, ln_b, size=size,
                               update_bias=update_bias, eps=eps,
                               mm_dtype=mm_dtype)
    return out[0]


def gru_sequence_reference(x_seq, h0, w, ln_g, ln_b, *, size,
                           update_bias=-1.0, eps=1e-3, mm_dtype=jnp.float32):
    """Pure-JAX reference mirroring the PyTorch module, unrolled over time."""
    g = jnp.reshape(ln_g, (1, 3 * size)).astype(jnp.float32)
    b = jnp.reshape(ln_b, (1, 3 * size)).astype(jnp.float32)
    wm = w.astype(mm_dtype)

    def step(h, x):
        xh = jnp.concatenate([x, h], axis=-1).astype(mm_dtype)
        parts = jnp.dot(xh, wm, preferred_element_type=jnp.float32)
        mean = jnp.mean(parts, axis=-1, keepdims=True)
        var = jnp.mean((parts - mean) ** 2, axis=-1, keepdims=True)
        parts = (parts - mean) * jax.lax.rsqrt(var + eps) * g + b
        reset, cand, update = jnp.split(parts, 3, axis=-1)
        reset = jax.nn.sigmoid(reset)
        cand = jnp.tanh(reset * cand)
        update = jax.nn.sigmoid(update + update_bias)
        h_new = update * cand + (1.0 - update) * h
        return h_new, h_new

    _, ys = jax.lax.scan(step, h0, x_seq)
    return ys


def _make_params(key, inp, size):
    fan_in = inp + size
    bound = 1.0 / math.sqrt(fan_in)
    kw, kg, kb = jax.random.split(key, 3)
    w = jax.random.uniform(kw, (fan_in, 3 * size), jnp.float32,
                           minval=-bound, maxval=bound)
    # Non-trivial affine to exercise the LayerNorm path (default init is 1/0).
    ln_g = 1.0 + 0.1 * jax.random.normal(kg, (3 * size,), jnp.float32)
    ln_b = 0.1 * jax.random.normal(kb, (3 * size,), jnp.float32)
    return w, ln_g, ln_b


def _check(key, T, B, INP, SIZE, mm_dtype, time_block, atol):
    kx, kh, kp = jax.random.split(key, 3)
    x_seq = jax.random.normal(kx, (T, B, INP), jnp.float32)
    h0 = jax.random.normal(kh, (B, SIZE), jnp.float32)
    w, ln_g, ln_b = _make_params(kp, INP, SIZE)

    out = gru_sequence_forward(x_seq, h0, w, ln_g, ln_b, size=SIZE,
                               time_block=time_block, mm_dtype=mm_dtype)
    out = jax.block_until_ready(out)
    ref = gru_sequence_reference(x_seq, h0, w, ln_g, ln_b, size=SIZE,
                                 mm_dtype=mm_dtype)

    assert out.shape == (T, B, SIZE)
    err = float(jnp.max(jnp.abs(out - ref)))
    assert err <= atol, f"max abs err {err} > {atol}"
    return out


if __name__ == "__main__":
    root = jax.random.PRNGKey(0)
    k1, k2, k3 = jax.random.split(root, 3)

    # 1) Main config: lane-dense size=128, whole 16-step rollout in a single
    #    grid step (grid=(1,)), bf16 MXU operands, hoisted x-projection.
    _check(k1, T=16, B=8, INP=64, SIZE=128,
           mm_dtype=jnp.bfloat16, time_block=None, atol=5e-3)

    # 2) Same shapes in f32 with time_block=4 (grid=(4,)): exercises the
    #    carried-state path across grid steps; tight tolerance vs. reference.
    _check(k2, T=16, B=8, INP=64, SIZE=128,
           mm_dtype=jnp.float32, time_block=4, atol=1e-4)

    # 3) Small / misaligned config at the original module scale (size=32):
    #    fused-gate slicing is lane-misaligned here but still correct.
    _check(k3, T=4, B=4, INP=32, SIZE=32,
           mm_dtype=jnp.float32, time_block=None, atol=1e-4)

    # Single-step API parity with the PyTorch forward.
    kx, kh, kp = jax.random.split(k1, 3)
    x1 = jax.random.normal(kx, (8, 64), jnp.float32)
    h1 = jax.random.normal(kh, (8, 128), jnp.float32)
    w1, g1, b1 = _make_params(kp, 64, 128)
    y1 = jax.block_until_ready(
        gru_cell_forward(x1, h1, w1, g1, b1, size=128, mm_dtype=jnp.float32))
    assert y1.shape == (8, 128)

    print("KERNEL_OK")
</pallas_src>

<mosaic_0001>
module attributes {stable_mosaic.version = 11 : i64} {
  func.func @_gru_seq_kernel(%arg0: i32, %arg1: memref<16x8x384xf32, #tpu.memory_space<vmem>>, %arg2: memref<8x128xf32, #tpu.memory_space<vmem>>, %arg3: memref<128x384xbf16, #tpu.memory_space<vmem>>, %arg4: memref<1x384xf32, #tpu.memory_space<vmem>>, %arg5: memref<1x384xf32, #tpu.memory_space<vmem>>, %arg6: memref<16x8x128xf32, #tpu.memory_space<vmem>>, %arg7: memref<8x128xf32, #tpu.memory_space<vmem>>) attributes {dimension_semantics = [#tpu.dimension_semantics<arbitrary>], iteration_bounds = array<i64: 1>, scalar_prefetch = 0 : i64, scratch_operands = 1 : i64, tpu.core_type = #tpu.core_type<tc>, window_params = [{transform_indices = @transform_0, window_bounds = array<i64: 16, 8, 384>}, {pipeline_mode = #tpu.pipeline_mode<synchronous>, transform_indices = @transform_1, window_bounds = array<i64: 8, 128>}, {pipeline_mode = #tpu.pipeline_mode<synchronous>, transform_indices = @transform_2, window_bounds = array<i64: 128, 384>}, {pipeline_mode = #tpu.pipeline_mode<synchronous>, transform_indices = @transform_3, window_bounds = array<i64: 1, 384>}, {pipeline_mode = #tpu.pipeline_mode<synchronous>, transform_indices = @transform_4, window_bounds = array<i64: 1, 384>}, {transform_indices = @transform_5, window_bounds = array<i64: 16, 8, 128>}]} {
    %c0_i32 = arith.constant 0 : i32
    %0 = arith.cmpi eq, %arg0, %c0_i32 : i32
    %1 = arith.extui %0 : i1 to i32
    %c0_i32_0 = arith.constant 0 : i32
    %2 = arith.cmpi ne, %1, %c0_i32_0 : i32
    scf.if %2 {
      %c0_202 = arith.constant 0 : index
      %c0_203 = arith.constant 0 : index
      %776 = vector.load %arg2[%c0_202, %c0_203] : memref<8x128xf32, #tpu.memory_space<vmem>>, vector<8x128xf32>
      %c0_204 = arith.constant 0 : index
      %c0_205 = arith.constant 0 : index
      %777 = vector.load %arg7[%c0_204, %c0_205] : memref<8x128xf32, #tpu.memory_space<vmem>>, vector<8x128xf32>
      tpu.vector_store %arg7[%c0_204, %c0_205], %776 {strides = array<i32>} : memref<8x128xf32, #tpu.memory_space<vmem>>, vector<8x128xf32>,
    } else {
    }
    %c0 = arith.constant 0 : index
    %c0_1 = arith.constant 0 : index
    %3 = vector.load %arg3[%c0, %c0_1] : memref<128x384xbf16, #tpu.memory_space<vmem>>, vector<128x384xbf16>
    %c0_2 = arith.constant 0 : index
    %c0_3 = arith.constant 0 : index
    %4 = vector.load %arg4[%c0_2, %c0_3] : memref<1x384xf32, #tpu.memory_space<vmem>>, vector<1x384xf32>
    %c0_4 = arith.constant 0 : index
    %c0_5 = arith.constant 0 : index
    %5 = vector.load %arg5[%c0_4, %c0_5] : memref<1x384xf32, #tpu.memory_space<vmem>>, vector<1x384xf32>
    %c0_6 = arith.constant 0 : index
    %c0_7 = arith.constant 0 : index
    %6 = vector.load %arg7[%c0_6, %c0_7] : memref<8x128xf32, #tpu.memory_space<vmem>>, vector<8x128xf32>
    %c0_i32_8 = arith.constant 0 : i32
    %7 = arith.index_cast %c0_i32_8 : i32 to index
    %c0_9 = arith.constant 0 : index
    %c0_10 = arith.constant 0 : index
    %8 = vector.load %arg1[%7, %c0_9, %c0_10] : memref<16x8x384xf32, #tpu.memory_space<vmem>>, vector<1x8x384xf32>
    %9 = vector.shape_cast %8 : vector<1x8x384xf32> to vector<8x384xf32>
    %10 = arith.truncf %6 : vector<8x128xf32> to vector<8x128xbf16>
    %cst = arith.constant dense<0.000000e+00> : vector<8x384xf32>
    %11 = tpu.matmul %10, %3, %cst {dimension_numbers = #tpu.dot_dimension_numbers<[1], [0], [0], [1], [0, 0, 1, 1], [], []>} : vector<8x128xbf16>, vector<128x384xbf16>, vector<8x384xf32> -> vector<8x384xf32>
    %12 = arith.addf %9, %11 : vector<8x384xf32>
    %cst_11 = arith.constant dense<0.000000e+00> : vector<8xf32>
    %13 = vector.multi_reduction <add>, %12, %cst_11 [1] : vector<8x384xf32> to vector<8xf32>
    %14 = vector.shape_cast %13 : vector<8xf32> to vector<8x1xf32>
    %cst_12 = arith.constant 0.00260416674 : f32
    %15 = vector.broadcast %cst_12 : f32 to vector<8x1xf32>
    %16 = arith.mulf %14, %15 : vector<8x1xf32>
    %17 = vector.broadcast %16 : vector<8x1xf32> to vector<8x384xf32>
    %18 = arith.subf %12, %17 : vector<8x384xf32>
    %19 = arith.mulf %18, %18 : vector<8x384xf32>
    %cst_13 = arith.constant dense<0.000000e+00> : vector<8xf32>
    %20 = vector.multi_reduction <add>, %19, %cst_13 [1] : vector<8x384xf32> to vector<8xf32>
    %21 = vector.shape_cast %20 : vector<8xf32> to vector<8x1xf32>
    %cst_14 = arith.constant 0.00260416674 : f32
    %22 = vector.broadcast %cst_14 : f32 to vector<8x1xf32>
    %23 = arith.mulf %21, %22 : vector<8x1xf32>
    %cst_15 = arith.constant 1.000000e-03 : f32
    %24 = vector.broadcast %cst_15 : f32 to vector<8x1xf32>
    %25 = arith.addf %23, %24 : vector<8x1xf32>
    %26 = math.rsqrt %25 : vector<8x1xf32>
    %27 = vector.broadcast %26 : vector<8x1xf32> to vector<8x384xf32>
    %28 = arith.mulf %18, %27 : vector<8x384xf32>
    %29 = vector.broadcast %4 : vector<1x384xf32> to vector<8x384xf32>
    %30 = arith.mulf %28, %29 : vector<8x384xf32>
    %31 = vector.broadcast %5 : vector<1x384xf32> to vector<8x384xf32>
    %32 = arith.addf %30, %31 : vector<8x384xf32>
    %33 = vector.extract_strided_slice %32 {offsets = [0, 0], sizes = [8, 128], strides = [1, 1]} : vector<8x384xf32> to vector<8x128xf32>
    %34 = arith.negf %33 : vector<8x128xf32>
    %35 = math.exp %34 : vector<8x128xf32>
    %cst_16 = arith.constant 1.000000e+00 : f32
    %36 = vector.broadcast %cst_16 : f32 to vector<8x128xf32>
    %37 = arith.addf %36, %35 : vector<8x128xf32>
    %38 = arith.divf %36, %37 : vector<8x128xf32>
    %39 = vector.extract_strided_slice %32 {offsets = [0, 128], sizes = [8, 128], strides = [1, 1]} : vector<8x384xf32> to vector<8x128xf32>
    %40 = arith.mulf %38, %39 : vector<8x128xf32>
    %41 = math.tanh %40 : vector<8x128xf32>
    %42 = vector.extract_strided_slice %32 {offsets = [0, 256], sizes = [8, 128], strides = [1, 1]} : vector<8x384xf32> to vector<8x128xf32>
    %43 = arith.negf %42 : vector<8x128xf32>
    %44 = math.exp %43 : vector<8x128xf32>
    %cst_17 = arith.constant 1.000000e+00 : f32
    %45 = vector.broadcast %cst_17 : f32 to vector<8x128xf32>
    %46 = arith.addf %45, %44 : vector<8x128xf32>
    %47 = arith.divf %45, %46 : vector<8x128xf32>
    %48 = arith.subf %41, %6 : vector<8x128xf32>
    %49 = arith.mulf %47, %48 : vector<8x128xf32>
    %50 = arith.addf %6, %49 : vector<8x128xf32>
    %51 = arith.index_cast %c0_i32_8 : i32 to index
    %c0_18 = arith.constant 0 : index
    %c0_19 = arith.constant 0 : index
    %52 = vector.load %arg6[%51, %c0_18, %c0_19] : memref<16x8x128xf32, #tpu.memory_space<vmem>>, vector<1x8x128xf32>
    %53 = vector.shape_cast %52 : vector<1x8x128xf32> to vector<8x128xf32>
    %54 = vector.shape_cast %50 : vector<8x128xf32> to vector<1x8x128xf32>
    tpu.vector_store %arg6[%51, %c0_18, %c0_19], %54 {strides = array<i32>} : memref<16x8x128xf32, #tpu.memory_space<vmem>>, vector<1x8x128xf32>,
    %c1_i32 = arith.constant 1 : i32
    %55 = arith.index_cast %c1_i32 : i32 to index
    %c0_20 = arith.constant 0 : index
    %c0_21 = arith.constant 0 : index
    %56 = vector.load %arg1[%55, %c0_20, %c0_21] : memref<16x8x384xf32, #tpu.memory_space<vmem>>, vector<1x8x384xf32>
    %57 = vector.shape_cast %56 : vector<1x8x384xf32> to vector<8x384xf32>
    %58 = arith.truncf %50 : vector<8x128xf32> to vector<8x128xbf16>
    %cst_22 = arith.constant dense<0.000000e+00> : vector<8x384xf32>
    %59 = tpu.matmul %58, %3, %cst_22 {dimension_numbers = #tpu.dot_dimension_numbers<[1], [0], [0], [1], [0, 0, 1, 1], [], []>} : vector<8x128xbf16>, vector<128x384xbf16>, vector<8x384xf32> -> vector<8x384xf32>
    %60 = arith.addf %57, %59 : vector<8x384xf32>
    %cst_23 = arith.constant dense<0.000000e+00> : vector<8xf32>
    %61 = vector.multi_reduction <add>, %60, %cst_23 [1] : vector<8x384xf32> to vector<8xf32>
    %62 = vector.shape_cast %61 : vector<8xf32> to vector<8x1xf32>
    %cst_24 = arith.constant 0.00260416674 : f32
    %63 = vector.broadcast %cst_24 : f32 to vector<8x1xf32>
    %64 = arith.mulf %62, %63 : vector<8x1xf32>
    %65 = vector.broadcast %64 : vector<8x1xf32> to vector<8x384xf32>
    %66 = arith.subf %60, %65 : vector<8x384xf32>
    %67 = arith.mulf %66, %66 : vector<8x384xf32>
    %cst_25 = arith.constant dense<0.000000e+00> : vector<8xf32>
    %68 = vector.multi_reduction <add>, %67, %cst_25 [1] : vector<8x384xf32> to vector<8xf32>
    %69 = vector.shape_cast %68 : vector<8xf32> to vector<8x1xf32>
    %cst_26 = arith.constant 0.00260416674 : f32
    %70 = vector.broadcast %cst_26 : f32 to vector<8x1xf32>
    %71 = arith.mulf %69, %70 : vector<8x1xf32>
    %cst_27 = arith.constant 1.000000e-03 : f32
    %72 = vector.broadcast %cst_27 : f32 to vector<8x1xf32>
    %73 = arith.addf %71, %72 : vector<8x1xf32>
    %74 = math.rsqrt %73 : vector<8x1xf32>
    %75 = vector.broadcast %74 : vector<8x1xf32> to vector<8x384xf32>
    %76 = arith.mulf %66, %75 : vector<8x384xf32>
    %77 = vector.broadcast %4 : vector<1x384xf32> to vector<8x384xf32>
    %78 = arith.mulf %76, %77 : vector<8x384xf32>
    %79 = vector.broadcast %5 : vector<1x384xf32> to vector<8x384xf32>
    %80 = arith.addf %78, %79 : vector<8x384xf32>
    %81 = vector.extract_strided_slice %80 {offsets = [0, 0], sizes = [8, 128], strides = [1, 1]} : vector<8x384xf32> to vector<8x128xf32>
    %82 = arith.negf %81 : vector<8x128xf32>
    %83 = math.exp %82 : vector<8x128xf32>
    %cst_28 = arith.constant 1.000000e+00 : f32
    %84 = vector.broadcast %cst_28 : f32 to vector<8x128xf32>
    %85 = arith.addf %84, %83 : vector<8x128xf32>
    %86 = arith.divf %84, %85 : vector<8x128xf32>
    %87 = vector.extract_strided_slice %80 {offsets = [0, 128], sizes = [8, 128], strides = [1, 1]} : vector<8x384xf32> to vector<8x128xf32>
    %88 = arith.mulf %86, %87 : vector<8x128xf32>
    %89 = math.tanh %88 : vector<8x128xf32>
    %90 = vector.extract_strided_slice %80 {offsets = [0, 256], sizes = [8, 128], strides = [1, 1]} : vector<8x384xf32> to vector<8x128xf32>
    %91 = arith.negf %90 : vector<8x128xf32>
    %92 = math.exp %91 : vector<8x128xf32>
    %cst_29 = arith.constant 1.000000e+00 : f32
    %93 = vector.broadcast %cst_29 : f32 to vector<8x128xf32>
    %94 = arith.addf %93, %92 : vector<8x128xf32>
    %95 = arith.divf %93, %94 : vector<8x128xf32>
    %96 = arith.subf %89, %50 : vector<8x128xf32>
    %97 = arith.mulf %95, %96 : vector<8x128xf32>
    %98 = arith.addf %50, %97 : vector<8x128xf32>
    %99 = arith.index_cast %c1_i32 : i32 to index
    %c0_30 = arith.constant 0 : index
    %c0_31 = arith.constant 0 : index
    %100 = vector.load %arg6[%99, %c0_30, %c0_31] : memref<16x8x128xf32, #tpu.memory_space<vmem>>, vector<1x8x128xf32>
    %101 = vector.shape_cast %100 : vector<1x8x128xf32> to vector<8x128xf32>
    %102 = vector.shape_cast %98 : vector<8x128xf32> to vector<1x8x128xf32>
    tpu.vector_store %arg6[%99, %c0_30, %c0_31], %102 {strides = array<i32>} : memref<16x8x128xf32, #tpu.memory_space<vmem>>, vector<1x8x128xf32>,
    %c2_i32 = arith.constant 2 : i32
    %103 = arith.index_cast %c2_i32 : i32 to index
    %c0_32 = arith.constant 0 : index
    %c0_33 = arith.constant 0 : index
    %104 = vector.load %arg1[%103, %c0_32, %c0_33] : memref<16x8x384xf32, #tpu.memory_space<vmem>>, vector<1x8x384xf32>
    %105 = vector.shape_cast %104 : vector<1x8x384xf32> to vector<8x384xf32>
    %106 = arith.truncf %98 : vector<8x128xf32> to vector<8x128xbf16>
    %cst_34 = arith.constant dense<0.000000e+00> : vector<8x384xf32>
    %107 = tpu.matmul %106, %3, %cst_34 {dimension_numbers = #tpu.dot_dimension_numbers<[1], [0], [0], [1], [0, 0, 1, 1], [], []>} : vector<8x128xbf16>, vector<128x384xbf16>, vector<8x384xf32> -> vector<8x384xf32>
    %108 = arith.addf %105, %107 : vector<8x384xf32>
    %cst_35 = arith.constant dense<0.000000e+00> : vector<8xf32>
    %109 = vector.multi_reduction <add>, %108, %cst_35 [1] : vector<8x384xf32> to vector<8xf32>
    %110 = vector.shape_cast %109 : vector<8xf32> to vector<8x1xf32>
    %cst_36 = arith.constant 0.00260416674 : f32
    %111 = vector.broadcast %cst_36 : f32 to vector<8x1xf32>
    %112 = arith.mulf %110, %111 : vector<8x1xf32>
    %113 = vector.broadcast %112 : vector<8x1xf32> to vector<8x384xf32>
    %114 = arith.subf %108, %113 : vector<8x384xf32>
    %115 = arith.mulf %114, %114 : vector<8x384xf32>
    %cst_37 = arith.constant dense<0.000000e+00> : vector<8xf32>
    %116 = vector.multi_reduction <add>, %115, %cst_37 [1] : vector<8x384xf32> to vector<8xf32>
    %117 = vector.shape_cast %116 : vector<8xf32> to vector<8x1xf32>
    %cst_38 = arith.constant 0.00260416674 : f32
    %118 = vector.broadcast %cst_38 : f32 to vector<8x1xf32>
    %119 = arith.mulf %117, %118 : vector<8x1xf32>
    %cst_39 = arith.constant 1.000000e-03 : f32
    %120 = vector.broadcast %cst_39 : f32 to vector<8x1xf32>
    %121 = arith.addf %119, %120 : vector<8x1xf32>
    %122 = math.rsqrt %121 : vector<8x1xf32>
    %123 = vector.broadcast %122 : vector<8x1xf32> to vector<8x384xf32>
    %124 = arith.mulf %114, %123 : vector<8x384xf32>
    %125 = vector.broadcast %4 : vector<1x384xf32> to vector<8x384xf32>
    %126 = arith.mulf %124, %125 : vector<8x384xf32>
    %127 = vector.broadcast %5 : vector<1x384xf32> to vector<8x384xf32>
    %128 = arith.addf %126, %127 : vector<8x384xf32>
    %129 = vector.extract_strided_slice %128 {offsets = [0, 0], sizes = [8, 128], strides = [1, 1]} : vector<8x384xf32> to vector<8x128xf32>
    %130 = arith.negf %129 : vector<8x128xf32>
    %131 = math.exp %130 : vector<8x128xf32>
    %cst_40 = arith.constant 1.000000e+00 : f32
    %132 = vector.broadcast %cst_40 : f32 to vector<8x128xf32>
    %133 = arith.addf %132, %131 : vector<8x128xf32>
    %134 = arith.divf %132, %133 : vector<8x128xf32>
    %135 = vector.extract_strided_slice %128 {offsets = [0, 128], sizes = [8, 128], strides = [1, 1]} : vector<8x384xf32> to vector<8x128xf32>
    %136 = arith.mulf %134, %135 : vector<8x128xf32>
    %137 = math.tanh %136 : vector<8x128xf32>
    %138 = vector.extract_strided_slice %128 {offsets = [0, 256], sizes = [8, 128], strides = [1, 1]} : vector<8x384xf32> to vector<8x128xf32>
    %139 = arith.negf %138 : vector<8x128xf32>
    %140 = math.exp %139 : vector<8x128xf32>
    %cst_41 = arith.constant 1.000000e+00 : f32
    %141 = vector.broadcast %cst_41 : f32 to vector<8x128xf32>
    %142 = arith.addf %141, %140 : vector<8x128xf32>
    %143 = arith.divf %141, %142 : vector<8x128xf32>
    %144 = arith.subf %137, %98 : vector<8x128xf32>
    %145 = arith.mulf %143, %144 : vector<8x128xf32>
    %146 = arith.addf %98, %145 : vector<8x128xf32>
    %147 = arith.index_cast %c2_i32 : i32 to index
    %c0_42 = arith.constant 0 : index
    %c0_43 = arith.constant 0 : index
    %148 = vector.load %arg6[%147, %c0_42, %c0_43] : memref<16x8x128xf32, #tpu.memory_space<vmem>>, vector<1x8x128xf32>
    %149 = vector.shape_cast %148 : vector<1x8x128xf32> to vector<8x128xf32>
    %150 = vector.shape_cast %146 : vector<8x128xf32> to vector<1x8x128xf32>
    tpu.vector_store %arg6[%147, %c0_42, %c0_43], %150 {strides = array<i32>} : memref<16x8x128xf32, #tpu.memory_space<vmem>>, vector<1x8x128xf32>,
    %c3_i32 = arith.constant 3 : i32
    %151 = arith.index_cast %c3_i32 : i32 to index
    %c0_44 = arith.constant 0 : index
    %c0_45 = arith.constant 0 : index
    %152 = vector.load %arg1[%151, %c0_44, %c0_45] : memref<16x8x384xf32, #tpu.memory_space<vmem>>, vector<1x8x384xf32>
    %153 = vector.shape_cast %152 : vector<1x8x384xf32> to vector<8x384xf32>
    %154 = arith.truncf %146 : vector<8x128xf32> to vector<8x128xbf16>
    %cst_46 = arith.constant dense<0.000000e+00> : vector<8x384xf32>
    %155 = tpu.matmul %154, %3, %cst_46 {dimension_numbers = #tpu.dot_dimension_numbers<[1], [0], [0], [1], [0, 0, 1, 1], [], []>} : vector<8x128xbf16>, vector<128x384xbf16>, vector<8x384xf32> -> vector<8x384xf32>
    %156 = arith.addf %153, %155 : vector<8x384xf32>
    %cst_47 = arith.constant dense<0.000000e+00> : vector<8xf32>
    %157 = vector.multi_reduction <add>, %156, %cst_47 [1] : vector<8x384xf32> to vector<8xf32>
    %158 = vector.shape_cast %157 : vector<8xf32> to vector<8x1xf32>
    %cst_48 = arith.constant 0.00260416674 : f32
    %159 = vector.broadcast %cst_48 : f32 to vector<8x1xf32>
    %160 = arith.mulf %158, %159 : vector<8x1xf32>
    %161 = vector.broadcast %160 : vector<8x1xf32> to vector<8x384xf32>
    %162 = arith.subf %156, %161 : vector<8x384xf32>
    %163 = arith.mulf %162, %162 : vector<8x384xf32>
    %cst_49 = arith.constant dense<0.000000e+00> : vector<8xf32>
    %164 = vector.multi_reduction <add>, %163, %cst_49 [1] : vector<8x384xf32> to vector<8xf32>
    %165 = vector.shape_cast %164 : vector<8xf32> to vector<8x1xf32>
    %cst_50 = arith.constant 0.00260416674 : f32
    %166 = vector.broadcast %cst_50 : f32 to vector<8x1xf32>
    %167 = arith.mulf %165, %166 : vector<8x1xf32>
    %cst_51 = arith.constant 1.000000e-03 : f32
    %168 = vector.broadcast %cst_51 : f32 to vector<8x1xf32>
    %169 = arith.addf %167, %168 : vector<8x1xf32>
    %170 = math.rsqrt %169 : vector<8x1xf32>
    %171 = vector.broadcast %170 : vector<8x1xf32> to vector<8x384xf32>
    %172 = arith.mulf %162, %171 : vector<8x384xf32>
    %173 = vector.broadcast %4 : vector<1x384xf32> to vector<8x384xf32>
    %174 = arith.mulf %172, %173 : vector<8x384xf32>
    %175 = vector.broadcast %5 : vector<1x384xf32> to vector<8x384xf32>
    %176 = arith.addf %174, %175 : vector<8x384xf32>
    %177 = vector.extract_strided_slice %176 {offsets = [0, 0], sizes = [8, 128], strides = [1, 1]} : vector<8x384xf32> to vector<8x128xf32>
    %178 = arith.negf %177 : vector<8x128xf32>
    %179 = math.exp %178 : vector<8x128xf32>
    %cst_52 = arith.constant 1.000000e+00 : f32
    %180 = vector.broadcast %cst_52 : f32 to vector<8x128xf32>
    %181 = arith.addf %180, %179 : vector<8x128xf32>
    %182 = arith.divf %180, %181 : vector<8x128xf32>
    %183 = vector.extract_strided_slice %176 {offsets = [0, 128], sizes = [8, 128], strides = [1, 1]} : vector<8x384xf32> to vector<8x128xf32>
    %184 = arith.mulf %182, %183 : vector<8x128xf32>
    %185 = math.tanh %184 : vector<8x128xf32>
    %186 = vector.extract_strided_slice %176 {offsets = [0, 256], sizes = [8, 128], strides = [1, 1]} : vector<8x384xf32> to vector<8x128xf32>
    %187 = arith.negf %186 : vector<8x128xf32>
    %188 = math.exp %187 : vector<8x128xf32>
    %cst_53 = arith.constant 1.000000e+00 : f32
    %189 = vector.broadcast %cst_53 : f32 to vector<8x128xf32>
    %190 = arith.addf %189, %188 : vector<8x128xf32>
    %191 = arith.divf %189, %190 : vector<8x128xf32>
    %192 = arith.subf %185, %146 : vector<8x128xf32>
    %193 = arith.mulf %191, %192 : vector<8x128xf32>
    %194 = arith.addf %146, %193 : vector<8x128xf32>
    %195 = arith.index_cast %c3_i32 : i32 to index
    %c0_54 = arith.constant 0 : index
    %c0_55 = arith.constant 0 : index
    %196 = vector.load %arg6[%195, %c0_54, %c0_55] : memref<16x8x128xf32, #tpu.memory_space<vmem>>, vector<1x8x128xf32>
    %197 = vector.shape_cast %196 : vector<1x8x128xf32> to vector<8x128xf32>
    %198 = vector.shape_cast %194 : vector<8x128xf32> to vector<1x8x128xf32>
    tpu.vector_store %arg6[%195, %c0_54, %c0_55], %198 {strides = array<i32>} : memref<16x8x128xf32, #tpu.memory_space<vmem>>, vector<1x8x128xf32>,
    %c4_i32 = arith.constant 4 : i32
    %199 = arith.index_cast %c4_i32 : i32 to index
    %c0_56 = arith.constant 0 : index
    %c0_57 = arith.constant 0 : index
    %200 = vector.load %arg1[%199, %c0_56, %c0_57] : memref<16x8x384xf32, #tpu.memory_space<vmem>>, vector<1x8x384xf32>
    %201 = vector.shape_cast %200 : vector<1x8x384xf32> to vector<8x384xf32>
    %202 = arith.truncf %194 : vector<8x128xf32> to vector<8x128xbf16>
    %cst_58 = arith.constant dense<0.000000e+00> : vector<8x384xf32>
    %203 = tpu.matmul %202, %3, %cst_58 {dimension_numbers = #tpu.dot_dimension_numbers<[1], [0], [0], [1], [0, 0, 1, 1], [], []>} : vector<8x128xbf16>, vector<128x384xbf16>, vector<8x384xf32> -> vector<8x384xf32>
    %204 = arith.addf %201, %203 : vector<8x384xf32>
    %cst_59 = arith.constant dense<0.000000e+00> : vector<8xf32>
    %205 = vector.multi_reduction <add>, %204, %cst_59 [1] : vector<8x384xf32> to vector<8xf32>
    %206 = vector.shape_cast %205 : vector<8xf32> to vector<8x1xf32>
    %cst_60 = arith.constant 0.00260416674 : f32
    %207 = vector.broadcast %cst_60 : f32 to vector<8x1xf32>
    %208 = arith.mulf %206, %207 : vector<8x1xf32>
    %209 = vector.broadcast %208 : vector<8x1xf32> to vector<8x384xf32>
    %210 = arith.subf %204, %209 : vector<8x384xf32>
    %211 = arith.mulf %210, %210 : vector<8x384xf32>
    %cst_61 = arith.constant dense<0.000000e+00> : vector<8xf32>
    %212 = vector.multi_reduction <add>, %211, %cst_61 [1] : vector<8x384xf32> to vector<8xf32>
    %213 = vector.shape_cast %212 : vector<8xf32> to vector<8x1xf32>
    %cst_62 = arith.constant 0.00260416674 : f32
    %214 = vector.broadcast %cst_62 : f32 to vector<8x1xf32>
    %215 = arith.mulf %213, %214 : vector<8x1xf32>
    %cst_63 = arith.constant 1.000000e-03 : f32
    %216 = vector.broadcast %cst_63 : f32 to vector<8x1xf32>
    %217 = arith.addf %215, %216 : vector<8x1xf32>
    %218 = math.rsqrt %217 : vector<8x1xf32>
    %219 = vector.broadcast %218 : vector<8x1xf32> to vector<8x384xf32>
    %220 = arith.mulf %210, %219 : vector<8x384xf32>
    %221 = vector.broadcast %4 : vector<1x384xf32> to vector<8x384xf32>
    %222 = arith.mulf %220, %221 : vector<8x384xf32>
    %223 = vector.broadcast %5 : vector<1x384xf32> to vector<8x384xf32>
    %224 = arith.addf %222, %223 : vector<8x384xf32>
    %225 = vector.extract_strided_slice %224 {offsets = [0, 0], sizes = [8, 128], strides = [1, 1]} : vector<8x384xf32> to vector<8x128xf32>
    %226 = arith.negf %225 : vector<8x128xf32>
    %227 = math.exp %226 : vector<8x128xf32>
    %cst_64 = arith.constant 1.000000e+00 : f32
    %228 = vector.broadcast %cst_64 : f32 to vector<8x128xf32>
    %229 = arith.addf %228, %227 : vector<8x128xf32>
    %230 = arith.divf %228, %229 : vector<8x128xf32>
    %231 = vector.extract_strided_slice %224 {offsets = [0, 128], sizes = [8, 128], strides = [1, 1]} : vector<8x384xf32> to vector<8x128xf32>
    %232 = arith.mulf %230, %231 : vector<8x128xf32>
    %233 = math.tanh %232 : vector<8x128xf32>
    %234 = vector.extract_strided_slice %224 {offsets = [0, 256], sizes = [8, 128], strides = [1, 1]} : vector<8x384xf32> to vector<8x128xf32>
    %235 = arith.negf %234 : vector<8x128xf32>
    %236 = math.exp %235 : vector<8x128xf32>
    %cst_65 = arith.constant 1.000000e+00 : f32
    %237 = vector.broadcast %cst_65 : f32 to vector<8x128xf32>
    %238 = arith.addf %237, %236 : vector<8x128xf32>
    %239 = arith.divf %237, %238 : vector<8x128xf32>
    %240 = arith.subf %233, %194 : vector<8x128xf32>
    %241 = arith.mulf %239, %240 : vector<8x128xf32>
    %242 = arith.addf %194, %241 : vector<8x128xf32>
    %243 = arith.index_cast %c4_i32 : i32 to index
    %c0_66 = arith.constant 0 : index
    %c0_67 = arith.constant 0 : index
    %244 = vector.load %arg6[%243, %c0_66, %c0_67] : memref<16x8x128xf32, #tpu.memory_space<vmem>>, vector<1x8x128xf32>
    %245 = vector.shape_cast %244 : vector<1x8x128xf32> to vector<8x128xf32>
    %246 = vector.shape_cast %242 : vector<8x128xf32> to vector<1x8x128xf32>
    tpu.vector_store %arg6[%243, %c0_66, %c0_67], %246 {strides = array<i32>} : memref<16x8x128xf32, #tpu.memory_space<vmem>>, vector<1x8x128xf32>,
    %c5_i32 = arith.constant 5 : i32
    %247 = arith.index_cast %c5_i32 : i32 to index
    %c0_68 = arith.constant 0 : index
    %c0_69 = arith.constant 0 : index
    %248 = vector.load %arg1[%247, %c0_68, %c0_69] : memref<16x8x384xf32, #tpu.memory_space<vmem>>, vector<1x8x384xf32>
    %249 = vector.shape_cast %248 : vector<1x8x384xf32> to vector<8x384xf32>
    %250 = arith.truncf %242 : vector<8x128xf32> to vector<8x128xbf16>
    %cst_70 = arith.constant dense<0.000000e+00> : vector<8x384xf32>
    %251 = tpu.matmul %250, %3, %cst_70 {dimension_numbers = #tpu.dot_dimension_numbers<[1], [0], [0], [1], [0, 0, 1, 1], [], []>} : vector<8x128xbf16>, vector<128x384xbf16>, vector<8x384xf32> -> vector<8x384xf32>
    %252 = arith.addf %249, %251 : vector<8x384xf32>
    %cst_71 = arith.constant dense<0.000000e+00> : vector<8xf32>
    %253 = vector.multi_reduction <add>, %252, %cst_71 [1] : vector<8x384xf32> to vector<8xf32>
    %254 = vector.shape_cast %253 : vector<8xf32> to vector<8x1xf32>
    %cst_72 = arith.constant 0.00260416674 : f32
    %255 = vector.broadcast %cst_72 : f32 to vector<8x1xf32>
    %256 = arith.mulf %254, %255 : vector<8x1xf32>
    %257 = vector.broadcast %256 : vector<8x1xf32> to vector<8x384xf32>
    %258 = arith.subf %252, %257 : vector<8x384xf32>
    %259 = arith.mulf %258, %258 : vector<8x384xf32>
    %cst_73 = arith.constant dense<0.000000e+00> : vector<8xf32>
    %260 = vector.multi_reduction <add>, %259, %cst_73 [1] : vector<8x384xf32> to vector<8xf32>
    %261 = vector.shape_cast %260 : vector<8xf32> to vector<8x1xf32>
    %cst_74 = arith.constant 0.00260416674 : f32
    %262 = vector.broadcast %cst_74 : f32 to vector<8x1xf32>
    %263 = arith.mulf %261, %262 : vector<8x1xf32>
    %cst_75 = arith.constant 1.000000e-03 : f32
    %264 = vector.broadcast %cst_75 : f32 to vector<8x1xf32>
    %265 = arith.addf %263, %264 : vector<8x1xf32>
    %266 = math.rsqrt %265 : vector<8x1xf32>
    %267 = vector.broadcast %266 : vector<8x1xf32> to vector<8x384xf32>
    %268 = arith.mulf %258, %267 : vector<8x384xf32>
    %269 = vector.broadcast %4 : vector<1x384xf32> to vector<8x384xf32>
    %270 = arith.mulf %268, %269 : vector<8x384xf32>
    %271 = vector.broadcast %5 : vector<1x384xf32> to vector<8x384xf32>
    %272 = arith.addf %270, %271 : vector<8x384xf32>
    %273 = vector.extract_strided_slice %272 {offsets = [0, 0], sizes = [8, 128], strides = [1, 1]} : vector<8x384xf32> to vector<8x128xf32>
    %274 = arith.negf %273 : vector<8x128xf32>
    %275 = math.exp %274 : vector<8x128xf32>
    %cst_76 = arith.constant 1.000000e+00 : f32
    %276 = vector.broadcast %cst_76 : f32 to vector<8x128xf32>
    %277 = arith.addf %276, %275 : vector<8x128xf32>
    %278 = arith.divf %276, %277 : vector<8x128xf32>
    %279 = vector.extract_strided_slice %272 {offsets = [0, 128], sizes = [8, 128], strides = [1, 1]} : vector<8x384xf32> to vector<8x128xf32>
    %280 = arith.mulf %278, %279 : vector<8x128xf32>
    %281 = math.tanh %280 : vector<8x128xf32>
    %282 = vector.extract_strided_slice %272 {offsets = [0, 256], sizes = [8, 128], strides = [1, 1]} : vector<8x384xf32> to vector<8x128xf32>
    %283 = arith.negf %282 : vector<8x128xf32>
    %284 = math.exp %283 : vector<8x128xf32>
    %cst_77 = arith.constant 1.000000e+00 : f32
    %285 = vector.broadcast %cst_77 : f32 to vector<8x128xf32>
    %286 = arith.addf %285, %284 : vector<8x128xf32>
    %287 = arith.divf %285, %286 : vector<8x128xf32>
    %288 = arith.subf %281, %242 : vector<8x128xf32>
    %289 = arith.mulf %287, %288 : vector<8x128xf32>
    %290 = arith.addf %242, %289 : vector<8x128xf32>
    %291 = arith.index_cast %c5_i32 : i32 to index
    %c0_78 = arith.constant 0 : index
    %c0_79 = arith.constant 0 : index
    %292 = vector.load %arg6[%291, %c0_78, %c0_79] : memref<16x8x128xf32, #tpu.memory_space<vmem>>, vector<1x8x128xf32>
    %293 = vector.shape_cast %292 : vector<1x8x128xf32> to vector<8x128xf32>
    %294 = vector.shape_cast %290 : vector<8x128xf32> to vector<1x8x128xf32>
    tpu.vector_store %arg6[%291, %c0_78, %c0_79], %294 {strides = array<i32>} : memref<16x8x128xf32, #tpu.memory_space<vmem>>, vector<1x8x128xf32>,
    %c6_i32 = arith.constant 6 : i32
    %295 = arith.index_cast %c6_i32 : i32 to index
    %c0_80 = arith.constant 0 : index
    %c0_81 = arith.constant 0 : index
    %296 = vector.load %arg1[%295, %c0_80, %c0_81] : memref<16x8x384xf32, #tpu.memory_space<vmem>>, vector<1x8x384xf32>
    %297 = vector.shape_cast %296 : vector<1x8x384xf32> to vector<8x384xf32>
    %298 = arith.truncf %290 : vector<8x128xf32> to vector<8x128xbf16>
    %cst_82 = arith.constant dense<0.000000e+00> : vector<8x384xf32>
    %299 = tpu.matmul %298, %3, %cst_82 {dimension_numbers = #tpu.dot_dimension_numbers<[1], [0], [0], [1], [0, 0, 1, 1], [], []>} : vector<8x128xbf16>, vector<128x384xbf16>, vector<8x384xf32> -> vector<8x384xf32>
    %300 = arith.addf %297, %299 : vector<8x384xf32>
    %cst_83 = arith.constant dense<0.000000e+00> : vector<8xf32>
    %301 = vector.multi_reduction <add>, %300, %cst_83 [1] : vector<8x384xf32> to vector<8xf32>
    %302 = vector.shape_cast %301 : vector<8xf32> to vector<8x1xf32>
    %cst_84 = arith.constant 0.00260416674 : f32
    %303 = vector.broadcast %cst_84 : f32 to vector<8x1xf32>
    %304 = arith.mulf %302, %303 : vector<8x1xf32>
    %305 = vector.broadcast %304 : vector<8x1xf32> to vector<8x384xf32>
    %306 = arith.subf %300, %305 : vector<8x384xf32>
    %307 = arith.mulf %306, %306 : vector<8x384xf32>
    %cst_85 = arith.constant dense<0.000000e+00> : vector<8xf32>
    %308 = vector.multi_reduction <add>, %307, %cst_85 [1] : vector<8x384xf32> to vector<8xf32>
    %309 = vector.shape_cast %308 : vector<8xf32> to vector<8x1xf32>
    %cst_86 = arith.constant 0.00260416674 : f32
    %310 = vector.broadcast %cst_86 : f32 to vector<8x1xf32>
    %311 = arith.mulf %309, %310 : vector<8x1xf32>
    %cst_87 = arith.constant 1.000000e-03 : f32
    %312 = vector.broadcast %cst_87 : f32 to vector<8x1xf32>
    %313 = arith.addf %311, %312 : vector<8x1xf32>
    %314 = math.rsqrt %313 : vector<8x1xf32>
    %315 = vector.broadcast %314 : vector<8x1xf32> to vector<8x384xf32>
    %316 = arith.mulf %306, %315 : vector<8x384xf32>
    %317 = vector.broadcast %4 : vector<1x384xf32> to vector<8x384xf32>
    %318 = arith.mulf %316, %317 : vector<8x384xf32>
    %319 = vector.broadcast %5 : vector<1x384xf32> to vector<8x384xf32>
    %320 = arith.addf %318, %319 : vector<8x384xf32>
    %321 = vector.extract_strided_slice %320 {offsets = [0, 0], sizes = [8, 128], strides = [1, 1]} : vector<8x384xf32> to vector<8x128xf32>
    %322 = arith.negf %321 : vector<8x128xf32>
    %323 = math.exp %322 : vector<8x128xf32>
    %cst_88 = arith.constant 1.000000e+00 : f32
    %324 = vector.broadcast %cst_88 : f32 to vector<8x128xf32>
    %325 = arith.addf %324, %323 : vector<8x128xf32>
    %326 = arith.divf %324, %325 : vector<8x128xf32>
    %327 = vector.extract_strided_slice %320 {offsets = [0, 128], sizes = [8, 128], strides = [1, 1]} : vector<8x384xf32> to vector<8x128xf32>
    %328 = arith.mulf %326, %327 : vector<8x128xf32>
    %329 = math.tanh %328 : vector<8x128xf32>
    %330 = vector.extract_strided_slice %320 {offsets = [0, 256], sizes = [8, 128], strides = [1, 1]} : vector<8x384xf32> to vector<8x128xf32>
    %331 = arith.negf %330 : vector<8x128xf32>
    %332 = math.exp %331 : vector<8x128xf32>
    %cst_89 = arith.constant 1.000000e+00 : f32
    %333 = vector.broadcast %cst_89 : f32 to vector<8x128xf32>
    %334 = arith.addf %333, %332 : vector<8x128xf32>
    %335 = arith.divf %333, %334 : vector<8x128xf32>
    %336 = arith.subf %329, %290 : vector<8x128xf32>
    %337 = arith.mulf %335, %336 : vector<8x128xf32>
    %338 = arith.addf %290, %337 : vector<8x128xf32>
    %339 = arith.index_cast %c6_i32 : i32 to index
    %c0_90 = arith.constant 0 : index
    %c0_91 = arith.constant 0 : index
    %340 = vector.load %arg6[%339, %c0_90, %c0_91] : memref<16x8x128xf32, #tpu.memory_space<vmem>>, vector<1x8x128xf32>
    %341 = vector.shape_cast %340 : vector<1x8x128xf32> to vector<8x128xf32>
    %342 = vector.shape_cast %338 : vector<8x128xf32> to vector<1x8x128xf32>
    tpu.vector_store %arg6[%339, %c0_90, %c0_91], %342 {strides = array<i32>} : memref<16x8x128xf32, #tpu.memory_space<vmem>>, vector<1x8x128xf32>,
    %c7_i32 = arith.constant 7 : i32
    %343 = arith.index_cast %c7_i32 : i32 to index
    %c0_92 = arith.constant 0 : index
    %c0_93 = arith.constant 0 : index
    %344 = vector.load %arg1[%343, %c0_92, %c0_93] : memref<16x8x384xf32, #tpu.memory_space<vmem>>, vector<1x8x384xf32>
    %345 = vector.shape_cast %344 : vector<1x8x384xf32> to vector<8x384xf32>
    %346 = arith.truncf %338 : vector<8x128xf32> to vector<8x128xbf16>
    %cst_94 = arith.constant dense<0.000000e+00> : vector<8x384xf32>
    %347 = tpu.matmul %346, %3, %cst_94 {dimension_numbers = #tpu.dot_dimension_numbers<[1], [0], [0], [1], [0, 0, 1, 1], [], []>} : vector<8x128xbf16>, vector<128x384xbf16>, vector<8x384xf32> -> vector<8x384xf32>
    %348 = arith.addf %345, %347 : vector<8x384xf32>
    %cst_95 = arith.constant dense<0.000000e+00> : vector<8xf32>
    %349 = vector.multi_reduction <add>, %348, %cst_95 [1] : vector<8x384xf32> to vector<8xf32>
    %350 = vector.shape_cast %349 : vector<8xf32> to vector<8x1xf32>
    %cst_96 = arith.constant 0.00260416674 : f32
    %351 = vector.broadcast %cst_96 : f32 to vector<8x1xf32>
    %352 = arith.mulf %350, %351 : vector<8x1xf32>
    %353 = vector.broadcast %352 : vector<8x1xf32> to vector<8x384xf32>
    %354 = arith.subf %348, %353 : vector<8x384xf32>
    %355 = arith.mulf %354, %354 : vector<8x384xf32>
    %cst_97 = arith.constant dense<0.000000e+00> : vector<8xf32>
    %356 = vector.multi_reduction <add>, %355, %cst_97 [1] : vector<8x384xf32> to vector<8xf32>
    %357 = vector.shape_cast %356 : vector<8xf32> to vector<8x1xf32>
    %cst_98 = arith.constant 0.00260416674 : f32
    %358 = vector.broadcast %cst_98 : f32 to vector<8x1xf32>
    %359 = arith.mulf %357, %358 : vector<8x1xf32>
    %cst_99 = arith.constant 1.000000e-03 : f32
    %360 = vector.broadcast %cst_99 : f32 to vector<8x1xf32>
    %361 = arith.addf %359, %360 : vector<8x1xf32>
    %362 = math.rsqrt %361 : vector<8x1xf32>
    %363 = vector.broadcast %362 : vector<8x1xf32> to vector<8x384xf32>
    %364 = arith.mulf %354, %363 : vector<8x384xf32>
    %365 = vector.broadcast %4 : vector<1x384xf32> to vector<8x384xf32>
    %366 = arith.mulf %364, %365 : vector<8x384xf32>
    %367 = vector.broadcast %5 : vector<1x384xf32> to vector<8x384xf32>
    %368 = arith.addf %366, %367 : vector<8x384xf32>
    %369 = vector.extract_strided_slice %368 {offsets = [0, 0], sizes = [8, 128], strides = [1, 1]} : vector<8x384xf32> to vector<8x128xf32>
    %370 = arith.negf %369 : vector<8x128xf32>
    %371 = math.exp %370 : vector<8x128xf32>
    %cst_100 = arith.constant 1.000000e+00 : f32
    %372 = vector.broadcast %cst_100 : f32 to vector<8x128xf32>
    %373 = arith.addf %372, %371 : vector<8x128xf32>
    %374 = arith.divf %372, %373 : vector<8x128xf32>
    %375 = vector.extract_strided_slice %368 {offsets = [0, 128], sizes = [8, 128], strides = [1, 1]} : vector<8x384xf32> to vector<8x128xf32>
    %376 = arith.mulf %374, %375 : vector<8x128xf32>
    %377 = math.tanh %376 : vector<8x128xf32>
    %378 = vector.extract_strided_slice %368 {offsets = [0, 256], sizes = [8, 128], strides = [1, 1]} : vector<8x384xf32> to vector<8x128xf32>
    %379 = arith.negf %378 : vector<8x128xf32>
    %380 = math.exp %379 : vector<8x128xf32>
    %cst_101 = arith.constant 1.000000e+00 : f32
    %381 = vector.broadcast %cst_101 : f32 to vector<8x128xf32>
    %382 = arith.addf %381, %380 : vector<8x128xf32>
    %383 = arith.divf %381, %382 : vector<8x128xf32>
    %384 = arith.subf %377, %338 : vector<8x128xf32>
    %385 = arith.mulf %383, %384 : vector<8x128xf32>
    %386 = arith.addf %338, %385 : vector<8x128xf32>
    %387 = arith.index_cast %c7_i32 : i32 to index
    %c0_102 = arith.constant 0 : index
    %c0_103 = arith.constant 0 : index
    %388 = vector.load %arg6[%387, %c0_102, %c0_103] : memref<16x8x128xf32, #tpu.memory_space<vmem>>, vector<1x8x128xf32>
    %389 = vector.shape_cast %388 : vector<1x8x128xf32> to vector<8x128xf32>
    %390 = vector.shape_cast %386 : vector<8x128xf32> to vector<1x8x128xf32>
    tpu.vector_store %arg6[%387, %c0_102, %c0_103], %390 {strides = array<i32>} : memref<16x8x128xf32, #tpu.memory_space<vmem>>, vector<1x8x128xf32>,
    %c8_i32 = arith.constant 8 : i32
    %391 = arith.index_cast %c8_i32 : i32 to index
    %c0_104 = arith.constant 0 : index
    %c0_105 = arith.constant 0 : index
    %392 = vector.load %arg1[%391, %c0_104, %c0_105] : memref<16x8x384xf32, #tpu.memory_space<vmem>>, vector<1x8x384xf32>
    %393 = vector.shape_cast %392 : vector<1x8x384xf32> to vector<8x384xf32>
    %394 = arith.truncf %386 : vector<8x128xf32> to vector<8x128xbf16>
    %cst_106 = arith.constant dense<0.000000e+00> : vector<8x384xf32>
    %395 = tpu.matmul %394, %3, %cst_106 {dimension_numbers = #tpu.dot_dimension_numbers<[1], [0], [0], [1], [0, 0, 1, 1], [], []>} : vector<8x128xbf16>, vector<128x384xbf16>, vector<8x384xf32> -> vector<8x384xf32>
    %396 = arith.addf %393, %395 : vector<8x384xf32>
    %cst_107 = arith.constant dense<0.000000e+00> : vector<8xf32>
    %397 = vector.multi_reduction <add>, %396, %cst_107 [1] : vector<8x384xf32> to vector<8xf32>
    %398 = vector.shape_cast %397 : vector<8xf32> to vector<8x1xf32>
    %cst_108 = arith.constant 0.00260416674 : f32
    %399 = vector.broadcast %cst_108 : f32 to vector<8x1xf32>
    %400 = arith.mulf %398, %399 : vector<8x1xf32>
    %401 = vector.broadcast %400 : vector<8x1xf32> to vector<8x384xf32>
    %402 = arith.subf %396, %401 : vector<8x384xf32>
    %403 = arith.mulf %402, %402 : vector<8x384xf32>
    %cst_109 = arith.constant dense<0.000000e+00> : vector<8xf32>
    %404 = vector.multi_reduction <add>, %403, %cst_109 [1] : vector<8x384xf32> to vector<8xf32>
    %405 = vector.shape_cast %404 : vector<8xf32> to vector<8x1xf32>
    %cst_110 = arith.constant 0.00260416674 : f32
    %406 = vector.broadcast %cst_110 : f32 to vector<8x1xf32>
    %407 = arith.mulf %405, %406 : vector<8x1xf32>
    %cst_111 = arith.constant 1.000000e-03 : f32
    %408 = vector.broadcast %cst_111 : f32 to vector<8x1xf32>
    %409 = arith.addf %407, %408 : vector<8x1xf32>
    %410 = math.rsqrt %409 : vector<8x1xf32>
    %411 = vector.broadcast %410 : vector<8x1xf32> to vector<8x384xf32>
    %412 = arith.mulf %402, %411 : vector<8x384xf32>
    %413 = vector.broadcast %4 : vector<1x384xf32> to vector<8x384xf32>
    %414 = arith.mulf %412, %413 : vector<8x384xf32>
    %415 = vector.broadcast %5 : vector<1x384xf32> to vector<8x384xf32>
    %416 = arith.addf %414, %415 : vector<8x384xf32>
    %417 = vector.extract_strided_slice %416 {offsets = [0, 0], sizes = [8, 128], strides = [1, 1]} : vector<8x384xf32> to vector<8x128xf32>
    %418 = arith.negf %417 : vector<8x128xf32>
    %419 = math.exp %418 : vector<8x128xf32>
    %cst_112 = arith.constant 1.000000e+00 : f32
    %420 = vector.broadcast %cst_112 : f32 to vector<8x128xf32>
    %421 = arith.addf %420, %419 : vector<8x128xf32>
    %422 = arith.divf %420, %421 : vector<8x128xf32>
    %423 = vector.extract_strided_slice %416 {offsets = [0, 128], sizes = [8, 128], strides = [1, 1]} : vector<8x384xf32> to vector<8x128xf32>
    %424 = arith.mulf %422, %423 : vector<8x128xf32>
    %425 = math.tanh %424 : vector<8x128xf32>
    %426 = vector.extract_strided_slice %416 {offsets = [0, 256], sizes = [8, 128], strides = [1, 1]} : vector<8x384xf32> to vector<8x128xf32>
    %427 = arith.negf %426 : vector<8x128xf32>
    %428 = math.exp %427 : vector<8x128xf32>
    %cst_113 = arith.constant 1.000000e+00 : f32
    %429 = vector.broadcast %cst_113 : f32 to vector<8x128xf32>
    %430 = arith.addf %429, %428 : vector<8x128xf32>
    %431 = arith.divf %429, %430 : vector<8x128xf32>
    %432 = arith.subf %425, %386 : vector<8x128xf32>
    %433 = arith.mulf %431, %432 : vector<8x128xf32>
    %434 = arith.addf %386, %433 : vector<8x128xf32>
    %435 = arith.index_cast %c8_i32 : i32 to index
    %c0_114 = arith.constant 0 : index
    %c0_115 = arith.constant 0 : index
    %436 = vector.load %arg6[%435, %c0_114, %c0_115] : memref<16x8x128xf32, #tpu.memory_space<vmem>>, vector<1x8x128xf32>
    %437 = vector.shape_cast %436 : vector<1x8x128xf32> to vector<8x128xf32>
    %438 = vector.shape_cast %434 : vector<8x128xf32> to vector<1x8x128xf32>
    tpu.vector_store %arg6[%435, %c0_114, %c0_115], %438 {strides = array<i32>} : memref<16x8x128xf32, #tpu.memory_space<vmem>>, vector<1x8x128xf32>,
    %c9_i32 = arith.constant 9 : i32
    %439 = arith.index_cast %c9_i32 : i32 to index
    %c0_116 = arith.constant 0 : index
    %c0_117 = arith.constant 0 : index
    %440 = vector.load %arg1[%439, %c0_116, %c0_117] : memref<16x8x384xf32, #tpu.memory_space<vmem>>, vector<1x8x384xf32>
    %441 = vector.shape_cast %440 : vector<1x8x384xf32> to vector<8x384xf32>
    %442 = arith.truncf %434 : vector<8x128xf32> to vector<8x128xbf16>
    %cst_118 = arith.constant dense<0.000000e+00> : vector<8x384xf32>
    %443 = tpu.matmul %442, %3, %cst_118 {dimension_numbers = #tpu.dot_dimension_numbers<[1], [0], [0], [1], [0, 0, 1, 1], [], []>} : vector<8x128xbf16>, vector<128x384xbf16>, vector<8x384xf32> -> vector<8x384xf32>
    %444 = arith.addf %441, %443 : vector<8x384xf32>
    %cst_119 = arith.constant dense<0.000000e+00> : vector<8xf32>
    %445 = vector.multi_reduction <add>, %444, %cst_119 [1] : vector<8x384xf32> to vector<8xf32>
    %446 = vector.shape_cast %445 : vector<8xf32> to vector<8x1xf32>
    %cst_120 = arith.constant 0.00260416674 : f32
    %447 = vector.broadcast %cst_120 : f32 to vector<8x1xf32>
    %448 = arith.mulf %446, %447 : vector<8x1xf32>
    %449 = vector.broadcast %448 : vector<8x1xf32> to vector<8x384xf32>
    %450 = arith.subf %444, %449 : vector<8x384xf32>
    %451 = arith.mulf %450, %450 : vector<8x384xf32>
    %cst_121 = arith.constant dense<0.000000e+00> : vector<8xf32>
    %452 = vector.multi_reduction <add>, %451, %cst_121 [1] : vector<8x384xf32> to vector<8xf32>
    %453 = vector.shape_cast %452 : vector<8xf32> to vector<8x1xf32>
    %cst_122 = arith.constant 0.00260416674 : f32
    %454 = vector.broadcast %cst_122 : f32 to vector<8x1xf32>
    %455 = arith.mulf %453, %454 : vector<8x1xf32>
    %cst_123 = arith.constant 1.000000e-03 : f32
    %456 = vector.broadcast %cst_123 : f32 to vector<8x1xf32>
    %457 = arith.addf %455, %456 : vector<8x1xf32>
    %458 = math.rsqrt %457 : vector<8x1xf32>
    %459 = vector.broadcast %458 : vector<8x1xf32> to vector<8x384xf32>
    %460 = arith.mulf %450, %459 : vector<8x384xf32>
    %461 = vector.broadcast %4 : vector<1x384xf32> to vector<8x384xf32>
    %462 = arith.mulf %460, %461 : vector<8x384xf32>
    %463 = vector.broadcast %5 : vector<1x384xf32> to vector<8x384xf32>
    %464 = arith.addf %462, %463 : vector<8x384xf32>
    %465 = vector.extract_strided_slice %464 {offsets = [0, 0], sizes = [8, 128], strides = [1, 1]} : vector<8x384xf32> to vector<8x128xf32>
    %466 = arith.negf %465 : vector<8x128xf32>
    %467 = math.exp %466 : vector<8x128xf32>
    %cst_124 = arith.constant 1.000000e+00 : f32
    %468 = vector.broadcast %cst_124 : f32 to vector<8x128xf32>
    %469 = arith.addf %468, %467 : vector<8x128xf32>
    %470 = arith.divf %468, %469 : vector<8x128xf32>
    %471 = vector.extract_strided_slice %464 {offsets = [0, 128], sizes = [8, 128], strides = [1, 1]} : vector<8x384xf32> to vector<8x128xf32>
    %472 = arith.mulf %470, %471 : vector<8x128xf32>
    %473 = math.tanh %472 : vector<8x128xf32>
    %474 = vector.extract_strided_slice %464 {offsets = [0, 256], sizes = [8, 128], strides = [1, 1]} : vector<8x384xf32> to vector<8x128xf32>
    %475 = arith.negf %474 : vector<8x128xf32>
    %476 = math.exp %475 : vector<8x128xf32>
    %cst_125 = arith.constant 1.000000e+00 : f32
    %477 = vector.broadcast %cst_125 : f32 to vector<8x128xf32>
    %478 = arith.addf %477, %476 : vector<8x128xf32>
    %479 = arith.divf %477, %478 : vector<8x128xf32>
    %480 = arith.subf %473, %434 : vector<8x128xf32>
    %481 = arith.mulf %479, %480 : vector<8x128xf32>
    %482 = arith.addf %434, %481 : vector<8x128xf32>
    %483 = arith.index_cast %c9_i32 : i32 to index
    %c0_126 = arith.constant 0 : index
    %c0_127 = arith.constant 0 : index
    %484 = vector.load %arg6[%483, %c0_126, %c0_127] : memref<16x8x128xf32, #tpu.memory_space<vmem>>, vector<1x8x128xf32>
    %485 = vector.shape_cast %484 : vector<1x8x128xf32> to vector<8x128xf32>
    %486 = vector.shape_cast %482 : vector<8x128xf32> to vector<1x8x128xf32>
    tpu.vector_store %arg6[%483, %c0_126, %c0_127], %486 {strides = array<i32>} : memref<16x8x128xf32, #tpu.memory_space<vmem>>, vector<1x8x128xf32>,
    %c10_i32 = arith.constant 10 : i32
    %487 = arith.index_cast %c10_i32 : i32 to index
    %c0_128 = arith.constant 0 : index
    %c0_129 = arith.constant 0 : index
    %488 = vector.load %arg1[%487, %c0_128, %c0_129] : memref<16x8x384xf32, #tpu.memory_space<vmem>>, vector<1x8x384xf32>
    %489 = vector.shape_cast %488 : vector<1x8x384xf32> to vector<8x384xf32>
    %490 = arith.truncf %482 : vector<8x128xf32> to vector<8x128xbf16>
    %cst_130 = arith.constant dense<0.000000e+00> : vector<8x384xf32>
    %491 = tpu.matmul %490, %3, %cst_130 {dimension_numbers = #tpu.dot_dimension_numbers<[1], [0], [0], [1], [0, 0, 1, 1], [], []>} : vector<8x128xbf16>, vector<128x384xbf16>, vector<8x384xf32> -> vector<8x384xf32>
    %492 = arith.addf %489, %491 : vector<8x384xf32>
    %cst_131 = arith.constant dense<0.000000e+00> : vector<8xf32>
    %493 = vector.multi_reduction <add>, %492, %cst_131 [1] : vector<8x384xf32> to vector<8xf32>
    %494 = vector.shape_cast %493 : vector<8xf32> to vector<8x1xf32>
    %cst_132 = arith.constant 0.00260416674 : f32
    %495 = vector.broadcast %cst_132 : f32 to vector<8x1xf32>
    %496 = arith.mulf %494, %495 : vector<8x1xf32>
    %497 = vector.broadcast %496 : vector<8x1xf32> to vector<8x384xf32>
    %498 = arith.subf %492, %497 : vector<8x384xf32>
    %499 = arith.mulf %498, %498 : vector<8x384xf32>
    %cst_133 = arith.constant dense<0.000000e+00> : vector<8xf32>
    %500 = vector.multi_reduction <add>, %499, %cst_133 [1] : vector<8x384xf32> to vector<8xf32>
    %501 = vector.shape_cast %500 : vector<8xf32> to vector<8x1xf32>
    %cst_134 = arith.constant 0.00260416674 : f32
    %502 = vector.broadcast %cst_134 : f32 to vector<8x1xf32>
    %503 = arith.mulf %501, %502 : vector<8x1xf32>
    %cst_135 = arith.constant 1.000000e-03 : f32
    %504 = vector.broadcast %cst_135 : f32 to vector<8x1xf32>
    %505 = arith.addf %503, %504 : vector<8x1xf32>
    %506 = math.rsqrt %505 : vector<8x1xf32>
    %507 = vector.broadcast %506 : vector<8x1xf32> to vector<8x384xf32>
    %508 = arith.mulf %498, %507 : vector<8x384xf32>
    %509 = vector.broadcast %4 : vector<1x384xf32> to vector<8x384xf32>
    %510 = arith.mulf %508, %509 : vector<8x384xf32>
    %511 = vector.broadcast %5 : vector<1x384xf32> to vector<8x384xf32>
    %512 = arith.addf %510, %511 : vector<8x384xf32>
    %513 = vector.extract_strided_slice %512 {offsets = [0, 0], sizes = [8, 128], strides = [1, 1]} : vector<8x384xf32> to vector<8x128xf32>
    %514 = arith.negf %513 : vector<8x128xf32>
    %515 = math.exp %514 : vector<8x128xf32>
    %cst_136 = arith.constant 1.000000e+00 : f32
    %516 = vector.broadcast %cst_136 : f32 to vector<8x128xf32>
    %517 = arith.addf %516, %515 : vector<8x128xf32>
    %518 = arith.divf %516, %517 : vector<8x128xf32>
    %519 = vector.extract_strided_slice %512 {offsets = [0, 128], sizes = [8, 128], strides = [1, 1]} : vector<8x384xf32> to vector<8x128xf32>
    %520 = arith.mulf %518, %519 : vector<8x128xf32>
    %521 = math.tanh %520 : vector<8x128xf32>
    %522 = vector.extract_strided_slice %512 {offsets = [0, 256], sizes = [8, 128], strides = [1, 1]} : vector<8x384xf32> to vector<8x128xf32>
    %523 = arith.negf %522 : vector<8x128xf32>
    %524 = math.exp %523 : vector<8x128xf32>
    %cst_137 = arith.constant 1.000000e+00 : f32
    %525 = vector.broadcast %cst_137 : f32 to vector<8x128xf32>
    %526 = arith.addf %525, %524 : vector<8x128xf32>
    %527 = arith.divf %525, %526 : vector<8x128xf32>
    %528 = arith.subf %521, %482 : vector<8x128xf32>
    %529 = arith.mulf %527, %528 : vector<8x128xf32>
    %530 = arith.addf %482, %529 : vector<8x128xf32>
    %531 = arith.index_cast %c10_i32 : i32 to index
    %c0_138 = arith.constant 0 : index
    %c0_139 = arith.constant 0 : index
    %532 = vector.load %arg6[%531, %c0_138, %c0_139] : memref<16x8x128xf32, #tpu.memory_space<vmem>>, vector<1x8x128xf32>
    %533 = vector.shape_cast %532 : vector<1x8x128xf32> to vector<8x128xf32>
    %534 = vector.shape_cast %530 : vector<8x128xf32> to vector<1x8x128xf32>
    tpu.vector_store %arg6[%531, %c0_138, %c0_139], %534 {strides = array<i32>} : memref<16x8x128xf32, #tpu.memory_space<vmem>>, vector<1x8x128xf32>,
    %c11_i32 = arith.constant 11 : i32
    %535 = arith.index_cast %c11_i32 : i32 to index
    %c0_140 = arith.constant 0 : index
    %c0_141 = arith.constant 0 : index
    %536 = vector.load %arg1[%535, %c0_140, %c0_141] : memref<16x8x384xf32, #tpu.memory_space<vmem>>, vector<1x8x384xf32>
    %537 = vector.shape_cast %536 : vector<1x8x384xf32> to vector<8x384xf32>
    %538 = arith.truncf %530 : vector<8x128xf32> to vector<8x128xbf16>
    %cst_142 = arith.constant dense<0.000000e+00> : vector<8x384xf32>
    %539 = tpu.matmul %538, %3, %cst_142 {dimension_numbers = #tpu.dot_dimension_numbers<[1], [0], [0], [1], [0, 0, 1, 1], [], []>} : vector<8x128xbf16>, vector<128x384xbf16>, vector<8x384xf32> -> vector<8x384xf32>
    %540 = arith.addf %537, %539 : vector<8x384xf32>
    %cst_143 = arith.constant dense<0.000000e+00> : vector<8xf32>
    %541 = vector.multi_reduction <add>, %540, %cst_143 [1] : vector<8x384xf32> to vector<8xf32>
    %542 = vector.shape_cast %541 : vector<8xf32> to vector<8x1xf32>
    %cst_144 = arith.constant 0.00260416674 : f32
    %543 = vector.broadcast %cst_144 : f32 to vector<8x1xf32>
    %544 = arith.mulf %542, %543 : vector<8x1xf32>
    %545 = vector.broadcast %544 : vector<8x1xf32> to vector<8x384xf32>
    %546 = arith.subf %540, %545 : vector<8x384xf32>
    %547 = arith.mulf %546, %546 : vector<8x384xf32>
    %cst_145 = arith.constant dense<0.000000e+00> : vector<8xf32>
    %548 = vector.multi_reduction <add>, %547, %cst_145 [1] : vector<8x384xf32> to vector<8xf32>
    %549 = vector.shape_cast %548 : vector<8xf32> to vector<8x1xf32>
    %cst_146 = arith.constant 0.00260416674 : f32
    %550 = vector.broadcast %cst_146 : f32 to vector<8x1xf32>
    %551 = arith.mulf %549, %550 : vector<8x1xf32>
    %cst_147 = arith.constant 1.000000e-03 : f32
    %552 = vector.broadcast %cst_147 : f32 to vector<8x1xf32>
    %553 = arith.addf %551, %552 : vector<8x1xf32>
    %554 = math.rsqrt %553 : vector<8x1xf32>
    %555 = vector.broadcast %554 : vector<8x1xf32> to vector<8x384xf32>
    %556 = arith.mulf %546, %555 : vector<8x384xf32>
    %557 = vector.broadcast %4 : vector<1x384xf32> to vector<8x384xf32>
    %558 = arith.mulf %556, %557 : vector<8x384xf32>
    %559 = vector.broadcast %5 : vector<1x384xf32> to vector<8x384xf32>
    %560 = arith.addf %558, %559 : vector<8x384xf32>
    %561 = vector.extract_strided_slice %560 {offsets = [0, 0], sizes = [8, 128], strides = [1, 1]} : vector<8x384xf32> to vector<8x128xf32>
    %562 = arith.negf %561 : vector<8x128xf32>
    %563 = math.exp %562 : vector<8x128xf32>
    %cst_148 = arith.constant 1.000000e+00 : f32
    %564 = vector.broadcast %cst_148 : f32 to vector<8x128xf32>
    %565 = arith.addf %564, %563 : vector<8x128xf32>
    %566 = arith.divf %564, %565 : vector<8x128xf32>
    %567 = vector.extract_strided_slice %560 {offsets = [0, 128], sizes = [8, 128], strides = [1, 1]} : vector<8x384xf32> to vector<8x128xf32>
    %568 = arith.mulf %566, %567 : vector<8x128xf32>
    %569 = math.tanh %568 : vector<8x128xf32>
    %570 = vector.extract_strided_slice %560 {offsets = [0, 256], sizes = [8, 128], strides = [1, 1]} : vector<8x384xf32> to vector<8x128xf32>
    %571 = arith.negf %570 : vector<8x128xf32>
    %572 = math.exp %571 : vector<8x128xf32>
    %cst_149 = arith.constant 1.000000e+00 : f32
    %573 = vector.broadcast %cst_149 : f32 to vector<8x128xf32>
    %574 = arith.addf %573, %572 : vector<8x128xf32>
    %575 = arith.divf %573, %574 : vector<8x128xf32>
    %576 = arith.subf %569, %530 : vector<8x128xf32>
    %577 = arith.mulf %575, %576 : vector<8x128xf32>
    %578 = arith.addf %530, %577 : vector<8x128xf32>
    %579 = arith.index_cast %c11_i32 : i32 to index
    %c0_150 = arith.constant 0 : index
    %c0_151 = arith.constant 0 : index
    %580 = vector.load %arg6[%579, %c0_150, %c0_151] : memref<16x8x128xf32, #tpu.memory_space<vmem>>, vector<1x8x128xf32>
    %581 = vector.shape_cast %580 : vector<1x8x128xf32> to vector<8x128xf32>
    %582 = vector.shape_cast %578 : vector<8x128xf32> to vector<1x8x128xf32>
    tpu.vector_store %arg6[%579, %c0_150, %c0_151], %582 {strides = array<i32>} : memref<16x8x128xf32, #tpu.memory_space<vmem>>, vector<1x8x128xf32>,
    %c12_i32 = arith.constant 12 : i32
    %583 = arith.index_cast %c12_i32 : i32 to index
    %c0_152 = arith.constant 0 : index
    %c0_153 = arith.constant 0 : index
    %584 = vector.load %arg1[%583, %c0_152, %c0_153] : memref<16x8x384xf32, #tpu.memory_space<vmem>>, vector<1x8x384xf32>
    %585 = vector.shape_cast %584 : vector<1x8x384xf32> to vector<8x384xf32>
    %586 = arith.truncf %578 : vector<8x128xf32> to vector<8x128xbf16>
    %cst_154 = arith.constant dense<0.000000e+00> : vector<8x384xf32>
    %587 = tpu.matmul %586, %3, %cst_154 {dimension_numbers = #tpu.dot_dimension_numbers<[1], [0], [0], [1], [0, 0, 1, 1], [], []>} : vector<8x128xbf16>, vector<128x384xbf16>, vector<8x384xf32> -> vector<8x384xf32>
    %588 = arith.addf %585, %587 : vector<8x384xf32>
    %cst_155 = arith.constant dense<0.000000e+00> : vector<8xf32>
    %589 = vector.multi_reduction <add>, %588, %cst_155 [1] : vector<8x384xf32> to vector<8xf32>
    %590 = vector.shape_cast %589 : vector<8xf32> to vector<8x1xf32>
    %cst_156 = arith.constant 0.00260416674 : f32
    %591 = vector.broadcast %cst_156 : f32 to vector<8x1xf32>
    %592 = arith.mulf %590, %591 : vector<8x1xf32>
    %593 = vector.broadcast %592 : vector<8x1xf32> to vector<8x384xf32>
    %594 = arith.subf %588, %593 : vector<8x384xf32>
    %595 = arith.mulf %594, %594 : vector<8x384xf32>
    %cst_157 = arith.constant dense<0.000000e+00> : vector<8xf32>
    %596 = vector.multi_reduction <add>, %595, %cst_157 [1] : vector<8x384xf32> to vector<8xf32>
    %597 = vector.shape_cast %596 : vector<8xf32> to vector<8x1xf32>
    %cst_158 = arith.constant 0.00260416674 : f32
    %598 = vector.broadcast %cst_158 : f32 to vector<8x1xf32>
    %599 = arith.mulf %597, %598 : vector<8x1xf32>
    %cst_159 = arith.constant 1.000000e-03 : f32
    %600 = vector.broadcast %cst_159 : f32 to vector<8x1xf32>
    %601 = arith.addf %599, %600 : vector<8x1xf32>
    %602 = math.rsqrt %601 : vector<8x1xf32>
    %603 = vector.broadcast %602 : vector<8x1xf32> to vector<8x384xf32>
    %604 = arith.mulf %594, %603 : vector<8x384xf32>
    %605 = vector.broadcast %4 : vector<1x384xf32> to vector<8x384xf32>
    %606 = arith.mulf %604, %605 : vector<8x384xf32>
    %607 = vector.broadcast %5 : vector<1x384xf32> to vector<8x384xf32>
    %608 = arith.addf %606, %607 : vector<8x384xf32>
    %609 = vector.extract_strided_slice %608 {offsets = [0, 0], sizes = [8, 128], strides = [1, 1]} : vector<8x384xf32> to vector<8x128xf32>
    %610 = arith.negf %609 : vector<8x128xf32>
    %611 = math.exp %610 : vector<8x128xf32>
    %cst_160 = arith.constant 1.000000e+00 : f32
    %612 = vector.broadcast %cst_160 : f32 to vector<8x128xf32>
    %613 = arith.addf %612, %611 : vector<8x128xf32>
    %614 = arith.divf %612, %613 : vector<8x128xf32>
    %615 = vector.extract_strided_slice %608 {offsets = [0, 128], sizes = [8, 128], strides = [1, 1]} : vector<8x384xf32> to vector<8x128xf32>
    %616 = arith.mulf %614, %615 : vector<8x128xf32>
    %617 = math.tanh %616 : vector<8x128xf32>
    %618 = vector.extract_strided_slice %608 {offsets = [0, 256], sizes = [8, 128], strides = [1, 1]} : vector<8x384xf32> to vector<8x128xf32>
    %619 = arith.negf %618 : vector<8x128xf32>
    %620 = math.exp %619 : vector<8x128xf32>
    %cst_161 = arith.constant 1.000000e+00 : f32
    %621 = vector.broadcast %cst_161 : f32 to vector<8x128xf32>
    %622 = arith.addf %621, %620 : vector<8x128xf32>
    %623 = arith.divf %621, %622 : vector<8x128xf32>
    %624 = arith.subf %617, %578 : vector<8x128xf32>
    %625 = arith.mulf %623, %624 : vector<8x128xf32>
    %626 = arith.addf %578, %625 : vector<8x128xf32>
    %627 = arith.index_cast %c12_i32 : i32 to index
    %c0_162 = arith.constant 0 : index
    %c0_163 = arith.constant 0 : index
    %628 = vector.load %arg6[%627, %c0_162, %c0_163] : memref<16x8x128xf32, #tpu.memory_space<vmem>>, vector<1x8x128xf32>
    %629 = vector.shape_cast %628 : vector<1x8x128xf32> to vector<8x128xf32>
    %630 = vector.shape_cast %626 : vector<8x128xf32> to vector<1x8x128xf32>
    tpu.vector_store %arg6[%627, %c0_162, %c0_163], %630 {strides = array<i32>} : memref<16x8x128xf32, #tpu.memory_space<vmem>>, vector<1x8x128xf32>,
    %c13_i32 = arith.constant 13 : i32
    %631 = arith.index_cast %c13_i32 : i32 to index
    %c0_164 = arith.constant 0 : index
    %c0_165 = arith.constant 0 : index
    %632 = vector.load %arg1[%631, %c0_164, %c0_165] : memref<16x8x384xf32, #tpu.memory_space<vmem>>, vector<1x8x384xf32>
    %633 = vector.shape_cast %632 : vector<1x8x384xf32> to vector<8x384xf32>
    %634 = arith.truncf %626 : vector<8x128xf32> to vector<8x128xbf16>
    %cst_166 = arith.constant dense<0.000000e+00> : vector<8x384xf32>
    %635 = tpu.matmul %634, %3, %cst_166 {dimension_numbers = #tpu.dot_dimension_numbers<[1], [0], [0], [1], [0, 0, 1, 1], [], []>} : vector<8x128xbf16>, vector<128x384xbf16>, vector<8x384xf32> -> vector<8x384xf32>
    %636 = arith.addf %633, %635 : vector<8x384xf32>
    %cst_167 = arith.constant dense<0.000000e+00> : vector<8xf32>
    %637 = vector.multi_reduction <add>, %636, %cst_167 [1] : vector<8x384xf32> to vector<8xf32>
    %638 = vector.shape_cast %637 : vector<8xf32> to vector<8x1xf32>
    %cst_168 = arith.constant 0.00260416674 : f32
    %639 = vector.broadcast %cst_168 : f32 to vector<8x1xf32>
    %640 = arith.mulf %638, %639 : vector<8x1xf32>
    %641 = vector.broadcast %640 : vector<8x1xf32> to vector<8x384xf32>
    %642 = arith.subf %636, %641 : vector<8x384xf32>
    %643 = arith.mulf %642, %642 : vector<8x384xf32>
    %cst_169 = arith.constant dense<0.000000e+00> : vector<8xf32>
    %644 = vector.multi_reduction <add>, %643, %cst_169 [1] : vector<8x384xf32> to vector<8xf32>
    %645 = vector.shape_cast %644 : vector<8xf32> to vector<8x1xf32>
    %cst_170 = arith.constant 0.00260416674 : f32
    %646 = vector.broadcast %cst_170 : f32 to vector<8x1xf32>
    %647 = arith.mulf %645, %646 : vector<8x1xf32>
    %cst_171 = arith.constant 1.000000e-03 : f32
    %648 = vector.broadcast %cst_171 : f32 to vector<8x1xf32>
    %649 = arith.addf %647, %648 : vector<8x1xf32>
    %650 = math.rsqrt %649 : vector<8x1xf32>
    %651 = vector.broadcast %650 : vector<8x1xf32> to vector<8x384xf32>
    %652 = arith.mulf %642, %651 : vector<8x384xf32>
    %653 = vector.broadcast %4 : vector<1x384xf32> to vector<8x384xf32>
    %654 = arith.mulf %652, %653 : vector<8x384xf32>
    %655 = vector.broadcast %5 : vector<1x384xf32> to vector<8x384xf32>
    %656 = arith.addf %654, %655 : vector<8x384xf32>
    %657 = vector.extract_strided_slice %656 {offsets = [0, 0], sizes = [8, 128], strides = [1, 1]} : vector<8x384xf32> to vector<8x128xf32>
    %658 = arith.negf %657 : vector<8x128xf32>
    %659 = math.exp %658 : vector<8x128xf32>
    %cst_172 = arith.constant 1.000000e+00 : f32
    %660 = vector.broadcast %cst_172 : f32 to vector<8x128xf32>
    %661 = arith.addf %660, %659 : vector<8x128xf32>
    %662 = arith.divf %660, %661 : vector<8x128xf32>
    %663 = vector.extract_strided_slice %656 {offsets = [0, 128], sizes = [8, 128], strides = [1, 1]} : vector<8x384xf32> to vector<8x128xf32>
    %664 = arith.mulf %662, %663 : vector<8x128xf32>
    %665 = math.tanh %664 : vector<8x128xf32>
    %666 = vector.extract_strided_slice %656 {offsets = [0, 256], sizes = [8, 128], strides = [1, 1]} : vector<8x384xf32> to vector<8x128xf32>
    %667 = arith.negf %666 : vector<8x128xf32>
    %668 = math.exp %667 : vector<8x128xf32>
    %cst_173 = arith.constant 1.000000e+00 : f32
    %669 = vector.broadcast %cst_173 : f32 to vector<8x128xf32>
    %670 = arith.addf %669, %668 : vector<8x128xf32>
    %671 = arith.divf %669, %670 : vector<8x128xf32>
    %672 = arith.subf %665, %626 : vector<8x128xf32>
    %673 = arith.mulf %671, %672 : vector<8x128xf32>
    %674 = arith.addf %626, %673 : vector<8x128xf32>
    %675 = arith.index_cast %c13_i32 : i32 to index
    %c0_174 = arith.constant 0 : index
    %c0_175 = arith.constant 0 : index
    %676 = vector.load %arg6[%675, %c0_174, %c0_175] : memref<16x8x128xf32, #tpu.memory_space<vmem>>, vector<1x8x128xf32>
    %677 = vector.shape_cast %676 : vector<1x8x128xf32> to vector<8x128xf32>
    %678 = vector.shape_cast %674 : vector<8x128xf32> to vector<1x8x128xf32>
    tpu.vector_store %arg6[%675, %c0_174, %c0_175], %678 {strides = array<i32>} : memref<16x8x128xf32, #tpu.memory_space<vmem>>, vector<1x8x128xf32>,
    %c14_i32 = arith.constant 14 : i32
    %679 = arith.index_cast %c14_i32 : i32 to index
    %c0_176 = arith.constant 0 : index
    %c0_177 = arith.constant 0 : index
    %680 = vector.load %arg1[%679, %c0_176, %c0_177] : memref<16x8x384xf32, #tpu.memory_space<vmem>>, vector<1x8x384xf32>
    %681 = vector.shape_cast %680 : vector<1x8x384xf32> to vector<8x384xf32>
    %682 = arith.truncf %674 : vector<8x128xf32> to vector<8x128xbf16>
    %cst_178 = arith.constant dense<0.000000e+00> : vector<8x384xf32>
    %683 = tpu.matmul %682, %3, %cst_178 {dimension_numbers = #tpu.dot_dimension_numbers<[1], [0], [0], [1], [0, 0, 1, 1], [], []>} : vector<8x128xbf16>, vector<128x384xbf16>, vector<8x384xf32> -> vector<8x384xf32>
    %684 = arith.addf %681, %683 : vector<8x384xf32>
    %cst_179 = arith.constant dense<0.000000e+00> : vector<8xf32>
    %685 = vector.multi_reduction <add>, %684, %cst_179 [1] : vector<8x384xf32> to vector<8xf32>
    %686 = vector.shape_cast %685 : vector<8xf32> to vector<8x1xf32>
    %cst_180 = arith.constant 0.00260416674 : f32
    %687 = vector.broadcast %cst_180 : f32 to vector<8x1xf32>
    %688 = arith.mulf %686, %687 : vector<8x1xf32>
    %689 = vector.broadcast %688 : vector<8x1xf32> to vector<8x384xf32>
    %690 = arith.subf %684, %689 : vector<8x384xf32>
    %691 = arith.mulf %690, %690 : vector<8x384xf32>
    %cst_181 = arith.constant dense<0.000000e+00> : vector<8xf32>
    %692 = vector.multi_reduction <add>, %691, %cst_181 [1] : vector<8x384xf32> to vector<8xf32>
    %693 = vector.shape_cast %692 : vector<8xf32> to vector<8x1xf32>
    %cst_182 = arith.constant 0.00260416674 : f32
    %694 = vector.broadcast %cst_182 : f32 to vector<8x1xf32>
    %695 = arith.mulf %693, %694 : vector<8x1xf32>
    %cst_183 = arith.constant 1.000000e-03 : f32
    %696 = vector.broadcast %cst_183 : f32 to vector<8x1xf32>
    %697 = arith.addf %695, %696 : vector<8x1xf32>
    %698 = math.rsqrt %697 : vector<8x1xf32>
    %699 = vector.broadcast %698 : vector<8x1xf32> to vector<8x384xf32>
    %700 = arith.mulf %690, %699 : vector<8x384xf32>
    %701 = vector.broadcast %4 : vector<1x384xf32> to vector<8x384xf32>
    %702 = arith.mulf %700, %701 : vector<8x384xf32>
    %703 = vector.broadcast %5 : vector<1x384xf32> to vector<8x384xf32>
    %704 = arith.addf %702, %703 : vector<8x384xf32>
    %705 = vector.extract_strided_slice %704 {offsets = [0, 0], sizes = [8, 128], strides = [1, 1]} : vector<8x384xf32> to vector<8x128xf32>
    %706 = arith.negf %705 : vector<8x128xf32>
    %707 = math.exp %706 : vector<8x128xf32>
    %cst_184 = arith.constant 1.000000e+00 : f32
    %708 = vector.broadcast %cst_184 : f32 to vector<8x128xf32>
    %709 = arith.addf %708, %707 : vector<8x128xf32>
    %710 = arith.divf %708, %709 : vector<8x128xf32>
    %711 = vector.extract_strided_slice %704 {offsets = [0, 128], sizes = [8, 128], strides = [1, 1]} : vector<8x384xf32> to vector<8x128xf32>
    %712 = arith.mulf %710, %711 : vector<8x128xf32>
    %713 = math.tanh %712 : vector<8x128xf32>
    %714 = vector.extract_strided_slice %704 {offsets = [0, 256], sizes = [8, 128], strides = [1, 1]} : vector<8x384xf32> to vector<8x128xf32>
    %715 = arith.negf %714 : vector<8x128xf32>
    %716 = math.exp %715 : vector<8x128xf32>
    %cst_185 = arith.constant 1.000000e+00 : f32
    %717 = vector.broadcast %cst_185 : f32 to vector<8x128xf32>
    %718 = arith.addf %717, %716 : vector<8x128xf32>
    %719 = arith.divf %717, %718 : vector<8x128xf32>
    %720 = arith.subf %713, %674 : vector<8x128xf32>
    %721 = arith.mulf %719, %720 : vector<8x128xf32>
    %722 = arith.addf %674, %721 : vector<8x128xf32>
    %723 = arith.index_cast %c14_i32 : i32 to index
    %c0_186 = arith.constant 0 : index
    %c0_187 = arith.constant 0 : index
    %724 = vector.load %arg6[%723, %c0_186, %c0_187] : memref<16x8x128xf32, #tpu.memory_space<vmem>>, vector<1x8x128xf32>
    %725 = vector.shape_cast %724 : vector<1x8x128xf32> to vector<8x128xf32>
    %726 = vector.shape_cast %722 : vector<8x128xf32> to vector<1x8x128xf32>
    tpu.vector_store %arg6[%723, %c0_186, %c0_187], %726 {strides = array<i32>} : memref<16x8x128xf32, #tpu.memory_space<vmem>>, vector<1x8x128xf32>,
    %c15_i32 = arith.constant 15 : i32
    %727 = arith.index_cast %c15_i32 : i32 to index
    %c0_188 = arith.constant 0 : index
    %c0_189 = arith.constant 0 : index
    %728 = vector.load %arg1[%727, %c0_188, %c0_189] : memref<16x8x384xf32, #tpu.memory_space<vmem>>, vector<1x8x384xf32>
    %729 = vector.shape_cast %728 : vector<1x8x384xf32> to vector<8x384xf32>
    %730 = arith.truncf %722 : vector<8x128xf32> to vector<8x128xbf16>
    %cst_190 = arith.constant dense<0.000000e+00> : vector<8x384xf32>
    %731 = tpu.matmul %730, %3, %cst_190 {dimension_numbers = #tpu.dot_dimension_numbers<[1], [0], [0], [1], [0, 0, 1, 1], [], []>} : vector<8x128xbf16>, vector<128x384xbf16>, vector<8x384xf32> -> vector<8x384xf32>
    %732 = arith.addf %729, %731 : vector<8x384xf32>
    %cst_191 = arith.constant dense<0.000000e+00> : vector<8xf32>
    %733 = vector.multi_reduction <add>, %732, %cst_191 [1] : vector<8x384xf32> to vector<8xf32>
    %734 = vector.shape_cast %733 : vector<8xf32> to vector<8x1xf32>
    %cst_192 = arith.constant 0.00260416674 : f32
    %735 = vector.broadcast %cst_192 : f32 to vector<8x1xf32>
    %736 = arith.mulf %734, %735 : vector<8x1xf32>
    %737 = vector.broadcast %736 : vector<8x1xf32> to vector<8x384xf32>
    %738 = arith.subf %732, %737 : vector<8x384xf32>
    %739 = arith.mulf %738, %738 : vector<8x384xf32>
    %cst_193 = arith.constant dense<0.000000e+00> : vector<8xf32>
    %740 = vector.multi_reduction <add>, %739, %cst_193 [1] : vector<8x384xf32> to vector<8xf32>
    %741 = vector.shape_cast %740 : vector<8xf32> to vector<8x1xf32>
    %cst_194 = arith.constant 0.00260416674 : f32
    %742 = vector.broadcast %cst_194 : f32 to vector<8x1xf32>
    %743 = arith.mulf %741, %742 : vector<8x1xf32>
    %cst_195 = arith.constant 1.000000e-03 : f32
    %744 = vector.broadcast %cst_195 : f32 to vector<8x1xf32>
    %745 = arith.addf %743, %744 : vector<8x1xf32>
    %746 = math.rsqrt %745 : vector<8x1xf32>
    %747 = vector.broadcast %746 : vector<8x1xf32> to vector<8x384xf32>
    %748 = arith.mulf %738, %747 : vector<8x384xf32>
    %749 = vector.broadcast %4 : vector<1x384xf32> to vector<8x384xf32>
    %750 = arith.mulf %748, %749 : vector<8x384xf32>
    %751 = vector.broadcast %5 : vector<1x384xf32> to vector<8x384xf32>
    %752 = arith.addf %750, %751 : vector<8x384xf32>
    %753 = vector.extract_strided_slice %752 {offsets = [0, 0], sizes = [8, 128], strides = [1, 1]} : vector<8x384xf32> to vector<8x128xf32>
    %754 = arith.negf %753 : vector<8x128xf32>
    %755 = math.exp %754 : vector<8x128xf32>
    %cst_196 = arith.constant 1.000000e+00 : f32
    %756 = vector.broadcast %cst_196 : f32 to vector<8x128xf32>
    %757 = arith.addf %756, %755 : vector<8x128xf32>
    %758 = arith.divf %756, %757 : vector<8x128xf32>
    %759 = vector.extract_strided_slice %752 {offsets = [0, 128], sizes = [8, 128], strides = [1, 1]} : vector<8x384xf32> to vector<8x128xf32>
    %760 = arith.mulf %758, %759 : vector<8x128xf32>
    %761 = math.tanh %760 : vector<8x128xf32>
    %762 = vector.extract_strided_slice %752 {offsets = [0, 256], sizes = [8, 128], strides = [1, 1]} : vector<8x384xf32> to vector<8x128xf32>
    %763 = arith.negf %762 : vector<8x128xf32>
    %764 = math.exp %763 : vector<8x128xf32>
    %cst_197 = arith.constant 1.000000e+00 : f32
    %765 = vector.broadcast %cst_197 : f32 to vector<8x128xf32>
    %766 = arith.addf %765, %764 : vector<8x128xf32>
    %767 = arith.divf %765, %766 : vector<8x128xf32>
    %768 = arith.subf %761, %722 : vector<8x128xf32>
    %769 = arith.mulf %767, %768 : vector<8x128xf32>
    %770 = arith.addf %722, %769 : vector<8x128xf32>
    %771 = arith.index_cast %c15_i32 : i32 to index
    %c0_198 = arith.constant 0 : index
    %c0_199 = arith.constant 0 : index
    %772 = vector.load %arg6[%771, %c0_198, %c0_199] : memref<16x8x128xf32, #tpu.memory_space<vmem>>, vector<1x8x128xf32>
    %773 = vector.shape_cast %772 : vector<1x8x128xf32> to vector<8x128xf32>
    %774 = vector.shape_cast %770 : vector<8x128xf32> to vector<1x8x128xf32>
    tpu.vector_store %arg6[%771, %c0_198, %c0_199], %774 {strides = array<i32>} : memref<16x8x128xf32, #tpu.memory_space<vmem>>, vector<1x8x128xf32>,
    %c16_i32 = arith.constant 16 : i32
    %c0_200 = arith.constant 0 : index
    %c0_201 = arith.constant 0 : index
    %775 = vector.load %arg7[%c0_200, %c0_201] : memref<8x128xf32, #tpu.memory_space<vmem>>, vector<8x128xf32>
    tpu.vector_store %arg7[%c0_200, %c0_201], %770 {strides = array<i32>} : memref<8x128xf32, #tpu.memory_space<vmem>>, vector<8x128xf32>,
    return
  }
  func.func @transform_0(%arg0: i32) -> (i32, i32, i32) {
    %c0_i32 = arith.constant 0 : i32
    %c0_i32_0 = arith.constant 0 : i32
    %c0_i32_1 = arith.constant 0 : i32
    return %arg0, %c0_i32, %c0_i32_0 : i32, i32, i32
  }
  func.func @transform_1(%arg0: i32) -> (i32, i32) {
    %c0_i32 = arith.constant 0 : i32
    %c0_i32_0 = arith.constant 0 : i32
    %c0_i32_1 = arith.constant 0 : i32
    return %c0_i32, %c0_i32_0 : i32, i32
  }
  func.func @transform_2(%arg0: i32) -> (i32, i32) {
    %c0_i32 = arith.constant 0 : i32
    %c0_i32_0 = arith.constant 0 : i32
    %c0_i32_1 = arith.constant 0 : i32
    return %c0_i32, %c0_i32_0 : i32, i32
  }
  func.func @transform_3(%arg0: i32) -> (i32, i32) {
    %c0_i32 = arith.constant 0 : i32
    %c0_i32_0 = arith.constant 0 : i32
    %c0_i32_1 = arith.constant 0 : i32
    return %c0_i32, %c0_i32_0 : i32, i32
  }
  func.func @transform_4(%arg0: i32) -> (i32, i32) {
    %c0_i32 = arith.constant 0 : i32
    %c0_i32_0 = arith.constant 0 : i32
    %c0_i32_1 = arith.constant 0 : i32
    return %c0_i32, %c0_i32_0 : i32, i32
  }
  func.func @transform_5(%arg0: i32) -> (i32, i32, i32) {
    %c0_i32 = arith.constant 0 : i32
    %c0_i32_0 = arith.constant 0 : i32
    %c0_i32_1 = arith.constant 0 : i32
    return %arg0, %c0_i32, %c0_i32_0 : i32, i32, i32
  }
}

</mosaic_0001>

<bundles_post_ra>
// kernel: tpu_custom_call.1
= control target key start
LH: loop header
LB: loop body
LE: loop exit
PB: predicated region body
PF: predicated region fallthrough
CT: control target
= control target key end

     0   :  { %10 = vsyncpa [#allocation4], 0  ;;  %s3524_s0 = inlined_call_operand.hbm [shape: f32[16,8,384], index: 0, kind: input, shape index: {}]   ;;  %s3525_s1 = inlined_call_operand.hbm [shape: f32[8,128], index: 1, kind: input, shape index: {}]   ;;  %s3526_s2 = inlined_call_operand.hbm [shape: bf16[128,384], index: 2, kind: input, shape index: {}]   ;;  %s3527_s3 = inlined_call_operand.hbm [shape: f32[1,384], index: 3, kind: input, shape index: {}]   ;;  %s3528_s4 = inlined_call_operand.vmem [shape: f32[1,384], index: 4, kind: input, shape index: {}]   ;;  %s3529_s5 = inlined_call_operand.hbm [shape: f32[16,8,128], index: 5, kind: output, shape index: {}]  }
   0x1   :  { %11 = vsyncpa [#allocation7], 0 }
   0x2   :  { %12 = vsyncpa [#allocation10], 0  ;;  %s32_s20 = sshll.u32 %s3525_s1, 4  ;;  %s33_s20 = int_to_ptr.hbm [resolvable:$true] %s32_s20 }
   0x3   :  { %13 = vsyncpa [#allocation5], 0  ;;  %s2814_s21 = smov [#allocation6]   ;;  %s18_s25 = sshll.u32 %s3524_s0, 4  ;;  %s19_s25 = int_to_ptr.hbm [resolvable:$true] %s18_s25 }
   0x4   :  { %s34_s22 = sshll.u32 %s2814_s21, 4  ;;  %s2815_s26 = smov [#allocation3]   ;;  %s35_s22 = int_to_ptr.vmem [resolvable:$true] %s34_s22 }
   0x5   :  { %37 = dma.hbm_to_vmem [thread:$0]  %s33_s20, 128, %s35_s22, [#allocation7]  }
   0x6   :  { %s20_s27 = sshll.u32 %s2815_s26, 4  ;;  %s2816_s28 = smov 384   ;;  %s21_s27 = int_to_ptr.vmem [resolvable:$true] %s20_s27 }
   0x7   :  { %s2817_s29 = smov 24   ;;  %s42_s1 = sshll.u32 %s3526_s2, 4  ;;  %s43_s1 = int_to_ptr.hbm [resolvable:$true] %s42_s1 }
   0x8   :  { %26 = dma.hbm_to_vmem [thread:$0]  %s19_s25, 6144, %s21_s27, [#allocation4], %s2816_s28, %s2816_s28, %s2817_s29  }
   0x9   :  { %s2818_s7 = smov [#allocation8]   ;;  %s56_s0 = sshll.u32 %s3527_s3, 4  ;;  %s57_s0 = int_to_ptr.hbm [resolvable:$true] %s56_s0 }
   0xa   :  { %s44_s8 = sshll.u32 %s2818_s7, 4  ;;  %s2819_s11 = smov 192   ;;  %s45_s8 = int_to_ptr.vmem [resolvable:$true] %s44_s8 }
   0xb   :  { %s2820_s12 = smov 12   ;;  %s2821_s13 = smov [#allocation9]  }
   0xc   :  { %50 = dma.hbm_to_vmem [thread:$0]  %s43_s1, 3072, %s45_s8, [#allocation7], %s2819_s11, %s2819_s11, %s2820_s12  }
   0xd   :  { %s58_s14 = sshll.u32 %s2821_s13, 4  ;;  %s59_s14 = int_to_ptr.vmem [resolvable:$true] %s58_s14 }
   0xe   :  { %61 = dma.hbm_to_vmem [thread:$0]  %s57_s0, 48, %s59_s14, [#allocation10]  }
   0xf   :  { %2806 = dma.done.wait [#allocation4], 6144  }
  0x10   :  { %2807 = vsyncadd [#allocation4], 4294961152 }
  0x11   :  { %2808 = dma.done.wait [#allocation7], 3200  }
  0x12   :  { %2809 = vsyncadd [#allocation7], 4294964096 }
  0x13   :  { %2810 = dma.done.wait [#allocation10], 48  }
  0x14   :  { %2811 = vsyncadd [#allocation10], 4294967248  ;;  %v2417_v0 = vld [vmem:[#allocation8 + $0xa8] sm:$0xf]  ;;  %v2481_v1 = vld [vmem:[#allocation8 + $0xb0] sm:$0xf0] }
  0x15   :  { %v2480_v2 = vld [vmem:[#allocation8 + $0xac] sm:$0xf]  ;;  %v2867_v3 = vor.u32 %v2481_v1, %v2417_v0  ;;  %v2419_v4 = vld [vmem:[#allocation8 + $0xb4] sm:$0xf0]  ;;  %v2425_v5 = vld [vmem:[#allocation8 + $0xb0] sm:$0xf] }
  0x16   :  { %v2482_v6 = vld [vmem:[#allocation8 + $0xb8] sm:$0xf0]  ;;  %v2869_v7 = vor.u32 %v2480_v2, %v2419_v4  ;;  %v2405_v9 = vld [vmem:[#allocation8 + $0x90] sm:$0xf]  ;;  %v2477_v11 = vld [vmem:[#allocation8 + $0x94] sm:$0xf] }
  0x17   :  { %v2871_v8 = vor.u32 %v2482_v6, %v2425_v5  ;;  %v2478_v10 = vld [vmem:[#allocation8 + $0x98] sm:$0xf0]  ;;  %253 = vmatpush.bf16.msra.mxu0 %v2867_v3  ;;  %v2407_v13 = vld [vmem:[#allocation8 + $0x9c] sm:$0xf0]  ;;  %v2413_v14 = vld [vmem:[#allocation8 + $0x98] sm:$0xf]  ;;  %394 = vmatpush.bf16.msra.mxu3 %v2867_v3 }
  0x18   :  { %v2874_v12 = vor.u32 %v2478_v10, %v2405_v9  ;;  %v2479_v15 = vld [vmem:[#allocation8 + $0xa0] sm:$0xf0]  ;;  %266 = vmatpush.bf16.msra.mxu1 %v2869_v7  ;;  %v2879_v16 = vor.u32 %v2477_v11, %v2407_v13  ;;  %v2393_v18 = vld [vmem:[#allocation8 + $0x78] sm:$0xf]  ;;  %v2474_v20 = vld [vmem:[#allocation8 + $0x7c] sm:$0xf] }
  0x19   :  { %279 = vmatpush.bf16.msra.mxu2 %v2871_v8  ;;  %v2881_v17 = vor.u32 %v2479_v15, %v2413_v14  ;;  %v2475_v19 = vld [vmem:[#allocation8 + $0x80] sm:$0xf0]  ;;  %v2395_v21 = vld [vmem:[#allocation8 + $0x84] sm:$0xf0]  ;;  %v2401_v22 = vld [vmem:[#allocation8 + $0x80] sm:$0xf] }
  0x1a   :  { %v2476_v23 = vld [vmem:[#allocation8 + $0x88] sm:$0xf0]  ;;  %v2884_v24 = vor.u32 %v2475_v19, %v2393_v18  ;;  %v2889_v25 = vor.u32 %v2474_v20, %v2395_v21  ;;  %v2381_v27 = vld [vmem:[#allocation8 + $0x60] sm:$0xf]  ;;  %v2471_v29 = vld [vmem:[#allocation8 + $0x64] sm:$0xf] }
  0x1b   :  { %254 = vmatpush.bf16.msra.mxu0 %v2874_v12  ;;  %395 = vmatpush.bf16.msra.mxu3 %v2874_v12  ;;  %v2891_v26 = vor.u32 %v2476_v23, %v2401_v22  ;;  %v2472_v28 = vld [vmem:[#allocation8 + $0x68] sm:$0xf0]  ;;  %v2383_v30 = vld [vmem:[#allocation8 + $0x6c] sm:$0xf0]  ;;  %v2389_v31 = vld [vmem:[#allocation8 + $0x68] sm:$0xf] }
  0x1c   :  { %267 = vmatpush.bf16.msra.mxu1 %v2879_v16  ;;  %v2473_v32 = vld [vmem:[#allocation8 + $0x70] sm:$0xf0]  ;;  %v2894_v33 = vor.u32 %v2472_v28, %v2381_v27  ;;  %v2899_v34 = vor.u32 %v2471_v29, %v2383_v30  ;;  %v2369_v36 = vld [vmem:[#allocation8 + $0x48] sm:$0xf]  ;;  %v2468_v38 = vld [vmem:[#allocation8 + $0x4c] sm:$0xf] }
  0x1d   :  { %280 = vmatpush.bf16.msra.mxu2 %v2881_v17  ;;  %v2901_v35 = vor.u32 %v2473_v32, %v2389_v31  ;;  %v2469_v37 = vld [vmem:[#allocation8 + $0x50] sm:$0xf0]  ;;  %v2371_v39 = vld [vmem:[#allocation8 + $0x54] sm:$0xf0]  ;;  %v2377_v40 = vld [vmem:[#allocation8 + $0x50] sm:$0xf] }
  0x1e   :  { %v2470_v41 = vld [vmem:[#allocation8 + $0x58] sm:$0xf0]  ;;  %v2904_v42 = vor.u32 %v2469_v37, %v2369_v36  ;;  %v2909_v43 = vor.u32 %v2468_v38, %v2371_v39  ;;  %v2357_v45 = vld [vmem:[#allocation8 + $0x30] sm:$0xf]  ;;  %v2465_v47 = vld [vmem:[#allocation8 + $0x34] sm:$0xf] }
  0x1f   :  { %255 = vmatpush.bf16.msra.mxu0 %v2884_v24  ;;  %396 = vmatpush.bf16.msra.mxu3 %v2884_v24  ;;  %v2911_v44 = vor.u32 %v2470_v41, %v2377_v40  ;;  %v2466_v46 = vld [vmem:[#allocation8 + $0x38] sm:$0xf0]  ;;  %v2359_v48 = vld [vmem:[#allocation8 + $0x3c] sm:$0xf0]  ;;  %v2365_v49 = vld [vmem:[#allocation8 + $0x38] sm:$0xf] }
  0x20   :  { %268 = vmatpush.bf16.msra.mxu1 %v2889_v25  ;;  %v2467_v50 = vld [vmem:[#allocation8 + $0x40] sm:$0xf0]  ;;  %v2914_v51 = vor.u32 %v2466_v46, %v2357_v45  ;;  %v2919_v52 = vor.u32 %v2465_v47, %v2359_v48  ;;  %v2345_v54 = vld [vmem:[#allocation8 + $0x18] sm:$0xf]  ;;  %v2462_v56 = vld [vmem:[#allocation8 + $0x1c] sm:$0xf] }
  0x21   :  { %281 = vmatpush.bf16.msra.mxu2 %v2891_v26  ;;  %v2921_v53 = vor.u32 %v2467_v50, %v2365_v49  ;;  %v2463_v55 = vld [vmem:[#allocation8 + $0x20] sm:$0xf0]  ;;  %v2347_v57 = vld [vmem:[#allocation8 + $0x24] sm:$0xf0]  ;;  %v2353_v58 = vld [vmem:[#allocation8 + $0x20] sm:$0xf] }
  0x22   :  { %v2464_v59 = vld [vmem:[#allocation8 + $0x28] sm:$0xf0]  ;;  %v2924_v60 = vor.u32 %v2463_v55, %v2345_v54  ;;  %v2929_v61 = vor.u32 %v2462_v56, %v2347_v57  ;;  %v2333_v63 = vld [vmem:[#allocation8] sm:$0xf]  ;;  %v2459_v1 = vld [vmem:[#allocation8 + $0x4] sm:$0xf] }
  0x23   :  { %256 = vmatpush.bf16.msra.mxu0 %v2894_v33  ;;  %397 = vmatpush.bf16.msra.mxu3 %v2894_v33  ;;  %v2931_v62 = vor.u32 %v2464_v59, %v2353_v58  ;;  %v2460_v0 = vld [vmem:[#allocation8 + $0x8] sm:$0xf0]  ;;  %v2335_v2 = vld [vmem:[#allocation8 + $0xc] sm:$0xf0]  ;;  %v2341_v4 = vld [vmem:[#allocation8 + $0x8] sm:$0xf] }
  0x24   :  { %269 = vmatpush.bf16.msra.mxu1 %v2899_v34  ;;  %v2461_v5 = vld [vmem:[#allocation8 + $0x10] sm:$0xf0]  ;;  %v2934_v6 = vor.u32 %v2460_v0, %v2333_v63  ;;  %v2936_v9 = vld [vmem:[#allocation6] sm:$0xff]  ;;  %v2941_v10 = vor.u32 %v2459_v1, %v2335_v2  ;;  %v122_v15 = vld [vmem:[#allocation3 + $0x8] sm:$0xff]  ;;  %s2316_s18 = sshll.u32 %s3529_s5, 4  ;;  %s2823_s19 = smov 128   ;;  %s2317_s18 = int_to_ptr.hbm [resolvable:$true] %s2316_s18 }
  0x25   :  { %282 = vmatpush.bf16.msra.mxu2 %v2901_v35  ;;  %v2943_v11 = vor.u32 %v2461_v5, %v2341_v4  ;;  %v124_v13 = vpack.c.bf16 %v2936_v9, %v2936_v9  ;;  %v121_v14 = vld [vmem:[#allocation3] sm:$0xff]  ;;  %v123_v22 = vld [vmem:[#allocation3 + $0x10] sm:$0xff]  ;;  %v118_v59 = vld [vmem:[#allocation9] sm:$0x7]  ;;  %s2824_s20 = smov 8  }
  0x26   :  { %v119_v0 = vld [vmem:[%s3528_s4] sm:$0x7]  ;;  %v3010_v2 = vperm.slane %v118_v59, 0  ;;  %v3012_v4 = vperm.slane %v118_v59, 2  ;;  %s2822_s4 = smov [#allocation11]  }
  0x27   :  { %257 = vmatpush.bf16.msra.mxu0 %v2904_v42  ;;  %398 = vmatpush.bf16.msra.mxu3 %v2904_v42  ;;  %s2314_s15 = sshll.u32 %s2822_s4, 4  ;;  %s2315_s15 = int_to_ptr.vmem [resolvable:$true] %s2314_s15 }
  0x28   :  { %270 = vmatpush.bf16.msra.mxu1 %v2909_v43 }
  0x29   :  { %283 = vmatpush.bf16.msra.mxu2 %v2911_v44 }
  0x2b   :  { %258 = vmatpush.bf16.msra.mxu0 %v2914_v51  ;;  %399 = vmatpush.bf16.msra.mxu3 %v2914_v51 }
  0x2c   :  { %271 = vmatpush.bf16.msra.mxu1 %v2919_v52 }
  0x2d   :  { %284 = vmatpush.bf16.msra.mxu2 %v2921_v53 }
  0x2f   :  { %259 = vmatpush.bf16.msra.mxu0 %v2924_v60  ;;  %400 = vmatpush.bf16.msra.mxu3 %v2924_v60 }
  0x30   :  { %272 = vmatpush.bf16.msra.mxu1 %v2929_v61 }
  0x31   :  { %285 = vmatpush.bf16.msra.mxu2 %v2931_v62 }
  0x33   :  { %260 = vmatpush.bf16.msra.mxu0 %v2934_v6  ;;  %401 = vmatpush.bf16.msra.mxu3 %v2934_v6 }
  0x34   :  { %273 = vmatpush.bf16.msra.mxu1 %v2941_v10 }
  0x35   :  { %286 = vmatpush.bf16.msra.mxu2 %v2943_v11 }
  0x36   :  { %261 = vmatmul.bf16.vlgmr.msra.gmra.mxu0 %v124_v13 }
  0x37   :  { %407 = vmatpush.bf16.msrb.mxu0 %v2869_v7  ;;  %274 = vmatmul.bf16.vlgmr.msra.gmra.mxu1 %v124_v13 }
  0x38   :  { %420 = vmatpush.bf16.msrb.mxu1 %v2871_v8  ;;  %287 = vmatmul.bf16.vlgmr.msra.gmra.mxu2 %v124_v13  ;;  %v3014_v13 = vperm.slane %v119_v0, 0 }
  0x39   :  { %522 = vmatpush.bf16.msrb.mxu2 %v2867_v3  ;;  %535 = vmatpush.bf16.msrb.mxu3 %v2869_v7 }
  0x3b   :  { %408 = vmatpush.bf16.msrb.mxu0 %v2879_v16 }
  0x3c   :  { %421 = vmatpush.bf16.msrb.mxu1 %v2881_v17 }
  0x3d   :  { %523 = vmatpush.bf16.msrb.mxu2 %v2874_v12  ;;  %536 = vmatpush.bf16.msrb.mxu3 %v2879_v16 }
  0x3f   :  { %409 = vmatpush.bf16.msrb.mxu0 %v2889_v25 }
  0x40   :  { %422 = vmatpush.bf16.msrb.mxu1 %v2891_v26 }
  0x41   :  { %524 = vmatpush.bf16.msrb.mxu2 %v2884_v24  ;;  %537 = vmatpush.bf16.msrb.mxu3 %v2889_v25 }
  0x43   :  { %410 = vmatpush.bf16.msrb.mxu0 %v2899_v34 }
  0x44   :  { %423 = vmatpush.bf16.msrb.mxu1 %v2901_v35 }
  0x45   :  { %525 = vmatpush.bf16.msrb.mxu2 %v2894_v33  ;;  %538 = vmatpush.bf16.msrb.mxu3 %v2899_v34 }
  0x47   :  { %411 = vmatpush.bf16.msrb.mxu0 %v2909_v43 }
  0x48   :  { %424 = vmatpush.bf16.msrb.mxu1 %v2911_v44 }
  0x49   :  { %526 = vmatpush.bf16.msrb.mxu2 %v2904_v42  ;;  %539 = vmatpush.bf16.msrb.mxu3 %v2909_v43 }
  0x4b   :  { %412 = vmatpush.bf16.msrb.mxu0 %v2919_v52 }
  0x4c   :  { %425 = vmatpush.bf16.msrb.mxu1 %v2921_v53 }
  0x4d   :  { %527 = vmatpush.bf16.msrb.mxu2 %v2914_v51  ;;  %540 = vmatpush.bf16.msrb.mxu3 %v2919_v52 }
  0x4f   :  { %413 = vmatpush.bf16.msrb.mxu0 %v2929_v61 }
  0x50   :  { %426 = vmatpush.bf16.msrb.mxu1 %v2931_v62 }
  0x51   :  { %528 = vmatpush.bf16.msrb.mxu2 %v2924_v60  ;;  %541 = vmatpush.bf16.msrb.mxu3 %v2929_v61 }
  0x53   :  { %414 = vmatpush.bf16.msrb.mxu0 %v2941_v10 }
  0x54   :  { %427 = vmatpush.bf16.msrb.mxu1 %v2943_v11 }
  0x55   :  { %529 = vmatpush.bf16.msrb.mxu2 %v2934_v6  ;;  %542 = vmatpush.bf16.msrb.mxu3 %v2941_v10 }
  0x57   :  { %548 = vmatpush.bf16.msra.mxu0 %v2871_v8 }
  0x58   :  { %650 = vmatpush.bf16.msra.mxu1 %v2867_v3 }
  0x59   :  { %663 = vmatpush.bf16.msra.mxu2 %v2869_v7 }
  0x5b   :  { %549 = vmatpush.bf16.msra.mxu0 %v2881_v17 }
  0x5c   :  { %651 = vmatpush.bf16.msra.mxu1 %v2874_v12 }
  0x5d   :  { %664 = vmatpush.bf16.msra.mxu2 %v2879_v16 }
  0x5f   :  { %550 = vmatpush.bf16.msra.mxu0 %v2891_v26 }
  0x60   :  { %652 = vmatpush.bf16.msra.mxu1 %v2884_v24 }
  0x61   :  { %665 = vmatpush.bf16.msra.mxu2 %v2889_v25 }
  0x63   :  { %551 = vmatpush.bf16.msra.mxu0 %v2901_v35 }
  0x64   :  { %653 = vmatpush.bf16.msra.mxu1 %v2894_v33 }
  0x65   :  { %666 = vmatpush.bf16.msra.mxu2 %v2899_v34 }
  0x67   :  { %552 = vmatpush.bf16.msra.mxu0 %v2911_v44 }
  0x68   :  { %654 = vmatpush.bf16.msra.mxu1 %v2904_v42 }
  0x69   :  { %667 = vmatpush.bf16.msra.mxu2 %v2909_v43 }
  0x6b   :  { %553 = vmatpush.bf16.msra.mxu0 %v2921_v53 }
  0x6c   :  { %655 = vmatpush.bf16.msra.mxu1 %v2914_v51 }
  0x6d   :  { %668 = vmatpush.bf16.msra.mxu2 %v2919_v52 }
  0x6f   :  { %554 = vmatpush.bf16.msra.mxu0 %v2931_v62 }
  0x70   :  { %656 = vmatpush.bf16.msra.mxu1 %v2924_v60 }
  0x71   :  { %669 = vmatpush.bf16.msra.mxu2 %v2929_v61 }
  0x73   :  { %555 = vmatpush.bf16.msra.mxu0 %v2943_v11 }
  0x74   :  { %657 = vmatpush.bf16.msra.mxu1 %v2934_v6 }
  0x75   :  { %670 = vmatpush.bf16.msra.mxu2 %v2941_v10 }
  0xb3   :  { %v262_v18 = vpop.f32.mrf.mxu0 }
  0xb4   :  { %v275_v19 = vpop.f32.mrf.mxu1  ;;  %v292_v20 = vadd.f32 %v262_v18, %v121_v14  ;;  %v3016_v14 = vperm.slane %v119_v0, 2 }
  0xb5   :  { %v293_v21 = vadd.f32 %v275_v19, %v122_v15 }
  0xb7   :  { %v295_v23 = vadd.f32 %v293_v21, %v292_v20 }
  0xbb   :  { %v288_v27 = vpop.f32.mrf.mxu2  ;;  %v264_v29 = vpop.f32.mrf.mxu0 }
  0xbc   :  { %v294_v28 = vadd.f32 %v288_v27, %v123_v22  ;;  %v277_v30 = vpop.f32.mrf.mxu1 }
  0xbe   :  { %v296_v31 = vadd.f32 %v295_v23, %v294_v28 }
  0xc0   :  { %297 = vadd.xlane.f32.xlu0 %v296_v31 }
  0xc3   :  { %v290_v32 = vpop.f32.mrf.mxu2 }
 0x133   :  { %v298_v36 = vpop.xlane.xlu0 %297 }
 0x134   :  { %v299_v37 = vmul.f32 0.0026041667, %v298_v36 }
 0x136   :  { %v300_v38 = vsub.f32 %v292_v20, %v299_v37  ;;  %v301_v39 = vsub.f32 %v293_v21, %v299_v37  ;;  %v302_v40 = vsub.f32 %v294_v28, %v299_v37  ;;  %v3022_v37 = vperm.slane %v118_v59, 1 }
 0x138   :  { %v303_v41 = vmul.f32 %v300_v38, %v300_v38  ;;  %v304_v45 = vmul.f32 %v301_v39, %v301_v39  ;;  %v305_v46 = vmul.f32 %v302_v40, %v302_v40 }
 0x13a   :  { %v306_v47 = vadd.f32 %v304_v45, %v303_v41 }
 0x13c   :  { %v307_v48 = vadd.f32 %v306_v47, %v305_v46  ;;  %v3024_v46 = vperm.slane %v119_v0, 1 }
 0x13e   :  { %308 = vadd.xlane.f32.xlu0 %v307_v48 }
 0x1b1   :  { %v309_v49 = vpop.xlane.xlu0 %308 }
 0x1b2   :  { %v310_v50 = vmul.f32 0.0026041667, %v309_v49 }
 0x1b4   :  { %v311_v54 = vadd.f32 0.001, %v310_v50 }
 0x1b6   :  { %2494 = vrsqrt.f32 %v311_v54  ;;  %vm318_vm1 = vweird.f32 %v311_v54 }
 0x1bc   :  { %v2495_v55 = vpop.eup %2494 }
 0x1bd   :  { %v313_v56 = vmul.f32 %v2495_v55, %v311_v54  ;;  %vm319_vm0 = vweird.f32 %v2495_v55 }
 0x1be   :  { %vm320_vm2 = vmor %vm318_vm1, %vm319_vm0 }
 0x1bf   :  { %v314_v57 = vmul.f32 %v2495_v55, %v313_v56 }
 0x1c1   :  { %v315_v58 = vmul.f32 0.5, %v314_v57 }
 0x1c3   :  { %v316_v63 = vsub.f32 1.5, %v315_v58 }
 0x1c5   :  { %v317_v1 = vmul.f32 %v2495_v55, %v316_v63 }
 0x1c7   :  { %v321_v5 = vsel %vm320_vm2, %v2495_v55, %v317_v1 }
 0x1c8   :  { %v322_v15 = vmul.f32 %v321_v5, %v300_v38  ;;  %v324_v18 = vmul.f32 %v321_v5, %v302_v40  ;;  %v323_v38 = vmul.f32 %v321_v5, %v301_v39 }
 0x1ca   :  { %v332_v19 = vmul.f32 %v3010_v2, %v322_v15  ;;  %v334_v20 = vmul.f32 %v3012_v4, %v324_v18  ;;  %v333_v48 = vmul.f32 %v3022_v37, %v323_v38 }
 0x1cc   :  { %v342_v21 = vadd.f32 %v3014_v13, %v332_v19  ;;  %v344_v22 = vadd.f32 %v3016_v14, %v334_v20  ;;  %v343_v57 = vadd.f32 %v3024_v46, %v333_v48 }
 0x1ce   :  { %v2427_v23 = vmul.f32 -1.442695, %v342_v21  ;;  %v2428_v27 = vmul.f32 -1.442695, %v344_v22 }
 0x1d0   :  { %2496 = vpow2.f32 %v2427_v23 }
 0x1d1   :  { %2498 = vpow2.f32 %v2428_v27 }
 0x1d6   :  { %v2497_v28 = vpop.eup %2496 }
 0x1d7   :  { %v2499_v29 = vpop.eup %2498  ;;  %v348_v30 = vadd.f32 1.0, %v2497_v28 }
 0x1d8   :  { %v369_v31 = vadd.f32 1.0, %v2499_v29  ;;  %v391_v29 = vld [vmem:[#allocation3 + $0x20] sm:$0xff] }
 0x1d9   :  { %2500 = vrcp.f32 %v348_v30  ;;  %v360_v47 = vand.u32 2147483648, %v348_v30  ;;  %v358_v50 = vand.u32 2147483647, %v348_v30  ;;  %vm354_vm4 = vweird.f32 %v348_v30 }
 0x1da   :  { %2502 = vrcp.f32 %v369_v31  ;;  %v381_v1 = vand.u32 2147483648, %v369_v31  ;;  %vm375_vm8 = vweird.f32 %v369_v31  ;;  %v379_v5 = vand.u32 2147483647, %v369_v31 }
 0x1db   :  { %v361_v56 = vor.u32 1.1754944e-38, %v360_v47  ;;  %vm359_vm6 = vcmp.eq.f32.partialorder %v358_v50, 8.507059e+37 }
 0x1dc   :  { %v382_v19 = vor.u32 1.1754944e-38, %v381_v1  ;;  %vm380_vm10 = vcmp.eq.f32.partialorder %v379_v5, 8.507059e+37 }
 0x1df   :  { %v2501_v32 = vpop.eup %2500 }
 0x1e0   :  { %v2503_v36 = vpop.eup %2502  ;;  %v350_v40 = vmul.f32 %v2501_v32, %v348_v30  ;;  %vm355_vm3 = vweird.f32 %v2501_v32  ;;  %v390_v30 = vld [vmem:[#allocation3 + $0x18] sm:$0xff] }
 0x1e1   :  { %v371_v41 = vmul.f32 %v2503_v36, %v369_v31  ;;  %vm356_vm5 = vmor %vm354_vm4, %vm355_vm3  ;;  %vm376_vm7 = vweird.f32 %v2503_v36  ;;  %v392_v31 = vld [vmem:[#allocation3 + $0x28] sm:$0xff] }
 0x1e2   :  { %v351_v45 = vsub.f32 1.0, %v350_v40  ;;  %vm377_vm9 = vmor %vm375_vm8, %vm376_vm7 }
 0x1e3   :  { %v372_v54 = vsub.f32 1.0, %v371_v41 }
 0x1e4   :  { %v352_v49 = vmul.f32 %v2501_v32, %v351_v45 }
 0x1e5   :  { %v373_v59 = vmul.f32 %v2503_v36, %v372_v54 }
 0x1e6   :  { %v353_v55 = vadd.f32 %v2501_v32, %v352_v49 }
 0x1e7   :  { %v374_v0 = vadd.f32 %v2503_v36, %v373_v59 }
 0x1e8   :  { %v357_v58 = vsel %vm356_vm5, %v2501_v32, %v353_v55 }
 0x1e9   :  { %v362_v39 = vsel %vm359_vm6, %v361_v56, %v357_v58  ;;  %v378_v15 = vsel %vm377_vm9, %v2503_v36, %v374_v0 }
 0x1ea   :  { %v364_v63 = vmul.f32 %v362_v39, %v343_v57  ;;  %v383_v21 = vsel %vm380_vm10, %v382_v19, %v378_v15 }
 0x1ec   :  { %2504 = vtanh.f32 %v364_v63 }
 0x1f2   :  { %v2505_v18 = vpop.eup %2504 }
 0x1f3   :  { %v385_v20 = vsub.f32 %v2505_v18, %v2936_v9 }
 0x1f5   :  { %v386_v22 = vmul.f32 %v385_v20, %v383_v21 }
 0x1f7   :  { %v3030_v23 = vadd.f32 %v386_v22, %v2936_v9 }
 0x1f9   :  { %388 = vst [vmem:[#allocation11] sm:$0xff] %v3030_v23  ;;  %v393_v27 = vpack.c.bf16 %v3030_v23, %v3030_v23 }
 0x1fb   :  { %402 = vmatmul.bf16.vlgmr.msra.gmra.mxu3 %v393_v27  ;;  %415 = vmatmul.bf16.vlgmr.msrb.gmra.mxu0 %v393_v27 }
 0x1fc   :  { %428 = vmatmul.bf16.vlgmr.msrb.gmra.mxu1 %v393_v27  ;;  %676 = vmatpush.bf16.msra.mxu3 %v2871_v8 }
 0x1fd   :  { %778 = vmatpush.bf16.msrb.mxu0 %v2867_v3  ;;  %791 = vmatpush.bf16.msrb.mxu1 %v2869_v7 }
 0x200   :  { %677 = vmatpush.bf16.msra.mxu3 %v2881_v17 }
 0x201   :  { %779 = vmatpush.bf16.msrb.mxu0 %v2874_v12  ;;  %792 = vmatpush.bf16.msrb.mxu1 %v2879_v16 }
 0x204   :  { %678 = vmatpush.bf16.msra.mxu3 %v2891_v26 }
 0x205   :  { %780 = vmatpush.bf16.msrb.mxu0 %v2884_v24  ;;  %793 = vmatpush.bf16.msrb.mxu1 %v2889_v25 }
 0x208   :  { %679 = vmatpush.bf16.msra.mxu3 %v2901_v35 }
 0x209   :  { %781 = vmatpush.bf16.msrb.mxu0 %v2894_v33  ;;  %794 = vmatpush.bf16.msrb.mxu1 %v2899_v34 }
 0x20c   :  { %680 = vmatpush.bf16.msra.mxu3 %v2911_v44 }
 0x20d   :  { %782 = vmatpush.bf16.msrb.mxu0 %v2904_v42  ;;  %795 = vmatpush.bf16.msrb.mxu1 %v2909_v43 }
 0x210   :  { %681 = vmatpush.bf16.msra.mxu3 %v2921_v53 }
 0x211   :  { %783 = vmatpush.bf16.msrb.mxu0 %v2914_v51  ;;  %796 = vmatpush.bf16.msrb.mxu1 %v2919_v52 }
 0x214   :  { %682 = vmatpush.bf16.msra.mxu3 %v2931_v62 }
 0x215   :  { %784 = vmatpush.bf16.msrb.mxu0 %v2924_v60  ;;  %797 = vmatpush.bf16.msrb.mxu1 %v2929_v61 }
 0x218   :  { %683 = vmatpush.bf16.msra.mxu3 %v2943_v11 }
 0x219   :  { %785 = vmatpush.bf16.msrb.mxu0 %v2934_v6  ;;  %798 = vmatpush.bf16.msrb.mxu1 %v2941_v10 }
 0x278   :  { %v416_v9 = vpop.f32.mrf.mxu0 }
 0x279   :  { %v429_v28 = vpop.f32.mrf.mxu1  ;;  %v434_v36 = vadd.f32 %v416_v9, %v391_v29 }
 0x27a   :  { %v435_v41 = vadd.f32 %v429_v28, %v392_v31 }
 0x27e   :  { %v403_v32 = vpop.f32.mrf.mxu3 }
 0x27f   :  { %v433_v38 = vadd.f32 %v403_v32, %v390_v30 }
 0x280   :  { %v418_v40 = vpop.f32.mrf.mxu0 }
 0x281   :  { %v431_v45 = vpop.f32.mrf.mxu1  ;;  %v436_v47 = vadd.f32 %v434_v36, %v433_v38 }
 0x283   :  { %v437_v48 = vadd.f32 %v436_v47, %v435_v41 }
 0x285   :  { %438 = vadd.xlane.f32.xlu1 %v437_v48 }
 0x286   :  { %v405_v49 = vpop.f32.mrf.mxu3 }
 0x2f8   :  { %v439_v50 = vpop.xlane.xlu1 %438 }
 0x2f9   :  { %v440_v54 = vmul.f32 0.0026041667, %v439_v50 }
 0x2fb   :  { %v441_v55 = vsub.f32 %v433_v38, %v440_v54  ;;  %v442_v56 = vsub.f32 %v434_v36, %v440_v54  ;;  %v443_v57 = vsub.f32 %v435_v41, %v440_v54 }
 0x2fd   :  { %v444_v58 = vmul.f32 %v441_v55, %v441_v55  ;;  %v445_v39 = vmul.f32 %v442_v56, %v442_v56  ;;  %v446_v59 = vmul.f32 %v443_v57, %v443_v57 }
 0x2ff   :  { %v447_v63 = vadd.f32 %v445_v39, %v444_v58 }
 0x301   :  { %v448_v0 = vadd.f32 %v447_v63, %v446_v59 }
 0x303   :  { %449 = vadd.xlane.f32.xlu1 %v448_v0 }
 0x376   :  { %v450_v1 = vpop.xlane.xlu1 %449 }
 0x377   :  { %v451_v5 = vmul.f32 0.0026041667, %v450_v1 }
 0x379   :  { %v452_v15 = vadd.f32 0.001, %v451_v5 }
 0x37b   :  { %2506 = vrsqrt.f32 %v452_v15  ;;  %vm459_vm12 = vweird.f32 %v452_v15 }
 0x381   :  { %v2507_v18 = vpop.eup %2506 }
 0x382   :  { %v454_v19 = vmul.f32 %v2507_v18, %v452_v15  ;;  %vm460_vm11 = vweird.f32 %v2507_v18 }
 0x383   :  { %vm461_vm13 = vmor %vm459_vm12, %vm460_vm11 }
 0x384   :  { %v455_v20 = vmul.f32 %v2507_v18, %v454_v19 }
 0x386   :  { %v456_v21 = vmul.f32 0.5, %v455_v20 }
 0x388   :  { %v457_v22 = vsub.f32 1.5, %v456_v21 }
 0x38a   :  { %v458_v27 = vmul.f32 %v2507_v18, %v457_v22 }
 0x38c   :  { %v462_v9 = vsel %vm461_vm13, %v2507_v18, %v458_v27 }
 0x38d   :  { %v463_v28 = vmul.f32 %v462_v9, %v441_v55  ;;  %v465_v29 = vmul.f32 %v462_v9, %v443_v57  ;;  %v464_v54 = vmul.f32 %v462_v9, %v442_v56 }
 0x38f   :  { %v466_v30 = vmul.f32 %v463_v28, %v3010_v2  ;;  %v468_v31 = vmul.f32 %v465_v29, %v3012_v4  ;;  %v467_v59 = vmul.f32 %v464_v54, %v3022_v37 }
 0x391   :  { %v469_v32 = vadd.f32 %v466_v30, %v3014_v13  ;;  %v471_v36 = vadd.f32 %v468_v31, %v3016_v14  ;;  %v470_v18 = vadd.f32 %v467_v59, %v3024_v46 }
 0x393   :  { %v2429_v38 = vmul.f32 -1.442695, %v469_v32  ;;  %v2430_v40 = vmul.f32 -1.442695, %v471_v36 }
 0x395   :  { %2508 = vpow2.f32 %v2429_v38 }
 0x396   :  { %2510 = vpow2.f32 %v2430_v40 }
 0x39b   :  { %v2509_v41 = vpop.eup %2508 }
 0x39c   :  { %v2511_v45 = vpop.eup %2510  ;;  %v475_v47 = vadd.f32 1.0, %v2509_v41  ;;  %v518_v41 = vld [vmem:[#allocation3 + $0x30] sm:$0xff] }
 0x39d   :  { %v496_v48 = vadd.f32 1.0, %v2511_v45  ;;  %v519_v45 = vld [vmem:[#allocation3 + $0x38] sm:$0xff] }
 0x39e   :  { %2512 = vrcp.f32 %v475_v47  ;;  %v487_v39 = vand.u32 2147483648, %v475_v47  ;;  %v485_v0 = vand.u32 2147483647, %v475_v47  ;;  %vm481_vm15 = vweird.f32 %v475_v47 }
 0x39f   :  { %2514 = vrcp.f32 %v496_v48  ;;  %v508_v27 = vand.u32 2147483648, %v496_v48  ;;  %vm502_vm3 = vweird.f32 %v496_v48  ;;  %v506_v9 = vand.u32 2147483647, %v496_v48 }
 0x3a0   :  { %v488_v15 = vor.u32 1.1754944e-38, %v487_v39  ;;  %vm486_vm1 = vcmp.eq.f32.partialorder %v485_v0, 8.507059e+37 }
 0x3a1   :  { %v509_v30 = vor.u32 1.1754944e-38, %v508_v27  ;;  %vm507_vm5 = vcmp.eq.f32.partialorder %v506_v9, 8.507059e+37 }
 0x3a4   :  { %v2513_v49 = vpop.eup %2512 }
 0x3a5   :  { %v2515_v50 = vpop.eup %2514  ;;  %v477_v55 = vmul.f32 %v2513_v49, %v475_v47  ;;  %vm482_vm14 = vweird.f32 %v2513_v49  ;;  %v520_v47 = vld [vmem:[#allocation3 + $0x40] sm:$0xff] }
 0x3a6   :  { %v498_v57 = vmul.f32 %v2515_v50, %v496_v48  ;;  %vm483_vm0 = vmor %vm481_vm15, %vm482_vm14  ;;  %vm503_vm2 = vweird.f32 %v2515_v50 }
 0x3a7   :  { %v478_v58 = vsub.f32 1.0, %v477_v55  ;;  %vm504_vm4 = vmor %vm502_vm3, %vm503_vm2 }
 0x3a8   :  { %v499_v1 = vsub.f32 1.0, %v498_v57 }
 0x3a9   :  { %v479_v63 = vmul.f32 %v2513_v49, %v478_v58 }
 0x3aa   :  { %v500_v56 = vmul.f32 %v2515_v50, %v499_v1 }
 0x3ab   :  { %v480_v5 = vadd.f32 %v2513_v49, %v479_v63 }
 0x3ac   :  { %v501_v22 = vadd.f32 %v2515_v50, %v500_v56 }
 0x3ad   :  { %v484_v19 = vsel %vm483_vm0, %v2513_v49, %v480_v5 }
 0x3ae   :  { %v489_v20 = vsel %vm486_vm1, %v488_v15, %v484_v19  ;;  %v505_v28 = vsel %vm504_vm4, %v2515_v50, %v501_v22 }
 0x3af   :  { %v491_v21 = vmul.f32 %v489_v20, %v470_v18  ;;  %v510_v32 = vsel %vm507_vm5, %v509_v30, %v505_v28 }
 0x3b1   :  { %2516 = vtanh.f32 %v491_v21 }
 0x3b7   :  { %v2517_v29 = vpop.eup %2516 }
 0x3b8   :  { %v512_v31 = vsub.f32 %v2517_v29, %v3030_v23 }
 0x3ba   :  { %v513_v36 = vmul.f32 %v512_v31, %v510_v32 }
 0x3bc   :  { %v3067_v38 = vadd.f32 %v513_v36, %v3030_v23 }
 0x3be   :  { %516 = vst [vmem:[#allocation11 + $0x8] sm:$0xff] %v3067_v38  ;;  %v521_v40 = vpack.c.bf16 %v3067_v38, %v3067_v38 }
 0x3c0   :  { %530 = vmatmul.bf16.vlgmr.msrb.gmra.mxu2 %v521_v40  ;;  %543 = vmatmul.bf16.vlgmr.msrb.gmra.mxu3 %v521_v40 }
 0x3c1   :  { %556 = vmatmul.bf16.vlgmr.msra.gmra.mxu0 %v521_v40  ;;  %804 = vmatpush.bf16.msrb.mxu2 %v2871_v8 }
 0x3c2   :  { %906 = vmatpush.bf16.msrb.mxu3 %v2867_v3  ;;  %919 = vmatpush.bf16.msra.mxu0 %v2869_v7 }
 0x3c5   :  { %805 = vmatpush.bf16.msrb.mxu2 %v2881_v17 }
 0x3c6   :  { %907 = vmatpush.bf16.msrb.mxu3 %v2874_v12  ;;  %920 = vmatpush.bf16.msra.mxu0 %v2879_v16 }
 0x3c9   :  { %806 = vmatpush.bf16.msrb.mxu2 %v2891_v26 }
 0x3ca   :  { %908 = vmatpush.bf16.msrb.mxu3 %v2884_v24  ;;  %921 = vmatpush.bf16.msra.mxu0 %v2889_v25 }
 0x3cd   :  { %807 = vmatpush.bf16.msrb.mxu2 %v2901_v35 }
 0x3ce   :  { %909 = vmatpush.bf16.msrb.mxu3 %v2894_v33  ;;  %922 = vmatpush.bf16.msra.mxu0 %v2899_v34 }
 0x3d1   :  { %808 = vmatpush.bf16.msrb.mxu2 %v2911_v44 }
 0x3d2   :  { %910 = vmatpush.bf16.msrb.mxu3 %v2904_v42  ;;  %923 = vmatpush.bf16.msra.mxu0 %v2909_v43 }
 0x3d5   :  { %809 = vmatpush.bf16.msrb.mxu2 %v2921_v53 }
 0x3d6   :  { %911 = vmatpush.bf16.msrb.mxu3 %v2914_v51  ;;  %924 = vmatpush.bf16.msra.mxu0 %v2919_v52 }
 0x3d9   :  { %810 = vmatpush.bf16.msrb.mxu2 %v2931_v62 }
 0x3da   :  { %912 = vmatpush.bf16.msrb.mxu3 %v2924_v60  ;;  %925 = vmatpush.bf16.msra.mxu0 %v2929_v61 }
 0x3dd   :  { %811 = vmatpush.bf16.msrb.mxu2 %v2943_v11 }
 0x3de   :  { %913 = vmatpush.bf16.msrb.mxu3 %v2934_v6  ;;  %926 = vmatpush.bf16.msra.mxu0 %v2941_v10 }
 0x43e   :  { %v557_v23 = vpop.f32.mrf.mxu0 }
 0x43f   :  { %v563_v55 = vadd.f32 %v557_v23, %v520_v47 }
 0x443   :  { %v531_v48 = vpop.f32.mrf.mxu2  ;;  %v544_v49 = vpop.f32.mrf.mxu3 }
 0x444   :  { %v561_v50 = vadd.f32 %v531_v48, %v518_v41  ;;  %v562_v54 = vadd.f32 %v544_v49, %v519_v45 }
 0x446   :  { %v559_v57 = vpop.f32.mrf.mxu0  ;;  %v564_v58 = vadd.f32 %v562_v54, %v561_v50 }
 0x448   :  { %v565_v39 = vadd.f32 %v564_v58, %v563_v55 }
 0x44a   :  { %566 = vadd.xlane.f32.xlu2 %v565_v39 }
 0x44b   :  { %v533_v59 = vpop.f32.mrf.mxu2  ;;  %v546_v63 = vpop.f32.mrf.mxu3 }
 0x4bd   :  { %v567_v0 = vpop.xlane.xlu2 %566 }
 0x4be   :  { %v568_v1 = vmul.f32 0.0026041667, %v567_v0 }
 0x4c0   :  { %v569_v5 = vsub.f32 %v561_v50, %v568_v1  ;;  %v570_v15 = vsub.f32 %v562_v54, %v568_v1  ;;  %v571_v18 = vsub.f32 %v563_v55, %v568_v1 }
 0x4c2   :  { %v572_v19 = vmul.f32 %v569_v5, %v569_v5  ;;  %v573_v20 = vmul.f32 %v570_v15, %v570_v15  ;;  %v574_v56 = vmul.f32 %v571_v18, %v571_v18 }
 0x4c4   :  { %v575_v21 = vadd.f32 %v573_v20, %v572_v19 }
 0x4c6   :  { %v576_v22 = vadd.f32 %v575_v21, %v574_v56 }
 0x4c8   :  { %577 = vadd.xlane.f32.xlu2 %v576_v22 }
 0x53b   :  { %v578_v27 = vpop.xlane.xlu2 %577 }
 0x53c   :  { %v579_v9 = vmul.f32 0.0026041667, %v578_v27 }
 0x53e   :  { %v580_v28 = vadd.f32 0.001, %v579_v9 }
 0x540   :  { %2518 = vrsqrt.f32 %v580_v28  ;;  %vm587_vm7 = vweird.f32 %v580_v28 }
 0x546   :  { %v2519_v29 = vpop.eup %2518 }
 0x547   :  { %v582_v30 = vmul.f32 %v2519_v29, %v580_v28  ;;  %vm588_vm6 = vweird.f32 %v2519_v29 }
 0x548   :  { %vm589_vm8 = vmor %vm587_vm7, %vm588_vm6 }
 0x549   :  { %v583_v31 = vmul.f32 %v2519_v29, %v582_v30 }
 0x54b   :  { %v584_v32 = vmul.f32 0.5, %v583_v31 }
 0x54d   :  { %v585_v36 = vsub.f32 1.5, %v584_v32 }
 0x54f   :  { %v586_v40 = vmul.f32 %v2519_v29, %v585_v36 }
 0x551   :  { %v590_v23 = vsel %vm589_vm8, %v2519_v29, %v586_v40 }
 0x552   :  { %v591_v41 = vmul.f32 %v590_v23, %v569_v5  ;;  %v593_v45 = vmul.f32 %v590_v23, %v571_v18  ;;  %v592_v1 = vmul.f32 %v590_v23, %v570_v15 }
 0x554   :  { %v594_v47 = vmul.f32 %v591_v41, %v3010_v2  ;;  %v596_v48 = vmul.f32 %v593_v45, %v3012_v4  ;;  %v595_v56 = vmul.f32 %v592_v1, %v3022_v37 }
 0x556   :  { %v597_v49 = vadd.f32 %v594_v47, %v3014_v13  ;;  %v599_v50 = vadd.f32 %v596_v48, %v3016_v14  ;;  %v598_v29 = vadd.f32 %v595_v56, %v3024_v46 }
 0x558   :  { %v2431_v54 = vmul.f32 -1.442695, %v597_v49  ;;  %v2432_v55 = vmul.f32 -1.442695, %v599_v50 }
 0x55a   :  { %2520 = vpow2.f32 %v2431_v54 }
 0x55b   :  { %2522 = vpow2.f32 %v2432_v55 }
 0x560   :  { %v2521_v57 = vpop.eup %2520 }
 0x561   :  { %v2523_v58 = vpop.eup %2522  ;;  %v603_v39 = vadd.f32 1.0, %v2521_v57  ;;  %v646_v57 = vld [vmem:[#allocation3 + $0x48] sm:$0xff] }
 0x562   :  { %v624_v59 = vadd.f32 1.0, %v2523_v58  ;;  %v647_v58 = vld [vmem:[#allocation3 + $0x50] sm:$0xff] }
 0x563   :  { %2524 = vrcp.f32 %v603_v39  ;;  %v615_v20 = vand.u32 2147483648, %v603_v39  ;;  %v613_v22 = vand.u32 2147483647, %v603_v39  ;;  %vm609_vm10 = vweird.f32 %v603_v39 }
 0x564   :  { %2526 = vrcp.f32 %v624_v59  ;;  %v636_v40 = vand.u32 2147483648, %v624_v59  ;;  %vm630_vm14 = vweird.f32 %v624_v59  ;;  %v634_v23 = vand.u32 2147483647, %v624_v59 }
 0x565   :  { %v616_v28 = vor.u32 1.1754944e-38, %v615_v20  ;;  %vm614_vm12 = vcmp.eq.f32.partialorder %v613_v22, 8.507059e+37 }
 0x566   :  { %v637_v47 = vor.u32 1.1754944e-38, %v636_v40  ;;  %vm635_vm0 = vcmp.eq.f32.partialorder %v634_v23, 8.507059e+37 }
 0x569   :  { %v2525_v63 = vpop.eup %2524 }
 0x56a   :  { %v2527_v0 = vpop.eup %2526  ;;  %v605_v5 = vmul.f32 %v2525_v63, %v603_v39  ;;  %vm610_vm9 = vweird.f32 %v2525_v63 }
 0x56b   :  { %v626_v18 = vmul.f32 %v2527_v0, %v624_v59  ;;  %vm611_vm11 = vmor %vm609_vm10, %vm610_vm9  ;;  %vm631_vm13 = vweird.f32 %v2527_v0  ;;  %v648_v59 = vld [vmem:[#allocation3 + $0x58] sm:$0xff] }
 0x56c   :  { %v606_v19 = vsub.f32 1.0, %v605_v5  ;;  %vm632_vm15 = vmor %vm630_vm14, %vm631_vm13 }
 0x56d   :  { %v627_v27 = vsub.f32 1.0, %v626_v18 }
 0x56e   :  { %v607_v21 = vmul.f32 %v2525_v63, %v606_v19 }
 0x56f   :  { %v628_v15 = vmul.f32 %v2527_v0, %v627_v27 }
 0x570   :  { %v608_v9 = vadd.f32 %v2525_v63, %v607_v21 }
 0x571   :  { %v629_v36 = vadd.f32 %v2527_v0, %v628_v15 }
 0x572   :  { %v612_v30 = vsel %vm611_vm11, %v2525_v63, %v608_v9 }
 0x573   :  { %v617_v31 = vsel %vm614_vm12, %v616_v28, %v612_v30  ;;  %v633_v41 = vsel %vm632_vm15, %v2527_v0, %v629_v36 }
 0x574   :  { %v619_v32 = vmul.f32 %v617_v31, %v598_v29  ;;  %v638_v49 = vsel %vm635_vm0, %v637_v47, %v633_v41 }
 0x576   :  { %2528 = vtanh.f32 %v619_v32 }
 0x57c   :  { %v2529_v45 = vpop.eup %2528 }
 0x57d   :  { %v640_v48 = vsub.f32 %v2529_v45, %v3067_v38 }
 0x57f   :  { %v641_v50 = vmul.f32 %v640_v48, %v638_v49 }
 0x581   :  { %v3104_v54 = vadd.f32 %v641_v50, %v3067_v38 }
 0x583   :  { %644 = vst [vmem:[#allocation11 + $0x10] sm:$0xff] %v3104_v54  ;;  %v649_v55 = vpack.c.bf16 %v3104_v54, %v3104_v54 }
 0x585   :  { %658 = vmatmul.bf16.vlgmr.msra.gmra.mxu1 %v649_v55  ;;  %671 = vmatmul.bf16.vlgmr.msra.gmra.mxu2 %v649_v55 }
 0x586   :  { %684 = vmatmul.bf16.vlgmr.msra.gmra.mxu3 %v649_v55  ;;  %932 = vmatpush.bf16.msra.mxu1 %v2871_v8 }
 0x587   :  { %1034 = vmatpush.bf16.msra.mxu2 %v2867_v3  ;;  %1047 = vmatpush.bf16.msra.mxu3 %v2869_v7 }
 0x58a   :  { %933 = vmatpush.bf16.msra.mxu1 %v2881_v17 }
 0x58b   :  { %1035 = vmatpush.bf16.msra.mxu2 %v2874_v12  ;;  %1048 = vmatpush.bf16.msra.mxu3 %v2879_v16 }
 0x58e   :  { %934 = vmatpush.bf16.msra.mxu1 %v2891_v26 }
 0x58f   :  { %1036 = vmatpush.bf16.msra.mxu2 %v2884_v24  ;;  %1049 = vmatpush.bf16.msra.mxu3 %v2889_v25 }
 0x592   :  { %935 = vmatpush.bf16.msra.mxu1 %v2901_v35 }
 0x593   :  { %1037 = vmatpush.bf16.msra.mxu2 %v2894_v33  ;;  %1050 = vmatpush.bf16.msra.mxu3 %v2899_v34 }
 0x596   :  { %936 = vmatpush.bf16.msra.mxu1 %v2911_v44 }
 0x597   :  { %1038 = vmatpush.bf16.msra.mxu2 %v2904_v42  ;;  %1051 = vmatpush.bf16.msra.mxu3 %v2909_v43 }
 0x59a   :  { %937 = vmatpush.bf16.msra.mxu1 %v2921_v53 }
 0x59b   :  { %1039 = vmatpush.bf16.msra.mxu2 %v2914_v51  ;;  %1052 = vmatpush.bf16.msra.mxu3 %v2919_v52 }
 0x59e   :  { %938 = vmatpush.bf16.msra.mxu1 %v2931_v62 }
 0x59f   :  { %1040 = vmatpush.bf16.msra.mxu2 %v2924_v60  ;;  %1053 = vmatpush.bf16.msra.mxu3 %v2929_v61 }
 0x5a2   :  { %939 = vmatpush.bf16.msra.mxu1 %v2943_v11 }
 0x5a3   :  { %1041 = vmatpush.bf16.msra.mxu2 %v2934_v6  ;;  %1054 = vmatpush.bf16.msra.mxu3 %v2941_v10 }
 0x602   :  { %v659_v38 = vpop.f32.mrf.mxu1 }
 0x603   :  { %v689_v63 = vadd.f32 %v659_v38, %v646_v57 }
 0x608   :  { %v672_v39 = vpop.f32.mrf.mxu2 }
 0x609   :  { %v690_v0 = vadd.f32 %v672_v39, %v647_v58  ;;  %v685_v1 = vpop.f32.mrf.mxu3 }
 0x60a   :  { %v661_v5 = vpop.f32.mrf.mxu1  ;;  %v691_v19 = vadd.f32 %v685_v1, %v648_v59 }
 0x60b   :  { %v692_v18 = vadd.f32 %v690_v0, %v689_v63 }
 0x60d   :  { %v693_v20 = vadd.f32 %v692_v18, %v691_v19 }
 0x60f   :  { %694 = vadd.xlane.f32.xlu0 %v693_v20 }
 0x610   :  { %v674_v56 = vpop.f32.mrf.mxu2 }
 0x611   :  { %v687_v21 = vpop.f32.mrf.mxu3 }
 0x682   :  { %v695_v22 = vpop.xlane.xlu0 %694 }
 0x683   :  { %v696_v27 = vmul.f32 0.0026041667, %v695_v22 }
 0x685   :  { %v697_v9 = vsub.f32 %v689_v63, %v696_v27  ;;  %v698_v28 = vsub.f32 %v690_v0, %v696_v27  ;;  %v699_v29 = vsub.f32 %v691_v19, %v696_v27 }
 0x687   :  { %v700_v30 = vmul.f32 %v697_v9, %v697_v9  ;;  %v701_v31 = vmul.f32 %v698_v28, %v698_v28  ;;  %v702_v15 = vmul.f32 %v699_v29, %v699_v29 }
 0x689   :  { %v703_v32 = vadd.f32 %v701_v31, %v700_v30 }
 0x68b   :  { %v704_v36 = vadd.f32 %v703_v32, %v702_v15 }
 0x68d   :  { %705 = vadd.xlane.f32.xlu1 %v704_v36 }
 0x700   :  { %v706_v40 = vpop.xlane.xlu1 %705 }
 0x701   :  { %v707_v23 = vmul.f32 0.0026041667, %v706_v40 }
 0x703   :  { %v708_v41 = vadd.f32 0.001, %v707_v23 }
 0x705   :  { %2530 = vrsqrt.f32 %v708_v41  ;;  %vm715_vm2 = vweird.f32 %v708_v41 }
 0x70b   :  { %v2531_v45 = vpop.eup %2530 }
 0x70c   :  { %v710_v47 = vmul.f32 %v2531_v45, %v708_v41  ;;  %vm716_vm1 = vweird.f32 %v2531_v45 }
 0x70d   :  { %vm717_vm3 = vmor %vm715_vm2, %vm716_vm1 }
 0x70e   :  { %v711_v48 = vmul.f32 %v2531_v45, %v710_v47 }
 0x710   :  { %v712_v49 = vmul.f32 0.5, %v711_v48 }
 0x712   :  { %v713_v50 = vsub.f32 1.5, %v712_v49 }
 0x714   :  { %v714_v55 = vmul.f32 %v2531_v45, %v713_v50 }
 0x716   :  { %v718_v38 = vsel %vm717_vm3, %v2531_v45, %v714_v55 }
 0x717   :  { %v719_v57 = vmul.f32 %v718_v38, %v697_v9  ;;  %v721_v58 = vmul.f32 %v718_v38, %v699_v29  ;;  %v720_v27 = vmul.f32 %v718_v38, %v698_v28 }
 0x719   :  { %v722_v39 = vmul.f32 %v719_v57, %v3010_v2  ;;  %v724_v59 = vmul.f32 %v721_v58, %v3012_v4  ;;  %v723_v15 = vmul.f32 %v720_v27, %v3022_v37 }
 0x71b   :  { %v725_v63 = vadd.f32 %v722_v39, %v3014_v13  ;;  %v727_v0 = vadd.f32 %v724_v59, %v3016_v14  ;;  %v726_v45 = vadd.f32 %v723_v15, %v3024_v46 }
 0x71d   :  { %v2433_v1 = vmul.f32 -1.442695, %v725_v63  ;;  %v2434_v5 = vmul.f32 -1.442695, %v727_v0 }
 0x71f   :  { %2532 = vpow2.f32 %v2433_v1 }
 0x720   :  { %2534 = vpow2.f32 %v2434_v5 }
 0x725   :  { %v2533_v18 = vpop.eup %2532 }
 0x726   :  { %v2535_v19 = vpop.eup %2534  ;;  %v731_v20 = vadd.f32 1.0, %v2533_v18 }
 0x727   :  { %v752_v56 = vadd.f32 1.0, %v2535_v19  ;;  %v774_v19 = vld [vmem:[#allocation3 + $0x60] sm:$0xff] }
 0x728   :  { %2536 = vrcp.f32 %v731_v20  ;;  %v743_v31 = vand.u32 2147483648, %v731_v20  ;;  %v741_v36 = vand.u32 2147483647, %v731_v20  ;;  %vm737_vm5 = vweird.f32 %v731_v20 }
 0x729   :  { %2538 = vrcp.f32 %v752_v56  ;;  %v764_v55 = vand.u32 2147483648, %v752_v56  ;;  %vm758_vm9 = vweird.f32 %v752_v56  ;;  %v762_v38 = vand.u32 2147483647, %v752_v56 }
 0x72a   :  { %v744_v41 = vor.u32 1.1754944e-38, %v743_v31  ;;  %vm742_vm7 = vcmp.eq.f32.partialorder %v741_v36, 8.507059e+37 }
 0x72b   :  { %v765_v39 = vor.u32 1.1754944e-38, %v764_v55  ;;  %vm763_vm11 = vcmp.eq.f32.partialorder %v762_v38, 8.507059e+37 }
 0x72e   :  { %v2537_v21 = vpop.eup %2536 }
 0x72f   :  { %v2539_v22 = vpop.eup %2538  ;;  %v733_v9 = vmul.f32 %v2537_v21, %v731_v20  ;;  %vm738_vm4 = vweird.f32 %v2537_v21  ;;  %v775_v20 = vld [vmem:[#allocation3 + $0x68] sm:$0xff] }
 0x730   :  { %v754_v29 = vmul.f32 %v2539_v22, %v752_v56  ;;  %vm739_vm6 = vmor %vm737_vm5, %vm738_vm4  ;;  %vm759_vm8 = vweird.f32 %v2539_v22 }
 0x731   :  { %v734_v30 = vsub.f32 1.0, %v733_v9  ;;  %vm760_vm10 = vmor %vm758_vm9, %vm759_vm8 }
 0x732   :  { %v755_v40 = vsub.f32 1.0, %v754_v29 }
 0x733   :  { %v735_v32 = vmul.f32 %v2537_v21, %v734_v30 }
 0x734   :  { %v756_v28 = vmul.f32 %v2539_v22, %v755_v40 }
 0x735   :  { %v736_v23 = vadd.f32 %v2537_v21, %v735_v32 }
 0x736   :  { %v757_v50 = vadd.f32 %v2539_v22, %v756_v28 }
 0x737   :  { %v740_v47 = vsel %vm739_vm6, %v2537_v21, %v736_v23 }
 0x738   :  { %v745_v48 = vsel %vm742_vm7, %v744_v41, %v740_v47  ;;  %v761_v57 = vsel %vm760_vm10, %v2539_v22, %v757_v50  ;;  %v776_v22 = vld [vmem:[#allocation3 + $0x70] sm:$0xff] }
 0x739   :  { %v747_v49 = vmul.f32 %v745_v48, %v726_v45  ;;  %v766_v63 = vsel %vm763_vm11, %v765_v39, %v761_v57 }
 0x73b   :  { %2540 = vtanh.f32 %v747_v49 }
 0x741   :  { %v2541_v58 = vpop.eup %2540 }
 0x742   :  { %v768_v59 = vsub.f32 %v2541_v58, %v3104_v54 }
 0x744   :  { %v769_v0 = vmul.f32 %v768_v59, %v766_v63 }
 0x746   :  { %v3141_v1 = vadd.f32 %v769_v0, %v3104_v54 }
 0x748   :  { %772 = vst [vmem:[#allocation11 + $0x18] sm:$0xff] %v3141_v1  ;;  %v777_v5 = vpack.c.bf16 %v3141_v1, %v3141_v1 }
 0x74a   :  { %786 = vmatmul.bf16.vlgmr.msrb.gmra.mxu0 %v777_v5  ;;  %799 = vmatmul.bf16.vlgmr.msrb.gmra.mxu1 %v777_v5 }
 0x74b   :  { %812 = vmatmul.bf16.vlgmr.msrb.gmra.mxu2 %v777_v5  ;;  %1060 = vmatpush.bf16.msrb.mxu0 %v2871_v8 }
 0x74c   :  { %1162 = vmatpush.bf16.msrb.mxu1 %v2867_v3  ;;  %1175 = vmatpush.bf16.msrb.mxu2 %v2869_v7 }
 0x74f   :  { %1061 = vmatpush.bf16.msrb.mxu0 %v2881_v17 }
 0x750   :  { %1163 = vmatpush.bf16.msrb.mxu1 %v2874_v12  ;;  %1176 = vmatpush.bf16.msrb.mxu2 %v2879_v16 }
 0x753   :  { %1062 = vmatpush.bf16.msrb.mxu0 %v2891_v26 }
 0x754   :  { %1164 = vmatpush.bf16.msrb.mxu1 %v2884_v24  ;;  %1177 = vmatpush.bf16.msrb.mxu2 %v2889_v25 }
 0x757   :  { %1063 = vmatpush.bf16.msrb.mxu0 %v2901_v35 }
 0x758   :  { %1165 = vmatpush.bf16.msrb.mxu1 %v2894_v33  ;;  %1178 = vmatpush.bf16.msrb.mxu2 %v2899_v34 }
 0x75b   :  { %1064 = vmatpush.bf16.msrb.mxu0 %v2911_v44 }
 0x75c   :  { %1166 = vmatpush.bf16.msrb.mxu1 %v2904_v42  ;;  %1179 = vmatpush.bf16.msrb.mxu2 %v2909_v43 }
 0x75f   :  { %1065 = vmatpush.bf16.msrb.mxu0 %v2921_v53 }
 0x760   :  { %1167 = vmatpush.bf16.msrb.mxu1 %v2914_v51  ;;  %1180 = vmatpush.bf16.msrb.mxu2 %v2919_v52 }
 0x763   :  { %1066 = vmatpush.bf16.msrb.mxu0 %v2931_v62 }
 0x764   :  { %1168 = vmatpush.bf16.msrb.mxu1 %v2924_v60  ;;  %1181 = vmatpush.bf16.msrb.mxu2 %v2929_v61 }
 0x767   :  { %1067 = vmatpush.bf16.msrb.mxu0 %v2943_v11 }
 0x768   :  { %1169 = vmatpush.bf16.msrb.mxu1 %v2934_v6  ;;  %1182 = vmatpush.bf16.msrb.mxu2 %v2941_v10 }
 0x7c7   :  { %v787_v54 = vpop.f32.mrf.mxu0  ;;  %v800_v18 = vpop.f32.mrf.mxu1 }
 0x7c8   :  { %v817_v56 = vadd.f32 %v787_v54, %v774_v19  ;;  %v818_v21 = vadd.f32 %v800_v18, %v775_v20 }
 0x7ca   :  { %v820_v9 = vadd.f32 %v818_v21, %v817_v56 }
 0x7ce   :  { %v813_v27 = vpop.f32.mrf.mxu2 }
 0x7cf   :  { %v819_v29 = vadd.f32 %v813_v27, %v776_v22  ;;  %v789_v30 = vpop.f32.mrf.mxu0  ;;  %v802_v31 = vpop.f32.mrf.mxu1 }
 0x7d1   :  { %v821_v15 = vadd.f32 %v820_v9, %v819_v29 }
 0x7d3   :  { %822 = vadd.xlane.f32.xlu2 %v821_v15 }
 0x7d6   :  { %v815_v32 = vpop.f32.mrf.mxu2 }
 0x846   :  { %v823_v36 = vpop.xlane.xlu2 %822 }
 0x847   :  { %v824_v40 = vmul.f32 0.0026041667, %v823_v36 }
 0x849   :  { %v825_v23 = vsub.f32 %v817_v56, %v824_v40  ;;  %v826_v41 = vsub.f32 %v818_v21, %v824_v40  ;;  %v827_v45 = vsub.f32 %v819_v29, %v824_v40 }
 0x84b   :  { %v828_v47 = vmul.f32 %v825_v23, %v825_v23  ;;  %v829_v48 = vmul.f32 %v826_v41, %v826_v41  ;;  %v830_v28 = vmul.f32 %v827_v45, %v827_v45 }
 0x84d   :  { %v831_v49 = vadd.f32 %v829_v48, %v828_v47 }
 0x84f   :  { %v832_v50 = vadd.f32 %v831_v49, %v830_v28 }
 0x851   :  { %833 = vadd.xlane.f32.xlu0 %v832_v50 }
 0x8c4   :  { %v834_v55 = vpop.xlane.xlu0 %833 }
 0x8c5   :  { %v835_v38 = vmul.f32 0.0026041667, %v834_v55 }
 0x8c7   :  { %v836_v57 = vadd.f32 0.001, %v835_v38 }
 0x8c9   :  { %2542 = vrsqrt.f32 %v836_v57  ;;  %vm843_vm13 = vweird.f32 %v836_v57 }
 0x8cf   :  { %v2543_v58 = vpop.eup %2542 }
 0x8d0   :  { %v838_v39 = vmul.f32 %v2543_v58, %v836_v57  ;;  %vm844_vm12 = vweird.f32 %v2543_v58 }
 0x8d1   :  { %vm845_vm14 = vmor %vm843_vm13, %vm844_vm12 }
 0x8d2   :  { %v839_v59 = vmul.f32 %v2543_v58, %v838_v39 }
 0x8d4   :  { %v840_v63 = vmul.f32 0.5, %v839_v59 }
 0x8d6   :  { %v841_v0 = vsub.f32 1.5, %v840_v63 }
 0x8d8   :  { %v842_v5 = vmul.f32 %v2543_v58, %v841_v0 }
 0x8da   :  { %v846_v54 = vsel %vm845_vm14, %v2543_v58, %v842_v5 }
 0x8db   :  { %v847_v18 = vmul.f32 %v846_v54, %v825_v23  ;;  %v849_v19 = vmul.f32 %v846_v54, %v827_v45  ;;  %v848_v40 = vmul.f32 %v846_v54, %v826_v41 }
 0x8dd   :  { %v850_v20 = vmul.f32 %v847_v18, %v3010_v2  ;;  %v852_v56 = vmul.f32 %v849_v19, %v3012_v4  ;;  %v851_v28 = vmul.f32 %v848_v40, %v3022_v37 }
 0x8df   :  { %v853_v21 = vadd.f32 %v850_v20, %v3014_v13  ;;  %v855_v22 = vadd.f32 %v852_v56, %v3016_v14  ;;  %v854_v58 = vadd.f32 %v851_v28, %v3024_v46 }
 0x8e1   :  { %v2435_v27 = vmul.f32 -1.442695, %v853_v21  ;;  %v2436_v9 = vmul.f32 -1.442695, %v855_v22 }
 0x8e3   :  { %2544 = vpow2.f32 %v2435_v27 }
 0x8e4   :  { %2546 = vpow2.f32 %v2436_v9 }
 0x8e9   :  { %v2545_v29 = vpop.eup %2544 }
 0x8ea   :  { %v2547_v30 = vpop.eup %2546  ;;  %v859_v31 = vadd.f32 1.0, %v2545_v29 }
 0x8eb   :  { %v880_v15 = vadd.f32 1.0, %v2547_v30  ;;  %v903_v30 = vld [vmem:[#allocation3 + $0x80] sm:$0xff] }
 0x8ec   :  { %2548 = vrcp.f32 %v859_v31  ;;  %v871_v48 = vand.u32 2147483648, %v859_v31  ;;  %v869_v50 = vand.u32 2147483647, %v859_v31  ;;  %vm865_vm0 = vweird.f32 %v859_v31 }
 0x8ed   :  { %2550 = vrcp.f32 %v880_v15  ;;  %v892_v5 = vand.u32 2147483648, %v880_v15  ;;  %vm886_vm4 = vweird.f32 %v880_v15  ;;  %v890_v54 = vand.u32 2147483647, %v880_v15 }
 0x8ee   :  { %v872_v57 = vor.u32 1.1754944e-38, %v871_v48  ;;  %vm870_vm2 = vcmp.eq.f32.partialorder %v869_v50, 8.507059e+37 }
 0x8ef   :  { %v893_v20 = vor.u32 1.1754944e-38, %v892_v5  ;;  %vm891_vm6 = vcmp.eq.f32.partialorder %v890_v54, 8.507059e+37 }
 0x8f2   :  { %v2549_v32 = vpop.eup %2548 }
 0x8f3   :  { %v2551_v36 = vpop.eup %2550  ;;  %v861_v23 = vmul.f32 %v2549_v32, %v859_v31  ;;  %vm866_vm15 = vweird.f32 %v2549_v32  ;;  %v902_v31 = vld [vmem:[#allocation3 + $0x78] sm:$0xff] }
 0x8f4   :  { %v882_v45 = vmul.f32 %v2551_v36, %v880_v15  ;;  %vm867_vm1 = vmor %vm865_vm0, %vm866_vm15  ;;  %vm887_vm3 = vweird.f32 %v2551_v36  ;;  %v904_v15 = vld [vmem:[#allocation3 + $0x88] sm:$0xff] }
 0x8f5   :  { %v862_v47 = vsub.f32 1.0, %v861_v23  ;;  %vm888_vm5 = vmor %vm886_vm4, %vm887_vm3 }
 0x8f6   :  { %v883_v55 = vsub.f32 1.0, %v882_v45 }
 0x8f7   :  { %v863_v49 = vmul.f32 %v2549_v32, %v862_v47 }
 0x8f8   :  { %v884_v41 = vmul.f32 %v2551_v36, %v883_v55 }
 0x8f9   :  { %v864_v38 = vadd.f32 %v2549_v32, %v863_v49 }
 0x8fa   :  { %v885_v0 = vadd.f32 %v2551_v36, %v884_v41 }
 0x8fb   :  { %v868_v39 = vsel %vm867_vm1, %v2549_v32, %v864_v38 }
 0x8fc   :  { %v873_v59 = vsel %vm870_vm2, %v872_v57, %v868_v39  ;;  %v889_v18 = vsel %vm888_vm5, %v2551_v36, %v885_v0 }
 0x8fd   :  { %v875_v63 = vmul.f32 %v873_v59, %v854_v58  ;;  %v894_v21 = vsel %vm891_vm6, %v893_v20, %v889_v18 }
 0x8ff   :  { %2552 = vtanh.f32 %v875_v63 }
 0x905   :  { %v2553_v19 = vpop.eup %2552 }
 0x906   :  { %v896_v56 = vsub.f32 %v2553_v19, %v3141_v1 }
 0x908   :  { %v897_v22 = vmul.f32 %v896_v56, %v894_v21 }
 0x90a   :  { %v3178_v27 = vadd.f32 %v897_v22, %v3141_v1 }
 0x90c   :  { %900 = vst [vmem:[#allocation11 + $0x20] sm:$0xff] %v3178_v27  ;;  %v905_v9 = vpack.c.bf16 %v3178_v27, %v3178_v27 }
 0x90e   :  { %914 = vmatmul.bf16.vlgmr.msrb.gmra.mxu3 %v905_v9  ;;  %927 = vmatmul.bf16.vlgmr.msra.gmra.mxu0 %v905_v9 }
 0x90f   :  { %940 = vmatmul.bf16.vlgmr.msra.gmra.mxu1 %v905_v9  ;;  %1188 = vmatpush.bf16.msrb.mxu3 %v2871_v8 }
 0x910   :  { %1290 = vmatpush.bf16.msra.mxu0 %v2867_v3  ;;  %1303 = vmatpush.bf16.msra.mxu1 %v2869_v7 }
 0x913   :  { %1189 = vmatpush.bf16.msrb.mxu3 %v2881_v17 }
 0x914   :  { %1291 = vmatpush.bf16.msra.mxu0 %v2874_v12  ;;  %1304 = vmatpush.bf16.msra.mxu1 %v2879_v16 }
 0x917   :  { %1190 = vmatpush.bf16.msrb.mxu3 %v2891_v26 }
 0x918   :  { %1292 = vmatpush.bf16.msra.mxu0 %v2884_v24  ;;  %1305 = vmatpush.bf16.msra.mxu1 %v2889_v25 }
 0x91b   :  { %1191 = vmatpush.bf16.msrb.mxu3 %v2901_v35 }
 0x91c   :  { %1293 = vmatpush.bf16.msra.mxu0 %v2894_v33  ;;  %1306 = vmatpush.bf16.msra.mxu1 %v2899_v34 }
 0x91f   :  { %1192 = vmatpush.bf16.msrb.mxu3 %v2911_v44 }
 0x920   :  { %1294 = vmatpush.bf16.msra.mxu0 %v2904_v42  ;;  %1307 = vmatpush.bf16.msra.mxu1 %v2909_v43 }
 0x923   :  { %1193 = vmatpush.bf16.msrb.mxu3 %v2921_v53 }
 0x924   :  { %1295 = vmatpush.bf16.msra.mxu0 %v2914_v51  ;;  %1308 = vmatpush.bf16.msra.mxu1 %v2919_v52 }
 0x927   :  { %1194 = vmatpush.bf16.msrb.mxu3 %v2931_v62 }
 0x928   :  { %1296 = vmatpush.bf16.msra.mxu0 %v2924_v60  ;;  %1309 = vmatpush.bf16.msra.mxu1 %v2929_v61 }
 0x92b   :  { %1195 = vmatpush.bf16.msrb.mxu3 %v2943_v11 }
 0x92c   :  { %1297 = vmatpush.bf16.msra.mxu0 %v2934_v6  ;;  %1310 = vmatpush.bf16.msra.mxu1 %v2941_v10 }
 0x98b   :  { %v928_v1 = vpop.f32.mrf.mxu0 }
 0x98c   :  { %v941_v29 = vpop.f32.mrf.mxu1  ;;  %v946_v36 = vadd.f32 %v928_v1, %v903_v30 }
 0x98d   :  { %v947_v45 = vadd.f32 %v941_v29, %v904_v15 }
 0x991   :  { %v915_v32 = vpop.f32.mrf.mxu3 }
 0x992   :  { %v945_v40 = vadd.f32 %v915_v32, %v902_v31 }
 0x993   :  { %v930_v23 = vpop.f32.mrf.mxu0 }
 0x994   :  { %v948_v47 = vadd.f32 %v946_v36, %v945_v40  ;;  %v943_v48 = vpop.f32.mrf.mxu1 }
 0x996   :  { %v949_v28 = vadd.f32 %v948_v47, %v947_v45 }
 0x998   :  { %950 = vadd.xlane.f32.xlu1 %v949_v28 }
 0x999   :  { %v917_v49 = vpop.f32.mrf.mxu3 }
 0xa0b   :  { %v951_v50 = vpop.xlane.xlu1 %950 }
 0xa0c   :  { %v952_v55 = vmul.f32 0.0026041667, %v951_v50 }
 0xa0e   :  { %v953_v38 = vsub.f32 %v945_v40, %v952_v55  ;;  %v954_v57 = vsub.f32 %v946_v36, %v952_v55  ;;  %v955_v58 = vsub.f32 %v947_v45, %v952_v55 }
 0xa10   :  { %v956_v39 = vmul.f32 %v953_v38, %v953_v38  ;;  %v957_v59 = vmul.f32 %v954_v57, %v954_v57  ;;  %v958_v41 = vmul.f32 %v955_v58, %v955_v58 }
 0xa12   :  { %v959_v63 = vadd.f32 %v957_v59, %v956_v39 }
 0xa14   :  { %v960_v0 = vadd.f32 %v959_v63, %v958_v41 }
 0xa16   :  { %961 = vadd.xlane.f32.xlu2 %v960_v0 }
 0xa89   :  { %v962_v5 = vpop.xlane.xlu2 %961 }
 0xa8a   :  { %v963_v54 = vmul.f32 0.0026041667, %v962_v5 }
 0xa8c   :  { %v964_v18 = vadd.f32 0.001, %v963_v54 }
 0xa8e   :  { %2554 = vrsqrt.f32 %v964_v18  ;;  %vm971_vm8 = vweird.f32 %v964_v18 }
 0xa94   :  { %v2555_v19 = vpop.eup %2554 }
 0xa95   :  { %v966_v20 = vmul.f32 %v2555_v19, %v964_v18  ;;  %vm972_vm7 = vweird.f32 %v2555_v19 }
 0xa96   :  { %vm973_vm9 = vmor %vm971_vm8, %vm972_vm7 }
 0xa97   :  { %v967_v56 = vmul.f32 %v2555_v19, %v966_v20 }
 0xa99   :  { %v968_v21 = vmul.f32 0.5, %v967_v56 }
 0xa9b   :  { %v969_v22 = vsub.f32 1.5, %v968_v21 }
 0xa9d   :  { %v970_v9 = vmul.f32 %v2555_v19, %v969_v22 }
 0xa9f   :  { %v974_v1 = vsel %vm973_vm9, %v2555_v19, %v970_v9 }
 0xaa0   :  { %v975_v29 = vmul.f32 %v974_v1, %v953_v38  ;;  %v977_v30 = vmul.f32 %v974_v1, %v955_v58  ;;  %v976_v55 = vmul.f32 %v974_v1, %v954_v57 }
 0xaa2   :  { %v978_v31 = vmul.f32 %v975_v29, %v3010_v2  ;;  %v980_v15 = vmul.f32 %v977_v30, %v3012_v4  ;;  %v979_v41 = vmul.f32 %v976_v55, %v3022_v37 }
 0xaa4   :  { %v981_v32 = vadd.f32 %v978_v31, %v3014_v13  ;;  %v983_v36 = vadd.f32 %v980_v15, %v3016_v14  ;;  %v982_v19 = vadd.f32 %v979_v41, %v3024_v46 }
 0xaa6   :  { %v2437_v40 = vmul.f32 -1.442695, %v981_v32  ;;  %v2438_v23 = vmul.f32 -1.442695, %v983_v36 }
 0xaa8   :  { %2556 = vpow2.f32 %v2437_v40 }
 0xaa9   :  { %2558 = vpow2.f32 %v2438_v23 }
 0xaae   :  { %v2557_v45 = vpop.eup %2556 }
 0xaaf   :  { %v2559_v47 = vpop.eup %2558  ;;  %v987_v48 = vadd.f32 1.0, %v2557_v45  ;;  %v1030_v45 = vld [vmem:[#allocation3 + $0x90] sm:$0xff] }
 0xab0   :  { %v1008_v28 = vadd.f32 1.0, %v2559_v47  ;;  %v1031_v47 = vld [vmem:[#allocation3 + $0x98] sm:$0xff] }
 0xab1   :  { %2560 = vrcp.f32 %v987_v48  ;;  %v999_v59 = vand.u32 2147483648, %v987_v48  ;;  %v997_v0 = vand.u32 2147483647, %v987_v48  ;;  %vm993_vm11 = vweird.f32 %v987_v48 }
 0xab2   :  { %2562 = vrcp.f32 %v1008_v28  ;;  %v1020_v9 = vand.u32 2147483648, %v1008_v28  ;;  %vm1014_vm15 = vweird.f32 %v1008_v28  ;;  %v1018_v1 = vand.u32 2147483647, %v1008_v28 }
 0xab3   :  { %v1000_v18 = vor.u32 1.1754944e-38, %v999_v59  ;;  %vm998_vm13 = vcmp.eq.f32.partialorder %v997_v0, 8.507059e+37 }
 0xab4   :  { %v1021_v31 = vor.u32 1.1754944e-38, %v1020_v9  ;;  %vm1019_vm1 = vcmp.eq.f32.partialorder %v1018_v1, 8.507059e+37 }
 0xab7   :  { %v2561_v49 = vpop.eup %2560 }
 0xab8   :  { %v2563_v50 = vpop.eup %2562  ;;  %v989_v38 = vmul.f32 %v2561_v49, %v987_v48  ;;  %vm994_vm10 = vweird.f32 %v2561_v49  ;;  %v1032_v48 = vld [vmem:[#allocation3 + $0xa0] sm:$0xff] }
 0xab9   :  { %v1010_v58 = vmul.f32 %v2563_v50, %v1008_v28  ;;  %vm995_vm12 = vmor %vm993_vm11, %vm994_vm10  ;;  %vm1015_vm14 = vweird.f32 %v2563_v50 }
 0xaba   :  { %v990_v39 = vsub.f32 1.0, %v989_v38  ;;  %vm1016_vm0 = vmor %vm1014_vm15, %vm1015_vm14 }
 0xabb   :  { %v1011_v5 = vsub.f32 1.0, %v1010_v58 }
 0xabc   :  { %v991_v63 = vmul.f32 %v2561_v49, %v990_v39 }
 0xabd   :  { %v1012_v57 = vmul.f32 %v2563_v50, %v1011_v5 }
 0xabe   :  { %v992_v54 = vadd.f32 %v2561_v49, %v991_v63 }
 0xabf   :  { %v1013_v22 = vadd.f32 %v2563_v50, %v1012_v57 }
 0xac0   :  { %v996_v20 = vsel %vm995_vm12, %v2561_v49, %v992_v54 }
 0xac1   :  { %v1001_v56 = vsel %vm998_vm13, %v1000_v18, %v996_v20  ;;  %v1017_v29 = vsel %vm1016_vm0, %v2563_v50, %v1013_v22 }
 0xac2   :  { %v1003_v21 = vmul.f32 %v1001_v56, %v982_v19  ;;  %v1022_v32 = vsel %vm1019_vm1, %v1021_v31, %v1017_v29 }
 0xac4   :  { %2564 = vtanh.f32 %v1003_v21 }
 0xaca   :  { %v2565_v30 = vpop.eup %2564 }
 0xacb   :  { %v1024_v15 = vsub.f32 %v2565_v30, %v3178_v27 }
 0xacd   :  { %v1025_v36 = vmul.f32 %v1024_v15, %v1022_v32 }
 0xacf   :  { %v3215_v40 = vadd.f32 %v1025_v36, %v3178_v27 }
 0xad1   :  { %1028 = vst [vmem:[#allocation11 + $0x28] sm:$0xff] %v3215_v40  ;;  %v1033_v23 = vpack.c.bf16 %v3215_v40, %v3215_v40 }
 0xad3   :  { %1042 = vmatmul.bf16.vlgmr.msra.gmra.mxu2 %v1033_v23  ;;  %1055 = vmatmul.bf16.vlgmr.msra.gmra.mxu3 %v1033_v23 }
 0xad4   :  { %1068 = vmatmul.bf16.vlgmr.msrb.gmra.mxu0 %v1033_v23  ;;  %1316 = vmatpush.bf16.msra.mxu2 %v2871_v8 }
 0xad5   :  { %1418 = vmatpush.bf16.msra.mxu3 %v2867_v3  ;;  %1431 = vmatpush.bf16.msrb.mxu0 %v2869_v7 }
 0xad8   :  { %1317 = vmatpush.bf16.msra.mxu2 %v2881_v17 }
 0xad9   :  { %1419 = vmatpush.bf16.msra.mxu3 %v2874_v12  ;;  %1432 = vmatpush.bf16.msrb.mxu0 %v2879_v16 }
 0xadc   :  { %1318 = vmatpush.bf16.msra.mxu2 %v2891_v26 }
 0xadd   :  { %1420 = vmatpush.bf16.msra.mxu3 %v2884_v24  ;;  %1433 = vmatpush.bf16.msrb.mxu0 %v2889_v25 }
 0xae0   :  { %1319 = vmatpush.bf16.msra.mxu2 %v2901_v35 }
 0xae1   :  { %1421 = vmatpush.bf16.msra.mxu3 %v2894_v33  ;;  %1434 = vmatpush.bf16.msrb.mxu0 %v2899_v34 }
 0xae4   :  { %1320 = vmatpush.bf16.msra.mxu2 %v2911_v44 }
 0xae5   :  { %1422 = vmatpush.bf16.msra.mxu3 %v2904_v42  ;;  %1435 = vmatpush.bf16.msrb.mxu0 %v2909_v43 }
 0xae8   :  { %1321 = vmatpush.bf16.msra.mxu2 %v2921_v53 }
 0xae9   :  { %1423 = vmatpush.bf16.msra.mxu3 %v2914_v51  ;;  %1436 = vmatpush.bf16.msrb.mxu0 %v2919_v52 }
 0xaec   :  { %1322 = vmatpush.bf16.msra.mxu2 %v2931_v62 }
 0xaed   :  { %1424 = vmatpush.bf16.msra.mxu3 %v2924_v60  ;;  %1437 = vmatpush.bf16.msrb.mxu0 %v2929_v61 }
 0xaf0   :  { %1323 = vmatpush.bf16.msra.mxu2 %v2943_v11 }
 0xaf1   :  { %1425 = vmatpush.bf16.msra.mxu3 %v2934_v6  ;;  %1438 = vmatpush.bf16.msrb.mxu0 %v2941_v10 }
 0xb51   :  { %v1069_v27 = vpop.f32.mrf.mxu0 }
 0xb52   :  { %v1075_v38 = vadd.f32 %v1069_v27, %v1032_v48 }
 0xb56   :  { %v1043_v28 = vpop.f32.mrf.mxu2  ;;  %v1056_v49 = vpop.f32.mrf.mxu3 }
 0xb57   :  { %v1073_v50 = vadd.f32 %v1043_v28, %v1030_v45  ;;  %v1074_v55 = vadd.f32 %v1056_v49, %v1031_v47 }
 0xb59   :  { %v1076_v58 = vadd.f32 %v1074_v55, %v1073_v50  ;;  %v1071_v39 = vpop.f32.mrf.mxu0 }
 0xb5b   :  { %v1077_v59 = vadd.f32 %v1076_v58, %v1075_v38 }
 0xb5d   :  { %1078 = vadd.xlane.f32.xlu0 %v1077_v59 }
 0xb5e   :  { %v1045_v41 = vpop.f32.mrf.mxu2  ;;  %v1058_v63 = vpop.f32.mrf.mxu3 }
 0xbd0   :  { %v1079_v0 = vpop.xlane.xlu0 %1078 }
 0xbd1   :  { %v1080_v5 = vmul.f32 0.0026041667, %v1079_v0 }
 0xbd3   :  { %v1081_v54 = vsub.f32 %v1073_v50, %v1080_v5  ;;  %v1082_v18 = vsub.f32 %v1074_v55, %v1080_v5  ;;  %v1083_v19 = vsub.f32 %v1075_v38, %v1080_v5 }
 0xbd5   :  { %v1084_v20 = vmul.f32 %v1081_v54, %v1081_v54  ;;  %v1085_v56 = vmul.f32 %v1082_v18, %v1082_v18  ;;  %v1086_v57 = vmul.f32 %v1083_v19, %v1083_v19 }
 0xbd7   :  { %v1087_v21 = vadd.f32 %v1085_v56, %v1084_v20 }
 0xbd9   :  { %v1088_v22 = vadd.f32 %v1087_v21, %v1086_v57 }
 0xbdb   :  { %1089 = vadd.xlane.f32.xlu1 %v1088_v22 }
 0xc4e   :  { %v1090_v9 = vpop.xlane.xlu1 %1089 }
 0xc4f   :  { %v1091_v1 = vmul.f32 0.0026041667, %v1090_v9 }
 0xc51   :  { %v1092_v29 = vadd.f32 0.001, %v1091_v1 }
 0xc53   :  { %2566 = vrsqrt.f32 %v1092_v29  ;;  %vm1099_vm3 = vweird.f32 %v1092_v29 }
 0xc59   :  { %v2567_v30 = vpop.eup %2566 }
 0xc5a   :  { %v1094_v31 = vmul.f32 %v2567_v30, %v1092_v29  ;;  %vm1100_vm2 = vweird.f32 %v2567_v30 }
 0xc5b   :  { %vm1101_vm4 = vmor %vm1099_vm3, %vm1100_vm2 }
 0xc5c   :  { %v1095_v15 = vmul.f32 %v2567_v30, %v1094_v31 }
 0xc5e   :  { %v1096_v32 = vmul.f32 0.5, %v1095_v15 }
 0xc60   :  { %v1097_v36 = vsub.f32 1.5, %v1096_v32 }
 0xc62   :  { %v1098_v23 = vmul.f32 %v2567_v30, %v1097_v36 }
 0xc64   :  { %v1102_v27 = vsel %vm1101_vm4, %v2567_v30, %v1098_v23 }
 0xc65   :  { %v1103_v45 = vmul.f32 %v1102_v27, %v1081_v54  ;;  %v1105_v47 = vmul.f32 %v1102_v27, %v1083_v19  ;;  %v1104_v5 = vmul.f32 %v1102_v27, %v1082_v18 }
 0xc67   :  { %v1106_v48 = vmul.f32 %v1103_v45, %v3010_v2  ;;  %v1108_v28 = vmul.f32 %v1105_v47, %v3012_v4  ;;  %v1107_v57 = vmul.f32 %v1104_v5, %v3022_v37 }
 0xc69   :  { %v1109_v49 = vadd.f32 %v1106_v48, %v3014_v13  ;;  %v1111_v50 = vadd.f32 %v1108_v28, %v3016_v14  ;;  %v1110_v30 = vadd.f32 %v1107_v57, %v3024_v46 }
 0xc6b   :  { %v2439_v55 = vmul.f32 -1.442695, %v1109_v49  ;;  %v2440_v38 = vmul.f32 -1.442695, %v1111_v50 }
 0xc6d   :  { %2568 = vpow2.f32 %v2439_v55 }
 0xc6e   :  { %2570 = vpow2.f32 %v2440_v38 }
 0xc73   :  { %v2569_v58 = vpop.eup %2568 }
 0xc74   :  { %v2571_v39 = vpop.eup %2570  ;;  %v1115_v59 = vadd.f32 1.0, %v2569_v58  ;;  %v1158_v58 = vld [vmem:[#allocation3 + $0xa8] sm:$0xff] }
 0xc75   :  { %v1136_v41 = vadd.f32 1.0, %v2571_v39  ;;  %v1159_v39 = vld [vmem:[#allocation3 + $0xb0] sm:$0xff] }
 0xc76   :  { %2572 = vrcp.f32 %v1115_v59  ;;  %v1127_v56 = vand.u32 2147483648, %v1115_v59  ;;  %v1125_v22 = vand.u32 2147483647, %v1115_v59  ;;  %vm1121_vm6 = vweird.f32 %v1115_v59 }
 0xc77   :  { %2574 = vrcp.f32 %v1136_v41  ;;  %v1148_v23 = vand.u32 2147483648, %v1136_v41  ;;  %vm1142_vm10 = vweird.f32 %v1136_v41  ;;  %v1146_v27 = vand.u32 2147483647, %v1136_v41 }
 0xc78   :  { %v1128_v29 = vor.u32 1.1754944e-38, %v1127_v56  ;;  %vm1126_vm8 = vcmp.eq.f32.partialorder %v1125_v22, 8.507059e+37 }
 0xc79   :  { %v1149_v48 = vor.u32 1.1754944e-38, %v1148_v23  ;;  %vm1147_vm12 = vcmp.eq.f32.partialorder %v1146_v27, 8.507059e+37 }
 0xc7c   :  { %v2573_v63 = vpop.eup %2572 }
 0xc7d   :  { %v2575_v0 = vpop.eup %2574  ;;  %v1117_v54 = vmul.f32 %v2573_v63, %v1115_v59  ;;  %vm1122_vm5 = vweird.f32 %v2573_v63 }
 0xc7e   :  { %v1138_v19 = vmul.f32 %v2575_v0, %v1136_v41  ;;  %vm1123_vm7 = vmor %vm1121_vm6, %vm1122_vm5  ;;  %vm1143_vm9 = vweird.f32 %v2575_v0  ;;  %v1160_v41 = vld [vmem:[#allocation3 + $0xb8] sm:$0xff] }
 0xc7f   :  { %v1118_v20 = vsub.f32 1.0, %v1117_v54  ;;  %vm1144_vm11 = vmor %vm1142_vm10, %vm1143_vm9 }
 0xc80   :  { %v1139_v9 = vsub.f32 1.0, %v1138_v19 }
 0xc81   :  { %v1119_v21 = vmul.f32 %v2573_v63, %v1118_v20 }
 0xc82   :  { %v1140_v18 = vmul.f32 %v2575_v0, %v1139_v9 }
 0xc83   :  { %v1120_v1 = vadd.f32 %v2573_v63, %v1119_v21 }
 0xc84   :  { %v1141_v36 = vadd.f32 %v2575_v0, %v1140_v18 }
 0xc85   :  { %v1124_v31 = vsel %vm1123_vm7, %v2573_v63, %v1120_v1 }
 0xc86   :  { %v1129_v15 = vsel %vm1126_vm8, %v1128_v29, %v1124_v31  ;;  %v1145_v45 = vsel %vm1144_vm11, %v2575_v0, %v1141_v36 }
 0xc87   :  { %v1131_v32 = vmul.f32 %v1129_v15, %v1110_v30  ;;  %v1150_v49 = vsel %vm1147_vm12, %v1149_v48, %v1145_v45 }
 0xc89   :  { %2576 = vtanh.f32 %v1131_v32 }
 0xc8f   :  { %v2577_v47 = vpop.eup %2576 }
 0xc90   :  { %v1152_v28 = vsub.f32 %v2577_v47, %v3215_v40 }
 0xc92   :  { %v1153_v50 = vmul.f32 %v1152_v28, %v1150_v49 }
 0xc94   :  { %v3252_v55 = vadd.f32 %v1153_v50, %v3215_v40 }
 0xc96   :  { %1156 = vst [vmem:[#allocation11 + $0x30] sm:$0xff] %v3252_v55  ;;  %v1161_v38 = vpack.c.bf16 %v3252_v55, %v3252_v55 }
 0xc98   :  { %1170 = vmatmul.bf16.vlgmr.msrb.gmra.mxu1 %v1161_v38  ;;  %1183 = vmatmul.bf16.vlgmr.msrb.gmra.mxu2 %v1161_v38 }
 0xc99   :  { %1196 = vmatmul.bf16.vlgmr.msrb.gmra.mxu3 %v1161_v38  ;;  %1444 = vmatpush.bf16.msrb.mxu1 %v2871_v8 }
 0xc9a   :  { %1546 = vmatpush.bf16.msrb.mxu2 %v2867_v3  ;;  %1559 = vmatpush.bf16.msrb.mxu3 %v2869_v7 }
 0xc9d   :  { %1445 = vmatpush.bf16.msrb.mxu1 %v2881_v17 }
 0xc9e   :  { %1547 = vmatpush.bf16.msrb.mxu2 %v2874_v12  ;;  %1560 = vmatpush.bf16.msrb.mxu3 %v2879_v16 }
 0xca1   :  { %1446 = vmatpush.bf16.msrb.mxu1 %v2891_v26 }
 0xca2   :  { %1548 = vmatpush.bf16.msrb.mxu2 %v2884_v24  ;;  %1561 = vmatpush.bf16.msrb.mxu3 %v2889_v25 }
 0xca5   :  { %1447 = vmatpush.bf16.msrb.mxu1 %v2901_v35 }
 0xca6   :  { %1549 = vmatpush.bf16.msrb.mxu2 %v2894_v33  ;;  %1562 = vmatpush.bf16.msrb.mxu3 %v2899_v34 }
 0xca9   :  { %1448 = vmatpush.bf16.msrb.mxu1 %v2911_v44 }
 0xcaa   :  { %1550 = vmatpush.bf16.msrb.mxu2 %v2904_v42  ;;  %1563 = vmatpush.bf16.msrb.mxu3 %v2909_v43 }
 0xcad   :  { %1449 = vmatpush.bf16.msrb.mxu1 %v2921_v53 }
 0xcae   :  { %1551 = vmatpush.bf16.msrb.mxu2 %v2914_v51  ;;  %1564 = vmatpush.bf16.msrb.mxu3 %v2919_v52 }
 0xcb1   :  { %1450 = vmatpush.bf16.msrb.mxu1 %v2931_v62 }
 0xcb2   :  { %1552 = vmatpush.bf16.msrb.mxu2 %v2924_v60  ;;  %1565 = vmatpush.bf16.msrb.mxu3 %v2929_v61 }
 0xcb5   :  { %1451 = vmatpush.bf16.msrb.mxu1 %v2943_v11 }
 0xcb6   :  { %1553 = vmatpush.bf16.msrb.mxu2 %v2934_v6  ;;  %1566 = vmatpush.bf16.msrb.mxu3 %v2941_v10 }
 0xd15   :  { %v1171_v40 = vpop.f32.mrf.mxu1 }
 0xd16   :  { %v1201_v63 = vadd.f32 %v1171_v40, %v1158_v58 }
 0xd1b   :  { %v1184_v59 = vpop.f32.mrf.mxu2 }
 0xd1c   :  { %v1202_v0 = vadd.f32 %v1184_v59, %v1159_v39  ;;  %v1197_v5 = vpop.f32.mrf.mxu3 }
 0xd1d   :  { %v1173_v54 = vpop.f32.mrf.mxu1  ;;  %v1203_v20 = vadd.f32 %v1197_v5, %v1160_v41 }
 0xd1e   :  { %v1204_v19 = vadd.f32 %v1202_v0, %v1201_v63 }
 0xd20   :  { %v1205_v56 = vadd.f32 %v1204_v19, %v1203_v20 }
 0xd22   :  { %1206 = vadd.xlane.f32.xlu2 %v1205_v56 }
 0xd23   :  { %v1186_v57 = vpop.f32.mrf.mxu2 }
 0xd24   :  { %v1199_v21 = vpop.f32.mrf.mxu3 }
 0xd95   :  { %v1207_v22 = vpop.xlane.xlu2 %1206 }
 0xd96   :  { %v1208_v9 = vmul.f32 0.0026041667, %v1207_v22 }
 0xd98   :  { %v1209_v1 = vsub.f32 %v1201_v63, %v1208_v9  ;;  %v1210_v29 = vsub.f32 %v1202_v0, %v1208_v9  ;;  %v1211_v30 = vsub.f32 %v1203_v20, %v1208_v9 }
 0xd9a   :  { %v1212_v31 = vmul.f32 %v1209_v1, %v1209_v1  ;;  %v1213_v15 = vmul.f32 %v1210_v29, %v1210_v29  ;;  %v1214_v18 = vmul.f32 %v1211_v30, %v1211_v30 }
 0xd9c   :  { %v1215_v32 = vadd.f32 %v1213_v15, %v1212_v31 }
 0xd9e   :  { %v1216_v36 = vadd.f32 %v1215_v32, %v1214_v18 }
 0xda0   :  { %1217 = vadd.xlane.f32.xlu0 %v1216_v36 }
 0xe13   :  { %v1218_v23 = vpop.xlane.xlu0 %1217 }
 0xe14   :  { %v1219_v27 = vmul.f32 0.0026041667, %v1218_v23 }
 0xe16   :  { %v1220_v45 = vadd.f32 0.001, %v1219_v27 }
 0xe18   :  { %2578 = vrsqrt.f32 %v1220_v45  ;;  %vm1227_vm14 = vweird.f32 %v1220_v45 }
 0xe1e   :  { %v2579_v47 = vpop.eup %2578 }
 0xe1f   :  { %v1222_v48 = vmul.f32 %v2579_v47, %v1220_v45  ;;  %vm1228_vm13 = vweird.f32 %v2579_v47 }
 0xe20   :  { %vm1229_vm15 = vmor %vm1227_vm14, %vm1228_vm13 }
 0xe21   :  { %v1223_v28 = vmul.f32 %v2579_v47, %v1222_v48 }
 0xe23   :  { %v1224_v49 = vmul.f32 0.5, %v1223_v28 }
 0xe25   :  { %v1225_v50 = vsub.f32 1.5, %v1224_v49 }
 0xe27   :  { %v1226_v38 = vmul.f32 %v2579_v47, %v1225_v50 }
 0xe29   :  { %v1230_v40 = vsel %vm1229_vm15, %v2579_v47, %v1226_v38 }
 0xe2a   :  { %v1231_v58 = vmul.f32 %v1230_v40, %v1209_v1  ;;  %v1233_v39 = vmul.f32 %v1230_v40, %v1211_v30  ;;  %v1232_v9 = vmul.f32 %v1230_v40, %v1210_v29 }
 0xe2c   :  { %v1234_v59 = vmul.f32 %v1231_v58, %v3010_v2  ;;  %v1236_v41 = vmul.f32 %v1233_v39, %v3012_v4  ;;  %v1235_v18 = vmul.f32 %v1232_v9, %v3022_v37 }
 0xe2e   :  { %v1237_v63 = vadd.f32 %v1234_v59, %v3014_v13  ;;  %v1239_v0 = vadd.f32 %v1236_v41, %v3016_v14  ;;  %v1238_v47 = vadd.f32 %v1235_v18, %v3024_v46 }
 0xe30   :  { %v2441_v5 = vmul.f32 -1.442695, %v1237_v63  ;;  %v2442_v54 = vmul.f32 -1.442695, %v1239_v0 }
 0xe32   :  { %2580 = vpow2.f32 %v2441_v5 }
 0xe33   :  { %2582 = vpow2.f32 %v2442_v54 }
 0xe38   :  { %v2581_v19 = vpop.eup %2580 }
 0xe39   :  { %v2583_v20 = vpop.eup %2582  ;;  %v1243_v56 = vadd.f32 1.0, %v2581_v19 }
 0xe3a   :  { %v1264_v57 = vadd.f32 1.0, %v2583_v20  ;;  %v1286_v20 = vld [vmem:[#allocation3 + $0xc0] sm:$0xff] }
 0xe3b   :  { %2584 = vrcp.f32 %v1243_v56  ;;  %v1255_v15 = vand.u32 2147483648, %v1243_v56  ;;  %v1253_v36 = vand.u32 2147483647, %v1243_v56  ;;  %vm1249_vm1 = vweird.f32 %v1243_v56 }
 0xe3c   :  { %2586 = vrcp.f32 %v1264_v57  ;;  %v1276_v38 = vand.u32 2147483648, %v1264_v57  ;;  %vm1270_vm5 = vweird.f32 %v1264_v57  ;;  %v1274_v40 = vand.u32 2147483647, %v1264_v57 }
 0xe3d   :  { %v1256_v45 = vor.u32 1.1754944e-38, %v1255_v15  ;;  %vm1254_vm3 = vcmp.eq.f32.partialorder %v1253_v36, 8.507059e+37 }
 0xe3e   :  { %v1277_v59 = vor.u32 1.1754944e-38, %v1276_v38  ;;  %vm1275_vm7 = vcmp.eq.f32.partialorder %v1274_v40, 8.507059e+37 }
 0xe41   :  { %v2585_v21 = vpop.eup %2584 }
 0xe42   :  { %v2587_v22 = vpop.eup %2586  ;;  %v1245_v1 = vmul.f32 %v2585_v21, %v1243_v56  ;;  %vm1250_vm0 = vweird.f32 %v2585_v21  ;;  %v1287_v56 = vld [vmem:[#allocation3 + $0xc8] sm:$0xff] }
 0xe43   :  { %v1266_v30 = vmul.f32 %v2587_v22, %v1264_v57  ;;  %vm1251_vm2 = vmor %vm1249_vm1, %vm1250_vm0  ;;  %vm1271_vm4 = vweird.f32 %v2587_v22 }
 0xe44   :  { %v1246_v31 = vsub.f32 1.0, %v1245_v1  ;;  %vm1272_vm6 = vmor %vm1270_vm5, %vm1271_vm4 }
 0xe45   :  { %v1267_v23 = vsub.f32 1.0, %v1266_v30 }
 0xe46   :  { %v1247_v32 = vmul.f32 %v2585_v21, %v1246_v31 }
 0xe47   :  { %v1268_v29 = vmul.f32 %v2587_v22, %v1267_v23 }
 0xe48   :  { %v1248_v27 = vadd.f32 %v2585_v21, %v1247_v32 }
 0xe49   :  { %v1269_v50 = vadd.f32 %v2587_v22, %v1268_v29 }
 0xe4a   :  { %v1252_v48 = vsel %vm1251_vm2, %v2585_v21, %v1248_v27 }
 0xe4b   :  { %v1257_v28 = vsel %vm1254_vm3, %v1256_v45, %v1252_v48  ;;  %v1273_v58 = vsel %vm1272_vm6, %v2587_v22, %v1269_v50  ;;  %v1288_v22 = vld [vmem:[#allocation3 + $0xd0] sm:$0xff] }
 0xe4c   :  { %v1259_v49 = vmul.f32 %v1257_v28, %v1238_v47  ;;  %v1278_v63 = vsel %vm1275_vm7, %v1277_v59, %v1273_v58 }
 0xe4e   :  { %2588 = vtanh.f32 %v1259_v49 }
 0xe54   :  { %v2589_v39 = vpop.eup %2588 }
 0xe55   :  { %v1280_v41 = vsub.f32 %v2589_v39, %v3252_v55 }
 0xe57   :  { %v1281_v0 = vmul.f32 %v1280_v41, %v1278_v63 }
 0xe59   :  { %v3289_v5 = vadd.f32 %v1281_v0, %v3252_v55 }
 0xe5b   :  { %1284 = vst [vmem:[#allocation11 + $0x38] sm:$0xff] %v3289_v5  ;;  %v1289_v54 = vpack.c.bf16 %v3289_v5, %v3289_v5 }
 0xe5d   :  { %1298 = vmatmul.bf16.vlgmr.msra.gmra.mxu0 %v1289_v54  ;;  %1311 = vmatmul.bf16.vlgmr.msra.gmra.mxu1 %v1289_v54 }
 0xe5e   :  { %1324 = vmatmul.bf16.vlgmr.msra.gmra.mxu2 %v1289_v54  ;;  %1572 = vmatpush.bf16.msra.mxu0 %v2871_v8 }
 0xe5f   :  { %1674 = vmatpush.bf16.msra.mxu1 %v2867_v3  ;;  %1687 = vmatpush.bf16.msra.mxu2 %v2869_v7 }
 0xe62   :  { %1573 = vmatpush.bf16.msra.mxu0 %v2881_v17 }
 0xe63   :  { %1675 = vmatpush.bf16.msra.mxu1 %v2874_v12  ;;  %1688 = vmatpush.bf16.msra.mxu2 %v2879_v16 }
 0xe66   :  { %1574 = vmatpush.bf16.msra.mxu0 %v2891_v26 }
 0xe67   :  { %1676 = vmatpush.bf16.msra.mxu1 %v2884_v24  ;;  %1689 = vmatpush.bf16.msra.mxu2 %v2889_v25 }
 0xe6a   :  { %1575 = vmatpush.bf16.msra.mxu0 %v2901_v35 }
 0xe6b   :  { %1677 = vmatpush.bf16.msra.mxu1 %v2894_v33  ;;  %1690 = vmatpush.bf16.msra.mxu2 %v2899_v34 }
 0xe6e   :  { %1576 = vmatpush.bf16.msra.mxu0 %v2911_v44 }
 0xe6f   :  { %1678 = vmatpush.bf16.msra.mxu1 %v2904_v42  ;;  %1691 = vmatpush.bf16.msra.mxu2 %v2909_v43 }
 0xe72   :  { %1577 = vmatpush.bf16.msra.mxu0 %v2921_v53 }
 0xe73   :  { %1679 = vmatpush.bf16.msra.mxu1 %v2914_v51  ;;  %1692 = vmatpush.bf16.msra.mxu2 %v2919_v52 }
 0xe76   :  { %1578 = vmatpush.bf16.msra.mxu0 %v2931_v62 }
 0xe77   :  { %1680 = vmatpush.bf16.msra.mxu1 %v2924_v60  ;;  %1693 = vmatpush.bf16.msra.mxu2 %v2929_v61 }
 0xe7a   :  { %1579 = vmatpush.bf16.msra.mxu0 %v2943_v11 }
 0xe7b   :  { %1681 = vmatpush.bf16.msra.mxu1 %v2934_v6  ;;  %1694 = vmatpush.bf16.msra.mxu2 %v2941_v10 }
 0xeda   :  { %v1299_v55 = vpop.f32.mrf.mxu0  ;;  %v1312_v19 = vpop.f32.mrf.mxu1 }
 0xedb   :  { %v1329_v57 = vadd.f32 %v1299_v55, %v1286_v20  ;;  %v1330_v21 = vadd.f32 %v1312_v19, %v1287_v56 }
 0xedd   :  { %v1332_v1 = vadd.f32 %v1330_v21, %v1329_v57 }
 0xee1   :  { %v1325_v9 = vpop.f32.mrf.mxu2 }
 0xee2   :  { %v1331_v30 = vadd.f32 %v1325_v9, %v1288_v22  ;;  %v1301_v31 = vpop.f32.mrf.mxu0  ;;  %v1314_v15 = vpop.f32.mrf.mxu1 }
 0xee4   :  { %v1333_v18 = vadd.f32 %v1332_v1, %v1331_v30 }
 0xee6   :  { %1334 = vadd.xlane.f32.xlu1 %v1333_v18 }
 0xee9   :  { %v1327_v32 = vpop.f32.mrf.mxu2 }
 0xf59   :  { %v1335_v36 = vpop.xlane.xlu1 %1334 }
 0xf5a   :  { %v1336_v23 = vmul.f32 0.0026041667, %v1335_v36 }
 0xf5c   :  { %v1337_v27 = vsub.f32 %v1329_v57, %v1336_v23  ;;  %v1338_v45 = vsub.f32 %v1330_v21, %v1336_v23  ;;  %v1339_v47 = vsub.f32 %v1331_v30, %v1336_v23 }
 0xf5e   :  { %v1340_v48 = vmul.f32 %v1337_v27, %v1337_v27  ;;  %v1341_v28 = vmul.f32 %v1338_v45, %v1338_v45  ;;  %v1342_v29 = vmul.f32 %v1339_v47, %v1339_v47 }
 0xf60   :  { %v1343_v49 = vadd.f32 %v1341_v28, %v1340_v48 }
 0xf62   :  { %v1344_v50 = vadd.f32 %v1343_v49, %v1342_v29 }
 0xf64   :  { %1345 = vadd.xlane.f32.xlu2 %v1344_v50 }
 0xfd7   :  { %v1346_v38 = vpop.xlane.xlu2 %1345 }
 0xfd8   :  { %v1347_v40 = vmul.f32 0.0026041667, %v1346_v38 }
 0xfda   :  { %v1348_v58 = vadd.f32 0.001, %v1347_v40 }
 0xfdc   :  { %2590 = vrsqrt.f32 %v1348_v58  ;;  %vm1355_vm9 = vweird.f32 %v1348_v58 }
 0xfe2   :  { %v2591_v39 = vpop.eup %2590 }
 0xfe3   :  { %v1350_v59 = vmul.f32 %v2591_v39, %v1348_v58  ;;  %vm1356_vm8 = vweird.f32 %v2591_v39 }
 0xfe4   :  { %vm1357_vm10 = vmor %vm1355_vm9, %vm1356_vm8 }
 0xfe5   :  { %v1351_v41 = vmul.f32 %v2591_v39, %v1350_v59 }
 0xfe7   :  { %v1352_v63 = vmul.f32 0.5, %v1351_v41 }
 0xfe9   :  { %v1353_v0 = vsub.f32 1.5, %v1352_v63 }
 0xfeb   :  { %v1354_v54 = vmul.f32 %v2591_v39, %v1353_v0 }
 0xfed   :  { %v1358_v55 = vsel %vm1357_vm10, %v2591_v39, %v1354_v54 }
 0xfee   :  { %v1359_v19 = vmul.f32 %v1358_v55, %v1337_v27  ;;  %v1361_v20 = vmul.f32 %v1358_v55, %v1339_v47  ;;  %v1360_v23 = vmul.f32 %v1358_v55, %v1338_v45 }
 0xff0   :  { %v1362_v56 = vmul.f32 %v1359_v19, %v3010_v2  ;;  %v1364_v57 = vmul.f32 %v1361_v20, %v3012_v4  ;;  %v1363_v29 = vmul.f32 %v1360_v23, %v3022_v37 }
 0xff2   :  { %v1365_v21 = vadd.f32 %v1362_v56, %v3014_v13  ;;  %v1367_v22 = vadd.f32 %v1364_v57, %v3016_v14  ;;  %v1366_v39 = vadd.f32 %v1363_v29, %v3024_v46 }
 0xff4   :  { %v2443_v9 = vmul.f32 -1.442695, %v1365_v21  ;;  %v2444_v1 = vmul.f32 -1.442695, %v1367_v22 }
 0xff6   :  { %2592 = vpow2.f32 %v2443_v9 }
 0xff7   :  { %2594 = vpow2.f32 %v2444_v1 }
 0xffc   :  { %v2593_v30 = vpop.eup %2592 }
 0xffd   :  { %v2595_v31 = vpop.eup %2594  ;;  %v1371_v15 = vadd.f32 1.0, %v2593_v30 }
 0xffe   :  { %v1392_v18 = vadd.f32 1.0, %v2595_v31  ;;  %v1415_v31 = vld [vmem:[#allocation3 + $0xe0] sm:$0xff] }
 0xfff   :  { %2596 = vrcp.f32 %v1371_v15  ;;  %v1383_v28 = vand.u32 2147483648, %v1371_v15  ;;  %v1381_v50 = vand.u32 2147483647, %v1371_v15  ;;  %vm1377_vm12 = vweird.f32 %v1371_v15 }
0x1000   :  { %2598 = vrcp.f32 %v1392_v18  ;;  %v1404_v54 = vand.u32 2147483648, %v1392_v18  ;;  %vm1398_vm0 = vweird.f32 %v1392_v18  ;;  %v1402_v55 = vand.u32 2147483647, %v1392_v18 }
0x1001   :  { %v1384_v58 = vor.u32 1.1754944e-38, %v1383_v28  ;;  %vm1382_vm14 = vcmp.eq.f32.partialorder %v1381_v50, 8.507059e+37 }
0x1002   :  { %v1405_v56 = vor.u32 1.1754944e-38, %v1404_v54  ;;  %vm1403_vm2 = vcmp.eq.f32.partialorder %v1402_v55, 8.507059e+37 }
0x1005   :  { %v2597_v32 = vpop.eup %2596 }
0x1006   :  { %v2599_v36 = vpop.eup %2598  ;;  %v1373_v27 = vmul.f32 %v2597_v32, %v1371_v15  ;;  %vm1378_vm11 = vweird.f32 %v2597_v32  ;;  %v1414_v15 = vld [vmem:[#allocation3 + $0xd8] sm:$0xff] }
0x1007   :  { %v1394_v47 = vmul.f32 %v2599_v36, %v1392_v18  ;;  %vm1379_vm13 = vmor %vm1377_vm12, %vm1378_vm11  ;;  %vm1399_vm15 = vweird.f32 %v2599_v36  ;;  %v1416_v18 = vld [vmem:[#allocation3 + $0xe8] sm:$0xff] }
0x1008   :  { %v1374_v48 = vsub.f32 1.0, %v1373_v27  ;;  %vm1400_vm1 = vmor %vm1398_vm0, %vm1399_vm15 }
0x1009   :  { %v1395_v38 = vsub.f32 1.0, %v1394_v47 }
0x100a   :  { %v1375_v49 = vmul.f32 %v2597_v32, %v1374_v48 }
0x100b   :  { %v1396_v45 = vmul.f32 %v2599_v36, %v1395_v38 }
0x100c   :  { %v1376_v40 = vadd.f32 %v2597_v32, %v1375_v49 }
0x100d   :  { %v1397_v0 = vadd.f32 %v2599_v36, %v1396_v45 }
0x100e   :  { %v1380_v59 = vsel %vm1379_vm13, %v2597_v32, %v1376_v40 }
0x100f   :  { %v1385_v41 = vsel %vm1382_vm14, %v1384_v58, %v1380_v59  ;;  %v1401_v19 = vsel %vm1400_vm1, %v2599_v36, %v1397_v0 }
0x1010   :  { %v1387_v63 = vmul.f32 %v1385_v41, %v1366_v39  ;;  %v1406_v21 = vsel %vm1403_vm2, %v1405_v56, %v1401_v19 }
0x1012   :  { %2600 = vtanh.f32 %v1387_v63 }
0x1018   :  { %v2601_v20 = vpop.eup %2600 }
0x1019   :  { %v1408_v57 = vsub.f32 %v2601_v20, %v3289_v5 }
0x101b   :  { %v1409_v22 = vmul.f32 %v1408_v57, %v1406_v21 }
0x101d   :  { %v3326_v9 = vadd.f32 %v1409_v22, %v3289_v5 }
0x101f   :  { %1412 = vst [vmem:[#allocation11 + $0x40] sm:$0xff] %v3326_v9  ;;  %v1417_v1 = vpack.c.bf16 %v3326_v9, %v3326_v9 }
0x1021   :  { %1426 = vmatmul.bf16.vlgmr.msra.gmra.mxu3 %v1417_v1  ;;  %1439 = vmatmul.bf16.vlgmr.msrb.gmra.mxu0 %v1417_v1 }
0x1022   :  { %1452 = vmatmul.bf16.vlgmr.msrb.gmra.mxu1 %v1417_v1  ;;  %1700 = vmatpush.bf16.msra.mxu3 %v2871_v8 }
0x1023   :  { %1802 = vmatpush.bf16.msrb.mxu0 %v2867_v3  ;;  %1815 = vmatpush.bf16.msrb.mxu1 %v2869_v7 }
0x1026   :  { %1701 = vmatpush.bf16.msra.mxu3 %v2881_v17 }
0x1027   :  { %1803 = vmatpush.bf16.msrb.mxu0 %v2874_v12  ;;  %1816 = vmatpush.bf16.msrb.mxu1 %v2879_v16 }
0x102a   :  { %1702 = vmatpush.bf16.msra.mxu3 %v2891_v26 }
0x102b   :  { %1804 = vmatpush.bf16.msrb.mxu0 %v2884_v24  ;;  %1817 = vmatpush.bf16.msrb.mxu1 %v2889_v25 }
0x102e   :  { %1703 = vmatpush.bf16.msra.mxu3 %v2901_v35 }
0x102f   :  { %1805 = vmatpush.bf16.msrb.mxu0 %v2894_v33  ;;  %1818 = vmatpush.bf16.msrb.mxu1 %v2899_v34 }
0x1032   :  { %1704 = vmatpush.bf16.msra.mxu3 %v2911_v44 }
0x1033   :  { %1806 = vmatpush.bf16.msrb.mxu0 %v2904_v42  ;;  %1819 = vmatpush.bf16.msrb.mxu1 %v2909_v43 }
0x1036   :  { %1705 = vmatpush.bf16.msra.mxu3 %v2921_v53 }
0x1037   :  { %1807 = vmatpush.bf16.msrb.mxu0 %v2914_v51  ;;  %1820 = vmatpush.bf16.msrb.mxu1 %v2919_v52 }
0x103a   :  { %1706 = vmatpush.bf16.msra.mxu3 %v2931_v62 }
0x103b   :  { %1808 = vmatpush.bf16.msrb.mxu0 %v2924_v60  ;;  %1821 = vmatpush.bf16.msrb.mxu1 %v2929_v61 }
0x103e   :  { %1707 = vmatpush.bf16.msra.mxu3 %v2943_v11 }
0x103f   :  { %1809 = vmatpush.bf16.msrb.mxu0 %v2934_v6  ;;  %1822 = vmatpush.bf16.msrb.mxu1 %v2941_v10 }
0x109e   :  { %v1440_v5 = vpop.f32.mrf.mxu0 }
0x109f   :  { %v1453_v30 = vpop.f32.mrf.mxu1  ;;  %v1458_v36 = vadd.f32 %v1440_v5, %v1415_v31 }
0x10a0   :  { %v1459_v47 = vadd.f32 %v1453_v30, %v1416_v18 }
0x10a4   :  { %v1427_v32 = vpop.f32.mrf.mxu3 }
0x10a5   :  { %v1457_v23 = vadd.f32 %v1427_v32, %v1414_v15 }
0x10a6   :  { %v1442_v27 = vpop.f32.mrf.mxu0 }
0x10a7   :  { %v1460_v48 = vadd.f32 %v1458_v36, %v1457_v23  ;;  %v1455_v28 = vpop.f32.mrf.mxu1 }
0x10a9   :  { %v1461_v29 = vadd.f32 %v1460_v48, %v1459_v47 }
0x10ab   :  { %1462 = vadd.xlane.f32.xlu0 %v1461_v29 }
0x10ac   :  { %v1429_v49 = vpop.f32.mrf.mxu3 }
0x111e   :  { %v1463_v50 = vpop.xlane.xlu0 %1462 }
0x111f   :  { %v1464_v38 = vmul.f32 0.0026041667, %v1463_v50 }
0x1121   :  { %v1465_v40 = vsub.f32 %v1457_v23, %v1464_v38  ;;  %v1466_v58 = vsub.f32 %v1458_v36, %v1464_v38  ;;  %v1467_v39 = vsub.f32 %v1459_v47, %v1464_v38 }
0x1123   :  { %v1468_v59 = vmul.f32 %v1465_v40, %v1465_v40  ;;  %v1469_v41 = vmul.f32 %v1466_v58, %v1466_v58  ;;  %v1470_v45 = vmul.f32 %v1467_v39, %v1467_v39 }
0x1125   :  { %v1471_v63 = vadd.f32 %v1469_v41, %v1468_v59 }
0x1127   :  { %v1472_v0 = vadd.f32 %v1471_v63, %v1470_v45 }
0x1129   :  { %1473 = vadd.xlane.f32.xlu1 %v1472_v0 }
0x119c   :  { %v1474_v54 = vpop.xlane.xlu1 %1473 }
0x119d   :  { %v1475_v55 = vmul.f32 0.0026041667, %v1474_v54 }
0x119f   :  { %v1476_v19 = vadd.f32 0.001, %v1475_v55 }
0x11a1   :  { %2602 = vrsqrt.f32 %v1476_v19  ;;  %vm1483_vm4 = vweird.f32 %v1476_v19 }
0x11a7   :  { %v2603_v20 = vpop.eup %2602 }
0x11a8   :  { %v1478_v56 = vmul.f32 %v2603_v20, %v1476_v19  ;;  %vm1484_vm3 = vweird.f32 %v2603_v20 }
0x11a9   :  { %vm1485_vm5 = vmor %vm1483_vm4, %vm1484_vm3 }
0x11aa   :  { %v1479_v57 = vmul.f32 %v2603_v20, %v1478_v56 }
0x11ac   :  { %v1480_v21 = vmul.f32 0.5, %v1479_v57 }
0x11ae   :  { %v1481_v22 = vsub.f32 1.5, %v1480_v21 }
0x11b0   :  { %v1482_v1 = vmul.f32 %v2603_v20, %v1481_v22 }
0x11b2   :  { %v1486_v5 = vsel %vm1485_vm5, %v2603_v20, %v1482_v1 }
0x11b3   :  { %v1487_v30 = vmul.f32 %v1486_v5, %v1465_v40  ;;  %v1489_v31 = vmul.f32 %v1486_v5, %v1467_v39  ;;  %v1488_v38 = vmul.f32 %v1486_v5, %v1466_v58 }
0x11b5   :  { %v1490_v15 = vmul.f32 %v1487_v30, %v3010_v2  ;;  %v1492_v18 = vmul.f32 %v1489_v31, %v3012_v4  ;;  %v1491_v45 = vmul.f32 %v1488_v38, %v3022_v37 }
0x11b7   :  { %v1493_v32 = vadd.f32 %v1490_v15, %v3014_v13  ;;  %v1495_v36 = vadd.f32 %v1492_v18, %v3016_v14  ;;  %v1494_v20 = vadd.f32 %v1491_v45, %v3024_v46 }
0x11b9   :  { %v2445_v23 = vmul.f32 -1.442695, %v1493_v32  ;;  %v2446_v27 = vmul.f32 -1.442695, %v1495_v36 }
0x11bb   :  { %2604 = vpow2.f32 %v2445_v23 }
0x11bc   :  { %2606 = vpow2.f32 %v2446_v27 }
0x11c1   :  { %v2605_v47 = vpop.eup %2604 }
0x11c2   :  { %v2607_v48 = vpop.eup %2606  ;;  %v1499_v28 = vadd.f32 1.0, %v2605_v47  ;;  %v1542_v47 = vld [vmem:[#allocation3 + $0xf0] sm:$0xff] }
0x11c3   :  { %v1520_v29 = vadd.f32 1.0, %v2607_v48  ;;  %v1543_v48 = vld [vmem:[#allocation3 + $0xf8] sm:$0xff] }
0x11c4   :  { %2608 = vrcp.f32 %v1499_v28  ;;  %v1511_v41 = vand.u32 2147483648, %v1499_v28  ;;  %v1509_v0 = vand.u32 2147483647, %v1499_v28  ;;  %vm1505_vm7 = vweird.f32 %v1499_v28 }
0x11c5   :  { %2610 = vrcp.f32 %v1520_v29  ;;  %v1532_v1 = vand.u32 2147483648, %v1520_v29  ;;  %vm1526_vm11 = vweird.f32 %v1520_v29  ;;  %v1530_v5 = vand.u32 2147483647, %v1520_v29 }
0x11c6   :  { %v1512_v19 = vor.u32 1.1754944e-38, %v1511_v41  ;;  %vm1510_vm9 = vcmp.eq.f32.partialorder %v1509_v0, 8.507059e+37 }
0x11c7   :  { %v1533_v15 = vor.u32 1.1754944e-38, %v1532_v1  ;;  %vm1531_vm13 = vcmp.eq.f32.partialorder %v1530_v5, 8.507059e+37 }
0x11ca   :  { %v2609_v49 = vpop.eup %2608 }
0x11cb   :  { %v2611_v50 = vpop.eup %2610  ;;  %v1501_v40 = vmul.f32 %v2609_v49, %v1499_v28  ;;  %vm1506_vm6 = vweird.f32 %v2609_v49  ;;  %v1544_v28 = vld [vmem:[#allocation3 + $0x100] sm:$0xff] }
0x11cc   :  { %v1522_v39 = vmul.f32 %v2611_v50, %v1520_v29  ;;  %vm1507_vm8 = vmor %vm1505_vm7, %vm1506_vm6  ;;  %vm1527_vm10 = vweird.f32 %v2611_v50 }
0x11cd   :  { %v1502_v59 = vsub.f32 1.0, %v1501_v40  ;;  %vm1528_vm12 = vmor %vm1526_vm11, %vm1527_vm10 }
0x11ce   :  { %v1523_v54 = vsub.f32 1.0, %v1522_v39 }
0x11cf   :  { %v1503_v63 = vmul.f32 %v2609_v49, %v1502_v59 }
0x11d0   :  { %v1524_v58 = vmul.f32 %v2611_v50, %v1523_v54 }
0x11d1   :  { %v1504_v55 = vadd.f32 %v2609_v49, %v1503_v63 }
0x11d2   :  { %v1525_v22 = vadd.f32 %v2611_v50, %v1524_v58 }
0x11d3   :  { %v1508_v56 = vsel %vm1507_vm8, %v2609_v49, %v1504_v55 }
0x11d4   :  { %v1513_v57 = vsel %vm1510_vm9, %v1512_v19, %v1508_v56  ;;  %v1529_v30 = vsel %vm1528_vm12, %v2611_v50, %v1525_v22 }
0x11d5   :  { %v1515_v21 = vmul.f32 %v1513_v57, %v1494_v20  ;;  %v1534_v32 = vsel %vm1531_vm13, %v1533_v15, %v1529_v30 }
0x11d7   :  { %2612 = vtanh.f32 %v1515_v21 }
0x11dd   :  { %v2613_v31 = vpop.eup %2612 }
0x11de   :  { %v1536_v18 = vsub.f32 %v2613_v31, %v3326_v9 }
0x11e0   :  { %v1537_v36 = vmul.f32 %v1536_v18, %v1534_v32 }
0x11e2   :  { %v3363_v23 = vadd.f32 %v1537_v36, %v3326_v9 }
0x11e4   :  { %1540 = vst [vmem:[#allocation11 + $0x48] sm:$0xff] %v3363_v23  ;;  %v1545_v27 = vpack.c.bf16 %v3363_v23, %v3363_v23 }
0x11e6   :  { %1554 = vmatmul.bf16.vlgmr.msrb.gmra.mxu2 %v1545_v27  ;;  %1567 = vmatmul.bf16.vlgmr.msrb.gmra.mxu3 %v1545_v27 }
0x11e7   :  { %1580 = vmatmul.bf16.vlgmr.msra.gmra.mxu0 %v1545_v27  ;;  %1828 = vmatpush.bf16.msrb.mxu2 %v2871_v8 }
0x11e8   :  { %1930 = vmatpush.bf16.msrb.mxu3 %v2867_v3  ;;  %1943 = vmatpush.bf16.msra.mxu0 %v2869_v7 }
0x11eb   :  { %1829 = vmatpush.bf16.msrb.mxu2 %v2881_v17 }
0x11ec   :  { %1931 = vmatpush.bf16.msrb.mxu3 %v2874_v12  ;;  %1944 = vmatpush.bf16.msra.mxu0 %v2879_v16 }
0x11ef   :  { %1830 = vmatpush.bf16.msrb.mxu2 %v2891_v26 }
0x11f0   :  { %1932 = vmatpush.bf16.msrb.mxu3 %v2884_v24  ;;  %1945 = vmatpush.bf16.msra.mxu0 %v2889_v25 }
0x11f3   :  { %1831 = vmatpush.bf16.msrb.mxu2 %v2901_v35 }
0x11f4   :  { %1933 = vmatpush.bf16.msrb.mxu3 %v2894_v33  ;;  %1946 = vmatpush.bf16.msra.mxu0 %v2899_v34 }
0x11f7   :  { %1832 = vmatpush.bf16.msrb.mxu2 %v2911_v44 }
0x11f8   :  { %1934 = vmatpush.bf16.msrb.mxu3 %v2904_v42  ;;  %1947 = vmatpush.bf16.msra.mxu0 %v2909_v43 }
0x11fb   :  { %1833 = vmatpush.bf16.msrb.mxu2 %v2921_v53 }
0x11fc   :  { %1935 = vmatpush.bf16.msrb.mxu3 %v2914_v51  ;;  %1948 = vmatpush.bf16.msra.mxu0 %v2919_v52 }
0x11ff   :  { %1834 = vmatpush.bf16.msrb.mxu2 %v2931_v62 }
0x1200   :  { %1936 = vmatpush.bf16.msrb.mxu3 %v2924_v60  ;;  %1949 = vmatpush.bf16.msra.mxu0 %v2929_v61 }
0x1203   :  { %1835 = vmatpush.bf16.msrb.mxu2 %v2943_v11 }
0x1204   :  { %1937 = vmatpush.bf16.msrb.mxu3 %v2934_v6  ;;  %1950 = vmatpush.bf16.msra.mxu0 %v2941_v10 }
0x1264   :  { %v1581_v9 = vpop.f32.mrf.mxu0 }
0x1265   :  { %v1587_v40 = vadd.f32 %v1581_v9, %v1544_v28 }
0x1269   :  { %v1555_v29 = vpop.f32.mrf.mxu2  ;;  %v1568_v49 = vpop.f32.mrf.mxu3 }
0x126a   :  { %v1585_v50 = vadd.f32 %v1555_v29, %v1542_v47  ;;  %v1586_v38 = vadd.f32 %v1568_v49, %v1543_v48 }
0x126c   :  { %v1588_v39 = vadd.f32 %v1586_v38, %v1585_v50  ;;  %v1583_v59 = vpop.f32.mrf.mxu0 }
0x126e   :  { %v1589_v41 = vadd.f32 %v1588_v39, %v1587_v40 }
0x1270   :  { %1590 = vadd.xlane.f32.xlu2 %v1589_v41 }
0x1271   :  { %v1557_v45 = vpop.f32.mrf.mxu2  ;;  %v1570_v63 = vpop.f32.mrf.mxu3 }
0x12e3   :  { %v1591_v0 = vpop.xlane.xlu2 %1590 }
0x12e4   :  { %v1592_v54 = vmul.f32 0.0026041667, %v1591_v0 }
0x12e6   :  { %v1593_v55 = vsub.f32 %v1585_v50, %v1592_v54  ;;  %v1594_v19 = vsub.f32 %v1586_v38, %v1592_v54  ;;  %v1595_v20 = vsub.f32 %v1587_v40, %v1592_v54 }
0x12e8   :  { %v1596_v56 = vmul.f32 %v1593_v55, %v1593_v55  ;;  %v1597_v57 = vmul.f32 %v1594_v19, %v1594_v19  ;;  %v1598_v58 = vmul.f32 %v1595_v20, %v1595_v20 }
0x12ea   :  { %v1599_v21 = vadd.f32 %v1597_v57, %v1596_v56 }
0x12ec   :  { %v1600_v22 = vadd.f32 %v1599_v21, %v1598_v58 }
0x12ee   :  { %1601 = vadd.xlane.f32.xlu0 %v1600_v22 }
0x1361   :  { %v1602_v1 = vpop.xlane.xlu0 %1601 }
0x1362   :  { %v1603_v5 = vmul.f32 0.0026041667, %v1602_v1 }
0x1364   :  { %v1604_v30 = vadd.f32 0.001, %v1603_v5 }
0x1366   :  { %2614 = vrsqrt.f32 %v1604_v30  ;;  %vm1611_vm15 = vweird.f32 %v1604_v30 }
0x136c   :  { %v2615_v31 = vpop.eup %2614 }
0x136d   :  { %v1606_v15 = vmul.f32 %v2615_v31, %v1604_v30  ;;  %vm1612_vm14 = vweird.f32 %v2615_v31 }
0x136e   :  { %vm1613_vm0 = vmor %vm1611_vm15, %vm1612_vm14 }
0x136f   :  { %v1607_v18 = vmul.f32 %v2615_v31, %v1606_v15 }
0x1371   :  { %v1608_v32 = vmul.f32 0.5, %v1607_v18 }
0x1373   :  { %v1609_v36 = vsub.f32 1.5, %v1608_v32 }
0x1375   :  { %v1610_v27 = vmul.f32 %v2615_v31, %v1609_v36 }
0x1377   :  { %v1614_v9 = vsel %vm1613_vm0, %v2615_v31, %v1610_v27 }
0x1378   :  { %v1615_v47 = vmul.f32 %v1614_v9, %v1593_v55  ;;  %v1617_v48 = vmul.f32 %v1614_v9, %v1595_v20  ;;  %v1616_v54 = vmul.f32 %v1614_v9, %v1594_v19 }
0x137a   :  { %v1618_v28 = vmul.f32 %v1615_v47, %v3010_v2  ;;  %v1620_v29 = vmul.f32 %v1617_v48, %v3012_v4  ;;  %v1619_v58 = vmul.f32 %v1616_v54, %v3022_v37 }
0x137c   :  { %v1621_v49 = vadd.f32 %v1618_v28, %v3014_v13  ;;  %v1623_v50 = vadd.f32 %v1620_v29, %v3016_v14  ;;  %v1622_v31 = vadd.f32 %v1619_v58, %v3024_v46 }
0x137e   :  { %v2447_v38 = vmul.f32 -1.442695, %v1621_v49  ;;  %v2448_v40 = vmul.f32 -1.442695, %v1623_v50 }
0x1380   :  { %2616 = vpow2.f32 %v2447_v38 }
0x1381   :  { %2618 = vpow2.f32 %v2448_v40 }
0x1386   :  { %v2617_v39 = vpop.eup %2616 }
0x1387   :  { %v2619_v59 = vpop.eup %2618  ;;  %v1627_v41 = vadd.f32 1.0, %v2617_v39  ;;  %v1670_v39 = vld [vmem:[#allocation3 + $0x108] sm:$0xff] }
0x1388   :  { %v1648_v45 = vadd.f32 1.0, %v2619_v59  ;;  %v1671_v59 = vld [vmem:[#allocation3 + $0x110] sm:$0xff] }
0x1389   :  { %2620 = vrcp.f32 %v1627_v41  ;;  %v1639_v57 = vand.u32 2147483648, %v1627_v41  ;;  %v1637_v22 = vand.u32 2147483647, %v1627_v41  ;;  %vm1633_vm2 = vweird.f32 %v1627_v41 }
0x138a   :  { %2622 = vrcp.f32 %v1648_v45  ;;  %v1660_v27 = vand.u32 2147483648, %v1648_v45  ;;  %vm1654_vm6 = vweird.f32 %v1648_v45  ;;  %v1658_v9 = vand.u32 2147483647, %v1648_v45 }
0x138b   :  { %v1640_v30 = vor.u32 1.1754944e-38, %v1639_v57  ;;  %vm1638_vm4 = vcmp.eq.f32.partialorder %v1637_v22, 8.507059e+37 }
0x138c   :  { %v1661_v28 = vor.u32 1.1754944e-38, %v1660_v27  ;;  %vm1659_vm8 = vcmp.eq.f32.partialorder %v1658_v9, 8.507059e+37 }
0x138f   :  { %v2621_v63 = vpop.eup %2620 }
0x1390   :  { %v2623_v0 = vpop.eup %2622  ;;  %v1629_v55 = vmul.f32 %v2621_v63, %v1627_v41  ;;  %vm1634_vm1 = vweird.f32 %v2621_v63 }
0x1391   :  { %v1650_v20 = vmul.f32 %v2623_v0, %v1648_v45  ;;  %vm1635_vm3 = vmor %vm1633_vm2, %vm1634_vm1  ;;  %vm1655_vm5 = vweird.f32 %v2623_v0  ;;  %v1672_v45 = vld [vmem:[#allocation3 + $0x118] sm:$0xff] }
0x1392   :  { %v1630_v56 = vsub.f32 1.0, %v1629_v55  ;;  %vm1656_vm7 = vmor %vm1654_vm6, %vm1655_vm5 }
0x1393   :  { %v1651_v1 = vsub.f32 1.0, %v1650_v20 }
0x1394   :  { %v1631_v21 = vmul.f32 %v2621_v63, %v1630_v56 }
0x1395   :  { %v1652_v19 = vmul.f32 %v2623_v0, %v1651_v1 }
0x1396   :  { %v1632_v5 = vadd.f32 %v2621_v63, %v1631_v21 }
0x1397   :  { %v1653_v36 = vadd.f32 %v2623_v0, %v1652_v19 }
0x1398   :  { %v1636_v15 = vsel %vm1635_vm3, %v2621_v63, %v1632_v5 }
0x1399   :  { %v1641_v18 = vsel %vm1638_vm4, %v1640_v30, %v1636_v15  ;;  %v1657_v47 = vsel %vm1656_vm7, %v2623_v0, %v1653_v36 }
0x139a   :  { %v1643_v32 = vmul.f32 %v1641_v18, %v1622_v31  ;;  %v1662_v49 = vsel %vm1659_vm8, %v1661_v28, %v1657_v47 }
0x139c   :  { %2624 = vtanh.f32 %v1643_v32 }
0x13a2   :  { %v2625_v48 = vpop.eup %2624 }
0x13a3   :  { %v1664_v29 = vsub.f32 %v2625_v48, %v3363_v23 }
0x13a5   :  { %v1665_v50 = vmul.f32 %v1664_v29, %v1662_v49 }
0x13a7   :  { %v3400_v38 = vadd.f32 %v1665_v50, %v3363_v23 }
0x13a9   :  { %1668 = vst [vmem:[#allocation11 + $0x50] sm:$0xff] %v3400_v38  ;;  %v1673_v40 = vpack.c.bf16 %v3400_v38, %v3400_v38 }
0x13ab   :  { %1682 = vmatmul.bf16.vlgmr.msra.gmra.mxu1 %v1673_v40  ;;  %1695 = vmatmul.bf16.vlgmr.msra.gmra.mxu2 %v1673_v40 }
0x13ac   :  { %1708 = vmatmul.bf16.vlgmr.msra.gmra.mxu3 %v1673_v40  ;;  %1956 = vmatpush.bf16.msra.mxu1 %v2871_v8 }
0x13ad   :  { %2058 = vmatpush.bf16.msra.mxu2 %v2867_v3  ;;  %2071 = vmatpush.bf16.msra.mxu3 %v2869_v7 }
0x13b0   :  { %1957 = vmatpush.bf16.msra.mxu1 %v2881_v17 }
0x13b1   :  { %2059 = vmatpush.bf16.msra.mxu2 %v2874_v12  ;;  %2072 = vmatpush.bf16.msra.mxu3 %v2879_v16 }
0x13b4   :  { %1958 = vmatpush.bf16.msra.mxu1 %v2891_v26 }
0x13b5   :  { %2060 = vmatpush.bf16.msra.mxu2 %v2884_v24  ;;  %2073 = vmatpush.bf16.msra.mxu3 %v2889_v25 }
0x13b8   :  { %1959 = vmatpush.bf16.msra.mxu1 %v2901_v35 }
0x13b9   :  { %2061 = vmatpush.bf16.msra.mxu2 %v2894_v33  ;;  %2074 = vmatpush.bf16.msra.mxu3 %v2899_v34 }
0x13bc   :  { %1960 = vmatpush.bf16.msra.mxu1 %v2911_v44 }
0x13bd   :  { %2062 = vmatpush.bf16.msra.mxu2 %v2904_v42  ;;  %2075 = vmatpush.bf16.msra.mxu3 %v2909_v43 }
0x13c0   :  { %1961 = vmatpush.bf16.msra.mxu1 %v2921_v53 }
0x13c1   :  { %2063 = vmatpush.bf16.msra.mxu2 %v2914_v51  ;;  %2076 = vmatpush.bf16.msra.mxu3 %v2919_v52 }
0x13c4   :  { %1962 = vmatpush.bf16.msra.mxu1 %v2931_v62 }
0x13c5   :  { %2064 = vmatpush.bf16.msra.mxu2 %v2924_v60  ;;  %2077 = vmatpush.bf16.msra.mxu3 %v2929_v61 }
0x13c8   :  { %1963 = vmatpush.bf16.msra.mxu1 %v2943_v11 }
0x13c9   :  { %2065 = vmatpush.bf16.msra.mxu2 %v2934_v6  ;;  %2078 = vmatpush.bf16.msra.mxu3 %v2941_v10 }
0x1428   :  { %v1683_v23 = vpop.f32.mrf.mxu1 }
0x1429   :  { %v1713_v63 = vadd.f32 %v1683_v23, %v1670_v39 }
0x142e   :  { %v1696_v41 = vpop.f32.mrf.mxu2 }
0x142f   :  { %v1714_v0 = vadd.f32 %v1696_v41, %v1671_v59  ;;  %v1709_v54 = vpop.f32.mrf.mxu3 }
0x1430   :  { %v1685_v55 = vpop.f32.mrf.mxu1  ;;  %v1715_v56 = vadd.f32 %v1709_v54, %v1672_v45 }
0x1431   :  { %v1716_v20 = vadd.f32 %v1714_v0, %v1713_v63 }
0x1433   :  { %v1717_v57 = vadd.f32 %v1716_v20, %v1715_v56 }
0x1435   :  { %1718 = vadd.xlane.f32.xlu1 %v1717_v57 }
0x1436   :  { %v1698_v58 = vpop.f32.mrf.mxu2 }
0x1437   :  { %v1711_v21 = vpop.f32.mrf.mxu3 }
0x14a8   :  { %v1719_v22 = vpop.xlane.xlu1 %1718 }
0x14a9   :  { %v1720_v1 = vmul.f32 0.0026041667, %v1719_v22 }
0x14ab   :  { %v1721_v5 = vsub.f32 %v1713_v63, %v1720_v1  ;;  %v1722_v30 = vsub.f32 %v1714_v0, %v1720_v1  ;;  %v1723_v31 = vsub.f32 %v1715_v56, %v1720_v1 }
0x14ad   :  { %v1724_v15 = vmul.f32 %v1721_v5, %v1721_v5  ;;  %v1725_v18 = vmul.f32 %v1722_v30, %v1722_v30  ;;  %v1726_v19 = vmul.f32 %v1723_v31, %v1723_v31 }
0x14af   :  { %v1727_v32 = vadd.f32 %v1725_v18, %v1724_v15 }
0x14b1   :  { %v1728_v36 = vadd.f32 %v1727_v32, %v1726_v19 }
0x14b3   :  { %1729 = vadd.xlane.f32.xlu2 %v1728_v36 }
0x1526   :  { %v1730_v27 = vpop.xlane.xlu2 %1729 }
0x1527   :  { %v1731_v9 = vmul.f32 0.0026041667, %v1730_v27 }
0x1529   :  { %v1732_v47 = vadd.f32 0.001, %v1731_v9 }
0x152b   :  { %2626 = vrsqrt.f32 %v1732_v47  ;;  %vm1739_vm10 = vweird.f32 %v1732_v47 }
0x1531   :  { %v2627_v48 = vpop.eup %2626 }
0x1532   :  { %v1734_v28 = vmul.f32 %v2627_v48, %v1732_v47  ;;  %vm1740_vm9 = vweird.f32 %v2627_v48 }
0x1533   :  { %vm1741_vm11 = vmor %vm1739_vm10, %vm1740_vm9 }
0x1534   :  { %v1735_v29 = vmul.f32 %v2627_v48, %v1734_v28 }
0x1536   :  { %v1736_v49 = vmul.f32 0.5, %v1735_v29 }
0x1538   :  { %v1737_v50 = vsub.f32 1.5, %v1736_v49 }
0x153a   :  { %v1738_v40 = vmul.f32 %v2627_v48, %v1737_v50 }
0x153c   :  { %v1742_v23 = vsel %vm1741_vm11, %v2627_v48, %v1738_v40 }
0x153d   :  { %v1743_v39 = vmul.f32 %v1742_v23, %v1721_v5  ;;  %v1745_v59 = vmul.f32 %v1742_v23, %v1723_v31  ;;  %v1744_v1 = vmul.f32 %v1742_v23, %v1722_v30 }
0x153f   :  { %v1746_v41 = vmul.f32 %v1743_v39, %v3010_v2  ;;  %v1748_v45 = vmul.f32 %v1745_v59, %v3012_v4  ;;  %v1747_v19 = vmul.f32 %v1744_v1, %v3022_v37 }
0x1541   :  { %v1749_v63 = vadd.f32 %v1746_v41, %v3014_v13  ;;  %v1751_v0 = vadd.f32 %v1748_v45, %v3016_v14  ;;  %v1750_v48 = vadd.f32 %v1747_v19, %v3024_v46 }
0x1543   :  { %v2449_v54 = vmul.f32 -1.442695, %v1749_v63  ;;  %v2450_v55 = vmul.f32 -1.442695, %v1751_v0 }
0x1545   :  { %2628 = vpow2.f32 %v2449_v54 }
0x1546   :  { %2630 = vpow2.f32 %v2450_v55 }
0x154b   :  { %v2629_v20 = vpop.eup %2628 }
0x154c   :  { %v2631_v56 = vpop.eup %2630  ;;  %v1755_v57 = vadd.f32 1.0, %v2629_v20 }
0x154d   :  { %v1776_v58 = vadd.f32 1.0, %v2631_v56 }
0x154e   :  { %2632 = vrcp.f32 %v1755_v57  ;;  %v1767_v18 = vand.u32 2147483648, %v1755_v57  ;;  %v1765_v36 = vand.u32 2147483647, %v1755_v57  ;;  %vm1761_vm13 = vweird.f32 %v1755_v57 }
0x154f   :  { %2634 = vrcp.f32 %v1776_v58  ;;  %v1788_v40 = vand.u32 2147483648, %v1776_v58  ;;  %vm1782_vm1 = vweird.f32 %v1776_v58  ;;  %v1786_v23 = vand.u32 2147483647, %v1776_v58 }
0x1550   :  { %v1768_v47 = vor.u32 1.1754944e-38, %v1767_v18  ;;  %vm1766_vm15 = vcmp.eq.f32.partialorder %v1765_v36, 8.507059e+37 }
0x1551   :  { %v1789_v41 = vor.u32 1.1754944e-38, %v1788_v40  ;;  %vm1787_vm3 = vcmp.eq.f32.partialorder %v1786_v23, 8.507059e+37 }
0x1554   :  { %v2633_v21 = vpop.eup %2632 }
0x1555   :  { %v2635_v22 = vpop.eup %2634  ;;  %v1757_v5 = vmul.f32 %v2633_v21, %v1755_v57  ;;  %vm1762_vm12 = vweird.f32 %v2633_v21 }
0x1556   :  { %v1778_v31 = vmul.f32 %v2635_v22, %v1776_v58  ;;  %vm1763_vm14 = vmor %vm1761_vm13, %vm1762_vm12  ;;  %vm1783_vm0 = vweird.f32 %v2635_v22 }
0x1557   :  { %v1758_v15 = vsub.f32 1.0, %v1757_v5  ;;  %vm1784_vm2 = vmor %vm1782_vm1, %vm1783_vm0 }
0x1558   :  { %v1779_v27 = vsub.f32 1.0, %v1778_v31 }
0x1559   :  { %v1759_v32 = vmul.f32 %v2633_v21, %v1758_v15 }
0x155a   :  { %v1780_v30 = vmul.f32 %v2635_v22, %v1779_v27 }
0x155b   :  { %v1760_v9 = vadd.f32 %v2633_v21, %v1759_v32 }
0x155c   :  { %v1781_v50 = vadd.f32 %v2635_v22, %v1780_v30 }
0x155d   :  { %v1764_v28 = vsel %vm1763_vm14, %v2633_v21, %v1760_v9 }
0x155e   :  { %v1769_v29 = vsel %vm1766_vm15, %v1768_v47, %v1764_v28  ;;  %v1785_v39 = vsel %vm1784_vm2, %v2635_v22, %v1781_v50 }
0x155f   :  { %v1771_v49 = vmul.f32 %v1769_v29, %v1750_v48  ;;  %v1790_v63 = vsel %vm1787_vm3, %v1789_v41, %v1785_v39 }
0x1561   :  { %2636 = vtanh.f32 %v1771_v49 }
0x1567   :  { %v2637_v59 = vpop.eup %2636 }
0x1568   :  { %v1792_v45 = vsub.f32 %v2637_v59, %v3400_v38 }
0x156a   :  { %v1793_v0 = vmul.f32 %v1792_v45, %v1790_v63 }
0x156c   :  { %v3437_v54 = vadd.f32 %v1793_v0, %v3400_v38 }
0x156e   :  { %1796 = vst [vmem:[#allocation11 + $0x58] sm:$0xff] %v3437_v54  ;;  %v1801_v55 = vpack.c.bf16 %v3437_v54, %v3437_v54 }
0x1570   :  { %1810 = vmatmul.bf16.vlgmr.msrb.gmra.mxu0 %v1801_v55  ;;  %1823 = vmatmul.bf16.vlgmr.msrb.gmra.mxu1 %v1801_v55 }
0x1571   :  { %1836 = vmatmul.bf16.vlgmr.msrb.gmra.mxu2 %v1801_v55  ;;  %2084 = vmatpush.bf16.msrb.mxu0 %v2871_v8 }
0x1572   :  { %2186 = vmatpush.bf16.msrb.mxu1 %v2867_v3  ;;  %2199 = vmatpush.bf16.msrb.mxu2 %v2869_v7 }
0x1575   :  { %2085 = vmatpush.bf16.msrb.mxu0 %v2881_v17 }
0x1576   :  { %2187 = vmatpush.bf16.msrb.mxu1 %v2874_v12  ;;  %2200 = vmatpush.bf16.msrb.mxu2 %v2879_v16  ;;  %v1798_v12 = vld [vmem:[#allocation3 + $0x120] sm:$0xff]  ;;  %v1799_v16 = vld [vmem:[#allocation3 + $0x128] sm:$0xff] }
0x1579   :  { %2086 = vmatpush.bf16.msrb.mxu0 %v2891_v26 }
0x157a   :  { %2188 = vmatpush.bf16.msrb.mxu1 %v2884_v24  ;;  %2201 = vmatpush.bf16.msrb.mxu2 %v2889_v25 }
0x157d   :  { %2087 = vmatpush.bf16.msrb.mxu0 %v2901_v35 }
0x157e   :  { %2189 = vmatpush.bf16.msrb.mxu1 %v2894_v33  ;;  %2202 = vmatpush.bf16.msrb.mxu2 %v2899_v34  ;;  %v1800_v33 = vld [vmem:[#allocation3 + $0x130] sm:$0xff] }
0x1581   :  { %2088 = vmatpush.bf16.msrb.mxu0 %v2911_v44 }
0x1582   :  { %2190 = vmatpush.bf16.msrb.mxu1 %v2904_v42  ;;  %2203 = vmatpush.bf16.msrb.mxu2 %v2909_v43 }
0x1585   :  { %2089 = vmatpush.bf16.msrb.mxu0 %v2921_v53 }
0x1586   :  { %2191 = vmatpush.bf16.msrb.mxu1 %v2914_v51  ;;  %2204 = vmatpush.bf16.msrb.mxu2 %v2919_v52 }
0x1589   :  { %2090 = vmatpush.bf16.msrb.mxu0 %v2931_v62 }
0x158a   :  { %2192 = vmatpush.bf16.msrb.mxu1 %v2924_v60  ;;  %2205 = vmatpush.bf16.msrb.mxu2 %v2929_v61 }
0x158d   :  { %2091 = vmatpush.bf16.msrb.mxu0 %v2943_v11 }
0x158e   :  { %2193 = vmatpush.bf16.msrb.mxu1 %v2934_v6  ;;  %2206 = vmatpush.bf16.msrb.mxu2 %v2941_v10 }
0x15ed   :  { %v1811_v3 = vpop.f32.mrf.mxu0  ;;  %v1824_v7 = vpop.f32.mrf.mxu1 }
0x15ee   :  { %v1841_v24 = vadd.f32 %v1811_v3, %v1798_v12  ;;  %v1842_v25 = vadd.f32 %v1824_v7, %v1799_v16 }
0x15f0   :  { %v1844_v42 = vadd.f32 %v1842_v25, %v1841_v24 }
0x15f4   :  { %v1837_v34 = vpop.f32.mrf.mxu2 }
0x15f5   :  { %v1843_v43 = vadd.f32 %v1837_v34, %v1800_v33  ;;  %v1813_v51 = vpop.f32.mrf.mxu0  ;;  %v1826_v52 = vpop.f32.mrf.mxu1 }
0x15f7   :  { %v1845_v60 = vadd.f32 %v1844_v42, %v1843_v43 }
0x15f9   :  { %1846 = vadd.xlane.f32.xlu0 %v1845_v60 }
0x15fc   :  { %v1839_v61 = vpop.f32.mrf.mxu2 }
0x166c   :  { %v1847_v38 = vpop.xlane.xlu0 %1846 }
0x166d   :  { %v1848_v20 = vmul.f32 0.0026041667, %v1847_v38 }
0x166f   :  { %v1849_v6 = vsub.f32 %v1841_v24, %v1848_v20  ;;  %v1850_v56 = vsub.f32 %v1842_v25, %v1848_v20  ;;  %v1851_v10 = vsub.f32 %v1843_v43, %v1848_v20 }
0x1671   :  { %v1852_v57 = vmul.f32 %v1849_v6, %v1849_v6  ;;  %v1853_v58 = vmul.f32 %v1850_v56, %v1850_v56  ;;  %v1854_v21 = vmul.f32 %v1851_v10, %v1851_v10 }
0x1673   :  { %v1855_v22 = vadd.f32 %v1853_v58, %v1852_v57 }
0x1675   :  { %v1856_v1 = vadd.f32 %v1855_v22, %v1854_v21 }
0x1677   :  { %1857 = vadd.xlane.f32.xlu1 %v1856_v1 }
0x16ea   :  { %v1858_v5 = vpop.xlane.xlu1 %1857 }
0x16eb   :  { %v1859_v31 = vmul.f32 0.0026041667, %v1858_v5 }
0x16ed   :  { %v1860_v15 = vadd.f32 0.001, %v1859_v31 }
0x16ef   :  { %2638 = vrsqrt.f32 %v1860_v15  ;;  %vm1867_vm5 = vweird.f32 %v1860_v15 }
0x16f5   :  { %v2639_v18 = vpop.eup %2638 }
0x16f6   :  { %v1862_v19 = vmul.f32 %v2639_v18, %v1860_v15  ;;  %vm1868_vm4 = vweird.f32 %v2639_v18 }
0x16f7   :  { %vm1869_vm6 = vmor %vm1867_vm5, %vm1868_vm4 }
0x16f8   :  { %v1863_v32 = vmul.f32 %v2639_v18, %v1862_v19  ;;  %v1926_v19 = vld [vmem:[#allocation3 + $0x138] sm:$0xff] }
0x16fa   :  { %v1864_v36 = vmul.f32 0.5, %v1863_v32  ;;  %v1928_v32 = vld [vmem:[#allocation3 + $0x148] sm:$0xff] }
0x16fc   :  { %v1865_v27 = vsub.f32 1.5, %v1864_v36 }
0x16fe   :  { %v1866_v9 = vmul.f32 %v2639_v18, %v1865_v27 }
0x1700   :  { %v1870_v47 = vsel %vm1869_vm6, %v2639_v18, %v1866_v9  ;;  %v1927_v18 = vld [vmem:[#allocation3 + $0x140] sm:$0xff] }
0x1701   :  { %v1871_v48 = vmul.f32 %v1870_v47, %v1849_v6  ;;  %v1873_v28 = vmul.f32 %v1870_v47, %v1851_v10  ;;  %v1872_v55 = vmul.f32 %v1870_v47, %v1850_v56 }
0x1703   :  { %v1874_v29 = vmul.f32 %v1871_v48, %v3010_v2  ;;  %v1876_v30 = vmul.f32 %v1873_v28, %v3012_v4  ;;  %v1875_v24 = vmul.f32 %v1872_v55, %v3022_v37 }
0x1705   :  { %v1877_v49 = vadd.f32 %v1874_v29, %v3014_v13  ;;  %v1879_v50 = vadd.f32 %v1876_v30, %v3016_v14  ;;  %v1878_v51 = vadd.f32 %v1875_v24, %v3024_v46 }
0x1707   :  { %v2451_v40 = vmul.f32 -1.442695, %v1877_v49  ;;  %v2452_v23 = vmul.f32 -1.442695, %v1879_v50 }
0x1709   :  { %2640 = vpow2.f32 %v2451_v40 }
0x170a   :  { %2642 = vpow2.f32 %v2452_v23 }
0x170f   :  { %v2641_v39 = vpop.eup %2640 }
0x1710   :  { %v2643_v59 = vpop.eup %2642  ;;  %v1883_v41 = vadd.f32 1.0, %v2641_v39 }
0x1711   :  { %v1904_v45 = vadd.f32 1.0, %v2643_v59 }
0x1712   :  { %2644 = vrcp.f32 %v1883_v41  ;;  %v1895_v16 = vand.u32 2147483648, %v1883_v41  ;;  %v1893_v33 = vand.u32 2147483647, %v1883_v41  ;;  %vm1889_vm8 = vweird.f32 %v1883_v41 }
0x1713   :  { %2646 = vrcp.f32 %v1904_v45  ;;  %v1916_v6 = vand.u32 2147483648, %v1904_v45  ;;  %vm1910_vm12 = vweird.f32 %v1904_v45  ;;  %v1914_v56 = vand.u32 2147483647, %v1904_v45 }
0x1714   :  { %v1896_v43 = vor.u32 1.1754944e-38, %v1895_v16  ;;  %vm1894_vm10 = vcmp.eq.f32.partialorder %v1893_v33, 8.507059e+37 }
0x1715   :  { %v1917_v58 = vor.u32 1.1754944e-38, %v1916_v6  ;;  %vm1915_vm14 = vcmp.eq.f32.partialorder %v1914_v56, 8.507059e+37 }
0x1718   :  { %v2645_v63 = vpop.eup %2644 }
0x1719   :  { %v2647_v0 = vpop.eup %2646  ;;  %v1885_v3 = vmul.f32 %v2645_v63, %v1883_v41  ;;  %vm1890_vm7 = vweird.f32 %v2645_v63 }
0x171a   :  { %v1906_v7 = vmul.f32 %v2647_v0, %v1904_v45  ;;  %vm1891_vm9 = vmor %vm1889_vm8, %vm1890_vm7  ;;  %vm1911_vm11 = vweird.f32 %v2647_v0 }
0x171b   :  { %v1886_v12 = vsub.f32 1.0, %v1885_v3  ;;  %vm1912_vm13 = vmor %vm1910_vm12, %vm1911_vm11 }
0x171c   :  { %v1907_v34 = vsub.f32 1.0, %v1906_v7 }
0x171d   :  { %v1887_v25 = vmul.f32 %v2645_v63, %v1886_v12 }
0x171e   :  { %v1908_v61 = vmul.f32 %v2647_v0, %v1907_v34 }
0x171f   :  { %v1888_v42 = vadd.f32 %v2645_v63, %v1887_v25 }
0x1720   :  { %v1909_v20 = vadd.f32 %v2647_v0, %v1908_v61 }
0x1721   :  { %v1892_v52 = vsel %vm1891_vm9, %v2645_v63, %v1888_v42 }
0x1722   :  { %v1897_v60 = vsel %vm1894_vm10, %v1896_v43, %v1892_v52  ;;  %v1913_v10 = vsel %vm1912_vm13, %v2647_v0, %v1909_v20 }
0x1723   :  { %v1899_v38 = vmul.f32 %v1897_v60, %v1878_v51  ;;  %v1918_v22 = vsel %vm1915_vm14, %v1917_v58, %v1913_v10 }
0x1725   :  { %2648 = vtanh.f32 %v1899_v38 }
0x172b   :  { %v2649_v57 = vpop.eup %2648 }
0x172c   :  { %v1920_v21 = vsub.f32 %v2649_v57, %v3437_v54 }
0x172e   :  { %v1921_v1 = vmul.f32 %v1920_v21, %v1918_v22 }
0x1730   :  { %v3474_v5 = vadd.f32 %v1921_v1, %v3437_v54 }
0x1732   :  { %1924 = vst [vmem:[#allocation11 + $0x60] sm:$0xff] %v3474_v5  ;;  %v1929_v31 = vpack.c.bf16 %v3474_v5, %v3474_v5 }
0x1734   :  { %1938 = vmatmul.bf16.vlgmr.msrb.gmra.mxu3 %v1929_v31  ;;  %1951 = vmatmul.bf16.vlgmr.msra.gmra.mxu0 %v1929_v31 }
0x1735   :  { %1964 = vmatmul.bf16.vlgmr.msra.gmra.mxu1 %v1929_v31  ;;  %2212 = vmatpush.bf16.msrb.mxu3 %v2871_v8 }
0x1739   :  { %2213 = vmatpush.bf16.msrb.mxu3 %v2881_v17 }
0x173d   :  { %2214 = vmatpush.bf16.msrb.mxu3 %v2891_v26 }
0x1741   :  { %2215 = vmatpush.bf16.msrb.mxu3 %v2901_v35 }
0x1745   :  { %2216 = vmatpush.bf16.msrb.mxu3 %v2911_v44 }
0x1749   :  { %2217 = vmatpush.bf16.msrb.mxu3 %v2921_v53 }
0x174d   :  { %2218 = vmatpush.bf16.msrb.mxu3 %v2931_v62 }
0x1751   :  { %2219 = vmatpush.bf16.msrb.mxu3 %v2943_v11 }
0x17b1   :  { %v1952_v54 = vpop.f32.mrf.mxu0 }
0x17b2   :  { %v1965_v15 = vpop.f32.mrf.mxu1  ;;  %v1970_v36 = vadd.f32 %v1952_v54, %v1927_v18 }
0x17b3   :  { %v1971_v26 = vadd.f32 %v1965_v15, %v1928_v32 }
0x17b7   :  { %v1939_v8 = vpop.f32.mrf.mxu3 }
0x17b8   :  { %v1969_v17 = vadd.f32 %v1939_v8, %v1926_v19 }
0x17b9   :  { %v1954_v27 = vpop.f32.mrf.mxu0 }
0x17ba   :  { %v1972_v9 = vadd.f32 %v1970_v36, %v1969_v17  ;;  %v1967_v35 = vpop.f32.mrf.mxu1 }
0x17bc   :  { %v1973_v47 = vadd.f32 %v1972_v9, %v1971_v26 }
0x17be   :  { %1974 = vadd.xlane.f32.xlu2 %v1973_v47 }
0x17bf   :  { %v1941_v44 = vpop.f32.mrf.mxu3 }
0x1831   :  { %v1975_v53 = vpop.xlane.xlu2 %1974 }
0x1832   :  { %v1976_v48 = vmul.f32 0.0026041667, %v1975_v53 }
0x1834   :  { %v1977_v62 = vsub.f32 %v1969_v17, %v1976_v48  ;;  %v1978_v28 = vsub.f32 %v1970_v36, %v1976_v48  ;;  %v1979_v11 = vsub.f32 %v1971_v26, %v1976_v48 }
0x1836   :  { %v1980_v29 = vmul.f32 %v1977_v62, %v1977_v62  ;;  %v1981_v30 = vmul.f32 %v1978_v28, %v1978_v28  ;;  %v1982_v49 = vmul.f32 %v1979_v11, %v1979_v11 }
0x1838   :  { %v1983_v50 = vadd.f32 %v1981_v30, %v1980_v29  ;;  %v2054_v29 = vld [vmem:[#allocation3 + $0x150] sm:$0xff]  ;;  %v2055_v30 = vld [vmem:[#allocation3 + $0x158] sm:$0xff] }
0x183a   :  { %v1984_v40 = vadd.f32 %v1983_v50, %v1982_v49  ;;  %v2056_v49 = vld [vmem:[#allocation3 + $0x160] sm:$0xff] }
0x183c   :  { %1985 = vadd.xlane.f32.xlu0 %v1984_v40 }
0x18af   :  { %v1986_v23 = vpop.xlane.xlu0 %1985 }
0x18b0   :  { %v1987_v39 = vmul.f32 0.0026041667, %v1986_v23 }
0x18b2   :  { %v1988_v59 = vadd.f32 0.001, %v1987_v39 }
0x18b4   :  { %2650 = vrsqrt.f32 %v1988_v59  ;;  %vm1995_vm0 = vweird.f32 %v1988_v59 }
0x18ba   :  { %v2651_v41 = vpop.eup %2650 }
0x18bb   :  { %v1990_v45 = vmul.f32 %v2651_v41, %v1988_v59  ;;  %vm1996_vm15 = vweird.f32 %v2651_v41 }
0x18bc   :  { %vm1997_vm1 = vmor %vm1995_vm0, %vm1996_vm15 }
0x18bd   :  { %v1991_v63 = vmul.f32 %v2651_v41, %v1990_v45 }
0x18bf   :  { %v1992_v0 = vmul.f32 0.5, %v1991_v63 }
0x18c1   :  { %v1993_v55 = vsub.f32 1.5, %v1992_v0 }
0x18c3   :  { %v1994_v3 = vmul.f32 %v2651_v41, %v1993_v55 }
0x18c5   :  { %v1998_v7 = vsel %vm1997_vm1, %v2651_v41, %v1994_v3 }
0x18c6   :  { %v1999_v12 = vmul.f32 %v1998_v7, %v1977_v62  ;;  %v2001_v16 = vmul.f32 %v1998_v7, %v1979_v11  ;;  %v2000_v6 = vmul.f32 %v1998_v7, %v1978_v28 }
0x18c8   :  { %v2002_v24 = vmul.f32 %v1999_v12, %v3010_v2  ;;  %v2004_v25 = vmul.f32 %v2001_v16, %v3012_v4  ;;  %v2003_v21 = vmul.f32 %v2000_v6, %v3022_v37 }
0x18ca   :  { %v2005_v33 = vadd.f32 %v2002_v24, %v3014_v13  ;;  %v2007_v34 = vadd.f32 %v2004_v25, %v3016_v14  ;;  %v2006_v18 = vadd.f32 %v2003_v21, %v3024_v46 }
0x18cc   :  { %v2453_v42 = vmul.f32 -1.442695, %v2005_v33  ;;  %v2454_v43 = vmul.f32 -1.442695, %v2007_v34 }
0x18ce   :  { %2652 = vpow2.f32 %v2453_v42 }
0x18cf   :  { %2654 = vpow2.f32 %v2454_v43 }
0x18d4   :  { %v2653_v51 = vpop.eup %2652 }
0x18d5   :  { %v2655_v52 = vpop.eup %2654  ;;  %v2011_v60 = vadd.f32 1.0, %v2653_v51 }
0x18d6   :  { %v2032_v61 = vadd.f32 1.0, %v2655_v52 }
0x18d7   :  { %2656 = vrcp.f32 %v2011_v60  ;;  %v2023_v58 = vand.u32 2147483648, %v2011_v60  ;;  %v2021_v1 = vand.u32 2147483647, %v2011_v60  ;;  %vm2017_vm3 = vweird.f32 %v2011_v60 }
0x18d8   :  { %2658 = vrcp.f32 %v2032_v61  ;;  %v2044_v27 = vand.u32 2147483648, %v2032_v61  ;;  %vm2038_vm7 = vweird.f32 %v2032_v61  ;;  %v2042_v26 = vand.u32 2147483647, %v2032_v61 }
0x18d9   :  { %v2024_v15 = vor.u32 1.1754944e-38, %v2023_v58  ;;  %vm2022_vm5 = vcmp.eq.f32.partialorder %v2021_v1, 8.507059e+37 }
0x18da   :  { %v2045_v47 = vor.u32 1.1754944e-38, %v2044_v27  ;;  %vm2043_vm9 = vcmp.eq.f32.partialorder %v2042_v26, 8.507059e+37 }
0x18dd   :  { %v2657_v38 = vpop.eup %2656 }
0x18de   :  { %v2659_v20 = vpop.eup %2658  ;;  %v2013_v56 = vmul.f32 %v2657_v38, %v2011_v60  ;;  %vm2018_vm2 = vweird.f32 %v2657_v38 }
0x18df   :  { %v2034_v10 = vmul.f32 %v2659_v20, %v2032_v61  ;;  %vm2019_vm4 = vmor %vm2017_vm3, %vm2018_vm2  ;;  %vm2039_vm6 = vweird.f32 %v2659_v20 }
0x18e0   :  { %v2014_v57 = vsub.f32 1.0, %v2013_v56  ;;  %vm2040_vm8 = vmor %vm2038_vm7, %vm2039_vm6 }
0x18e1   :  { %v2035_v31 = vsub.f32 1.0, %v2034_v10 }
0x18e2   :  { %v2015_v22 = vmul.f32 %v2657_v38, %v2014_v57 }
0x18e3   :  { %v2036_v8 = vmul.f32 %v2659_v20, %v2035_v31 }
0x18e4   :  { %v2016_v54 = vadd.f32 %v2657_v38, %v2015_v22 }
0x18e5   :  { %v2037_v17 = vadd.f32 %v2659_v20, %v2036_v8 }
0x18e6   :  { %v2020_v19 = vsel %vm2019_vm4, %v2657_v38, %v2016_v54 }
0x18e7   :  { %v2025_v32 = vsel %vm2022_vm5, %v2024_v15, %v2020_v19  ;;  %v2041_v9 = vsel %vm2040_vm8, %v2659_v20, %v2037_v17 }
0x18e8   :  { %v2027_v36 = vmul.f32 %v2025_v32, %v2006_v18  ;;  %v2046_v53 = vsel %vm2043_vm9, %v2045_v47, %v2041_v9 }
0x18ea   :  { %2660 = vtanh.f32 %v2027_v36 }
0x18f0   :  { %v2661_v35 = vpop.eup %2660 }
0x18f1   :  { %v2048_v44 = vsub.f32 %v2661_v35, %v3474_v5 }
0x18f3   :  { %v2049_v48 = vmul.f32 %v2048_v44, %v2046_v53 }
0x18f5   :  { %v3495_v62 = vadd.f32 %v2049_v48, %v3474_v5 }
0x18f7   :  { %2052 = vst [vmem:[#allocation11 + $0x68] sm:$0xff] %v3495_v62  ;;  %v2057_v28 = vpack.c.bf16 %v3495_v62, %v3495_v62 }
0x18f9   :  { %2066 = vmatmul.bf16.vlgmr.msra.gmra.mxu2 %v2057_v28  ;;  %2079 = vmatmul.bf16.vlgmr.msra.gmra.mxu3 %v2057_v28 }
0x18fa   :  { %2092 = vmatmul.bf16.vlgmr.msrb.gmra.mxu0 %v2057_v28 }
0x1977   :  { %v2093_v11 = vpop.f32.mrf.mxu0 }
0x1978   :  { %v2099_v59 = vadd.f32 %v2093_v11, %v2056_v49 }
0x197c   :  { %v2067_v50 = vpop.f32.mrf.mxu2  ;;  %v2080_v40 = vpop.f32.mrf.mxu3 }
0x197d   :  { %v2097_v23 = vadd.f32 %v2067_v50, %v2054_v29  ;;  %v2098_v39 = vadd.f32 %v2080_v40, %v2055_v30 }
0x197f   :  { %v2100_v41 = vadd.f32 %v2098_v39, %v2097_v23  ;;  %v2095_v5 = vpop.f32.mrf.mxu0 }
0x1981   :  { %v2101_v45 = vadd.f32 %v2100_v41, %v2099_v59 }
0x1983   :  { %2102 = vadd.xlane.f32.xlu1 %v2101_v45 }
0x1984   :  { %v2069_v63 = vpop.f32.mrf.mxu2  ;;  %v2082_v0 = vpop.f32.mrf.mxu3 }
0x19f6   :  { %v2103_v55 = vpop.xlane.xlu1 %2102 }
0x19f7   :  { %v2104_v3 = vmul.f32 0.0026041667, %v2103_v55 }
0x19f9   :  { %v2105_v7 = vsub.f32 %v2097_v23, %v2104_v3  ;;  %v2106_v12 = vsub.f32 %v2098_v39, %v2104_v3  ;;  %v2107_v16 = vsub.f32 %v2099_v59, %v2104_v3 }
0x19fb   :  { %v2108_v24 = vmul.f32 %v2105_v7, %v2105_v7  ;;  %v2109_v25 = vmul.f32 %v2106_v12, %v2106_v12  ;;  %v2110_v33 = vmul.f32 %v2107_v16, %v2107_v16 }
0x19fd   :  { %v2111_v34 = vadd.f32 %v2109_v25, %v2108_v24  ;;  %v2182_v24 = vld [vmem:[#allocation3 + $0x168] sm:$0xff]  ;;  %v2183_v25 = vld [vmem:[#allocation3 + $0x170] sm:$0xff] }
0x19ff   :  { %v2112_v42 = vadd.f32 %v2111_v34, %v2110_v33  ;;  %v2184_v34 = vld [vmem:[#allocation3 + $0x178] sm:$0xff] }
0x1a01   :  { %2113 = vadd.xlane.f32.xlu2 %v2112_v42 }
0x1a74   :  { %v2114_v43 = vpop.xlane.xlu2 %2113 }
0x1a75   :  { %v2115_v51 = vmul.f32 0.0026041667, %v2114_v43 }
0x1a77   :  { %v2116_v52 = vadd.f32 0.001, %v2115_v51 }
0x1a79   :  { %2662 = vrsqrt.f32 %v2116_v52  ;;  %vm2123_vm11 = vweird.f32 %v2116_v52 }
0x1a7f   :  { %v2663_v60 = vpop.eup %2662 }
0x1a80   :  { %v2118_v61 = vmul.f32 %v2663_v60, %v2116_v52  ;;  %vm2124_vm10 = vweird.f32 %v2663_v60 }
0x1a81   :  { %vm2125_vm12 = vmor %vm2123_vm11, %vm2124_vm10 }
0x1a82   :  { %v2119_v38 = vmul.f32 %v2663_v60, %v2118_v61 }
0x1a84   :  { %v2120_v20 = vmul.f32 0.5, %v2119_v38 }
0x1a86   :  { %v2121_v6 = vsub.f32 1.5, %v2120_v20 }
0x1a88   :  { %v2122_v56 = vmul.f32 %v2663_v60, %v2121_v6 }
0x1a8a   :  { %v2126_v10 = vsel %vm2125_vm12, %v2663_v60, %v2122_v56 }
0x1a8b   :  { %v2127_v57 = vmul.f32 %v2126_v10, %v2105_v7  ;;  %v2129_v58 = vmul.f32 %v2126_v10, %v2107_v16  ;;  %v2128_v27 = vmul.f32 %v2126_v10, %v2106_v12 }
0x1a8d   :  { %v2130_v21 = vmul.f32 %v2127_v57, %v3010_v2  ;;  %v2132_v22 = vmul.f32 %v2129_v58, %v3012_v4  ;;  %v2131_v44 = vmul.f32 %v2128_v27, %v3022_v37 }
0x1a8f   :  { %v2133_v1 = vadd.f32 %v2130_v21, %v3014_v13  ;;  %v2135_v31 = vadd.f32 %v2132_v22, %v3016_v14  ;;  %v2134_v30 = vadd.f32 %v2131_v44, %v3024_v46 }
0x1a91   :  { %v2455_v54 = vmul.f32 -1.442695, %v2133_v1  ;;  %v2456_v15 = vmul.f32 -1.442695, %v2135_v31 }
0x1a93   :  { %2664 = vpow2.f32 %v2455_v54 }
0x1a94   :  { %2666 = vpow2.f32 %v2456_v15 }
0x1a99   :  { %v2665_v18 = vpop.eup %2664 }
0x1a9a   :  { %v2667_v19 = vpop.eup %2666  ;;  %v2139_v32 = vadd.f32 1.0, %v2665_v18 }
0x1a9b   :  { %v2160_v8 = vadd.f32 1.0, %v2667_v19 }
0x1a9c   :  { %2668 = vrcp.f32 %v2139_v32  ;;  %v2151_v47 = vand.u32 2147483648, %v2139_v32  ;;  %v2149_v48 = vand.u32 2147483647, %v2139_v32  ;;  %vm2145_vm14 = vweird.f32 %v2139_v32 }
0x1a9d   :  { %2670 = vrcp.f32 %v2160_v8  ;;  %v2172_v59 = vand.u32 2147483648, %v2160_v8  ;;  %vm2166_vm2 = vweird.f32 %v2160_v8  ;;  %v2170_v41 = vand.u32 2147483647, %v2160_v8 }
0x1a9e   :  { %v2152_v29 = vor.u32 1.1754944e-38, %v2151_v47  ;;  %vm2150_vm0 = vcmp.eq.f32.partialorder %v2149_v48, 8.507059e+37 }
0x1a9f   :  { %v2173_v63 = vor.u32 1.1754944e-38, %v2172_v59  ;;  %vm2171_vm4 = vcmp.eq.f32.partialorder %v2170_v41, 8.507059e+37 }
0x1aa2   :  { %v2669_v36 = vpop.eup %2668 }
0x1aa3   :  { %v2671_v17 = vpop.eup %2670  ;;  %v2141_v26 = vmul.f32 %v2669_v36, %v2139_v32  ;;  %vm2146_vm13 = vweird.f32 %v2669_v36 }
0x1aa4   :  { %v2162_v9 = vmul.f32 %v2671_v17, %v2160_v8  ;;  %vm2147_vm15 = vmor %vm2145_vm14, %vm2146_vm13  ;;  %vm2167_vm1 = vweird.f32 %v2671_v17 }
0x1aa5   :  { %v2142_v35 = vsub.f32 1.0, %v2141_v26  ;;  %vm2168_vm3 = vmor %vm2166_vm2, %vm2167_vm1 }
0x1aa6   :  { %v2163_v28 = vsub.f32 1.0, %v2162_v9 }
0x1aa7   :  { %v2143_v53 = vmul.f32 %v2669_v36, %v2142_v35 }
0x1aa8   :  { %v2164_v40 = vmul.f32 %v2671_v17, %v2163_v28 }
0x1aa9   :  { %v2144_v11 = vadd.f32 %v2669_v36, %v2143_v53 }
0x1aaa   :  { %v2165_v39 = vadd.f32 %v2671_v17, %v2164_v40 }
0x1aab   :  { %v2148_v49 = vsel %vm2147_vm15, %v2669_v36, %v2144_v11 }
0x1aac   :  { %v2153_v50 = vsel %vm2150_vm0, %v2152_v29, %v2148_v49  ;;  %v2169_v5 = vsel %vm2168_vm3, %v2671_v17, %v2165_v39 }
0x1aad   :  { %v2155_v23 = vmul.f32 %v2153_v50, %v2134_v30  ;;  %v2174_v55 = vsel %vm2171_vm4, %v2173_v63, %v2169_v5 }
0x1aaf   :  { %2672 = vtanh.f32 %v2155_v23 }
0x1ab5   :  { %v2673_v45 = vpop.eup %2672 }
0x1ab6   :  { %v2176_v0 = vsub.f32 %v2673_v45, %v3495_v62 }
0x1ab8   :  { %v2177_v3 = vmul.f32 %v2176_v0, %v2174_v55 }
0x1aba   :  { %v3508_v7 = vadd.f32 %v2177_v3, %v3495_v62 }
0x1abc   :  { %2180 = vst [vmem:[#allocation11 + $0x70] sm:$0xff] %v3508_v7  ;;  %v2185_v12 = vpack.c.bf16 %v3508_v7, %v3508_v7 }
0x1abe   :  { %2194 = vmatmul.bf16.vlgmr.msrb.gmra.mxu1 %v2185_v12  ;;  %2207 = vmatmul.bf16.vlgmr.msrb.gmra.mxu2 %v2185_v12 }
0x1abf   :  { %2220 = vmatmul.bf16.vlgmr.msrb.gmra.mxu3 %v2185_v12 }
0x1b3b   :  { %v2195_v16 = vpop.f32.mrf.mxu1 }
0x1b3c   :  { %v2225_v42 = vadd.f32 %v2195_v16, %v2182_v24 }
0x1b41   :  { %v2208_v33 = vpop.f32.mrf.mxu2 }
0x1b42   :  { %v2226_v43 = vadd.f32 %v2208_v33, %v2183_v25  ;;  %v2221_v51 = vpop.f32.mrf.mxu3 }
0x1b43   :  { %v2197_v52 = vpop.f32.mrf.mxu1  ;;  %v2227_v62 = vadd.f32 %v2221_v51, %v2184_v34 }
0x1b44   :  { %v2228_v60 = vadd.f32 %v2226_v43, %v2225_v42 }
0x1b46   :  { %v2229_v61 = vadd.f32 %v2228_v60, %v2227_v62 }
0x1b48   :  { %2230 = vadd.xlane.f32.xlu0 %v2229_v61 }
0x1b49   :  { %v2210_v38 = vpop.f32.mrf.mxu2 }
0x1b4a   :  { %v2223_v20 = vpop.f32.mrf.mxu3 }
0x1bbb   :  { %v2231_v6 = vpop.xlane.xlu0 %2230 }
0x1bbc   :  { %v2232_v56 = vmul.f32 0.0026041667, %v2231_v6 }
0x1bbe   :  { %v2233_v10 = vsub.f32 %v2225_v42, %v2232_v56  ;;  %v2234_v57 = vsub.f32 %v2226_v43, %v2232_v56  ;;  %v2235_v58 = vsub.f32 %v2227_v62, %v2232_v56 }
0x1bc0   :  { %v2236_v21 = vmul.f32 %v2233_v10, %v2233_v10  ;;  %v2237_v22 = vmul.f32 %v2234_v57, %v2234_v57  ;;  %v2238_v1 = vmul.f32 %v2235_v58, %v2235_v58 }
0x1bc2   :  { %v2239_v31 = vadd.f32 %v2237_v22, %v2236_v21 }
0x1bc4   :  { %v2240_v54 = vadd.f32 %v2239_v31, %v2238_v1 }
0x1bc6   :  { %2241 = vadd.xlane.f32.xlu1 %v2240_v54 }
0x1c39   :  { %v2242_v15 = vpop.xlane.xlu1 %2241 }
0x1c3a   :  { %v2243_v18 = vmul.f32 0.0026041667, %v2242_v15 }
0x1c3c   :  { %v2244_v19 = vadd.f32 0.001, %v2243_v18 }
0x1c3e   :  { %2674 = vrsqrt.f32 %v2244_v19  ;;  %vm2251_vm6 = vweird.f32 %v2244_v19 }
0x1c44   :  { %v2675_v32 = vpop.eup %2674 }
0x1c45   :  { %v2246_v8 = vmul.f32 %v2675_v32, %v2244_v19  ;;  %vm2252_vm5 = vweird.f32 %v2675_v32 }
0x1c46   :  { %vm2253_vm7 = vmor %vm2251_vm6, %vm2252_vm5 }
0x1c47   :  { %v2247_v36 = vmul.f32 %v2675_v32, %v2246_v8 }
0x1c49   :  { %v2248_v17 = vmul.f32 0.5, %v2247_v36 }
0x1c4b   :  { %v2249_v27 = vsub.f32 1.5, %v2248_v17 }
0x1c4d   :  { %v2250_v26 = vmul.f32 %v2675_v32, %v2249_v27 }
0x1c4f   :  { %v2254_v9 = vsel %vm2253_vm7, %v2675_v32, %v2250_v26 }
0x1c50   :  { %v2255_v35 = vmul.f32 %v2254_v9, %v2233_v10  ;;  %v2257_v47 = vmul.f32 %v2254_v9, %v2235_v58  ;;  %v2256_v59 = vmul.f32 %v2254_v9, %v2234_v57 }
0x1c52   :  { %v2258_v44 = vmul.f32 %v2255_v35, %v3010_v2  ;;  %v2260_v53 = vmul.f32 %v2257_v47, %v3012_v4 }
0x1c54   :  { %v2261_v48 = vadd.f32 %v2258_v44, %v3014_v13  ;;  %v2263_v28 = vadd.f32 %v2260_v53, %v3016_v14  ;;  %v2259_v13 = vmul.f32 %v2256_v59, %v3022_v37 }
0x1c56   :  { %v2457_v11 = vmul.f32 -1.442695, %v2261_v48  ;;  %v2458_v29 = vmul.f32 -1.442695, %v2263_v28  ;;  %v2262_v3 = vadd.f32 %v2259_v13, %v3024_v46 }
0x1c58   :  { %2676 = vpow2.f32 %v2457_v11 }
0x1c59   :  { %2678 = vpow2.f32 %v2458_v29 }
0x1c5e   :  { %v2677_v30 = vpop.eup %2676 }
0x1c5f   :  { %v2679_v49 = vpop.eup %2678  ;;  %v2267_v50 = vadd.f32 1.0, %v2677_v30 }
0x1c60   :  { %v2288_v40 = vadd.f32 1.0, %v2679_v49 }
0x1c61   :  { %2680 = vrcp.f32 %v2267_v50  ;;  %v2279_v5 = vand.u32 2147483648, %v2267_v50  ;;  %v2277_v45 = vand.u32 2147483647, %v2267_v50  ;;  %vm2273_vm9 = vweird.f32 %v2267_v50 }
0x1c62   :  { %2682 = vrcp.f32 %v2288_v40  ;;  %v2300_v34 = vand.u32 2147483648, %v2288_v40  ;;  %vm2294_vm13 = vweird.f32 %v2288_v40  ;;  %v2298_v37 = vand.u32 2147483647, %v2288_v40 }
0x1c63   :  { %v2280_v55 = vor.u32 1.1754944e-38, %v2279_v5  ;;  %vm2278_vm11 = vcmp.eq.f32.partialorder %v2277_v45, 8.507059e+37 }
0x1c64   :  { %v2301_v51 = vor.u32 1.1754944e-38, %v2300_v34  ;;  %vm2299_vm15 = vcmp.eq.f32.partialorder %v2298_v37, 8.507059e+37 }
0x1c67   :  { %v2681_v23 = vpop.eup %2680 }
0x1c68   :  { %v2683_v39 = vpop.eup %2682  ;;  %v2269_v2 = vmul.f32 %v2681_v23, %v2267_v50  ;;  %vm2274_vm8 = vweird.f32 %v2681_v23 }
0x1c69   :  { %v2290_v41 = vmul.f32 %v2683_v39, %v2288_v40  ;;  %vm2275_vm10 = vmor %vm2273_vm9, %vm2274_vm8  ;;  %vm2295_vm12 = vweird.f32 %v2683_v39 }
0x1c6a   :  { %v2270_v4 = vsub.f32 1.0, %v2269_v2  ;;  %vm2296_vm14 = vmor %vm2294_vm13, %vm2295_vm12 }
0x1c6b   :  { %v2291_v63 = vsub.f32 1.0, %v2290_v41 }
0x1c6c   :  { %v2271_v14 = vmul.f32 %v2681_v23, %v2270_v4 }
0x1c6d   :  { %v2292_v24 = vmul.f32 %v2683_v39, %v2291_v63 }
0x1c6e   :  { %v2272_v0 = vadd.f32 %v2681_v23, %v2271_v14 }
0x1c6f   :  { %v2293_v33 = vadd.f32 %v2683_v39, %v2292_v24 }
0x1c70   :  { %v2276_v12 = vsel %vm2275_vm10, %v2681_v23, %v2272_v0 }
0x1c71   :  { %v2281_v16 = vsel %vm2278_vm11, %v2280_v55, %v2276_v12  ;;  %v2297_v42 = vsel %vm2296_vm14, %v2683_v39, %v2293_v33 }
0x1c72   :  { %v2283_v25 = vmul.f32 %v2281_v16, %v2262_v3  ;;  %v2302_v46 = vsel %vm2299_vm15, %v2301_v51, %v2297_v42 }
0x1c74   :  { %2684 = vtanh.f32 %v2283_v25 }
0x1c7a   :  { %v2685_v43 = vpop.eup %2684 }
0x1c7b   :  { %v2304_v52 = vsub.f32 %v2685_v43, %v3508_v7 }
0x1c7d   :  { %v2305_v60 = vmul.f32 %v2304_v52, %v2302_v46 }
0x1c7f   :  { %v2306_v62 = vadd.f32 %v2305_v60, %v3508_v7 }
0x1c81   :  { %2308 = vst [vmem:[#allocation11 + $0x78] sm:$0xff] %v2306_v62 }
0x1c82   :  { %2322 = dma.vmem_to_hbm [thread:$0]  %s2315_s15, 2048, %s2317_s18, [#allocation5], %s2823_s19, %s2823_s19, %s2824_s20  }
0x1c83   :  { %2812 = dma.done.wait [#allocation5], 2048  }
0x1c84   :  { %2813 = vsyncadd [#allocation5], 4294965248 }
0x1c85   :  { %2327 = vsyncpa [#allocation4], 1 }
0x1c86   :  { %2328 = vsyncpa [#allocation7], 1 }
0x1c87   :  { %2329 = vsyncpa [#allocation10], 1 }
0x1c88   :  { %2330 = vsyncpa [#allocation5], 1 }

</bundles_post_ra>
